<compile_context>
chip_gen: v5e
topology: v5e:2x2
jax: 0.10.0
libtpu: 0.0.40
codegen_flags: <defaults>
</compile_context>

<pallas_src>
import functools

import jax
import jax.numpy as jnp
import numpy as np
from jax import lax
from jax.experimental import pallas as pl
from jax.experimental.pallas import tpu as pltpu


def _silu(v):
    return v * jax.nn.sigmoid(v)


def ggb_kernel(minmax_ref,        # (2,)  f32 SMEM: [global xmin, global xmax]
               x_ref,             # (TB, F)   f32
               alpha_t_ref,       # (F, F)    f32   silu(alpha).T   (for xn @ silu(alpha).T)
               alpha2_ref,        # (F, F)    f32   2*silu(alpha)   (for prev @ (2*alpha))
               a2sum_ref,         # (1, F)    f32   ones @ (2*silu(alpha))  (n==1 step)
               gbias_ref,         # (1, F)    f32
               fused_wt_ref,      # ((order+1)*F, H) mxu dtype  [base_w.T ; poly_w_t(k>=1)]
               p0b_ref,           # (1, H)    f32   P0 (all-ones) contribution of poly_w
               ln_g_ref,          # (1, H)    f32
               ln_b_ref,          # (1, H)    f32
               lin_wt_ref,        # (H, OUT_PAD) mxu dtype (zero-padded, pre-transposed)
               lin_b_ref,         # (1, OUT_PAD) f32 (zero-padded)
               out_ref,           # (TB, OUT_PAD)
               *, order, mxu_dtype):
    f32 = jnp.float32
    x = x_ref[...].astype(f32)                                   # (TB, F)
    sx = _silu(x)                                                # base-branch activation

    # ---- global min/max normalization (reduction hoisted out of the kernel) ----
    xmin = minmax_ref[0]
    xmax = minmax_ref[1]
    xn = 2.0 * (x - xmin) / (xmax - xmin + 1e-8) - 1.0           # (TB, F), f32

    # ---- Gegenbauer polynomial recurrence (all F x F matmuls in f32) ----
    xn_aT = jnp.dot(xn, alpha_t_ref[...], preferred_element_type=f32)   # xn @ silu(alpha).T
    P1 = 2.0 * (xn_aT + gbias_ref[...])
    polys = [jnp.ones_like(xn), P1]                              # P0 kept only for the recurrence
    for n in range(1, order):
        first = 2.0 * (n * xn + xn_aT) * polys[-1]
        prev = polys[-2]
        if n == 1:
            # prev is all-ones and (n-1)==0:  second = ones @ (2*silu(alpha))  (precomputed)
            second = a2sum_ref[...]
        else:
            # prev @ ((n-1) I + 2 alpha)  ==  (n-1)*prev + prev @ (2 alpha)
            second = (n - 1.0) * prev + jnp.dot(prev, alpha2_ref[...],
                                                preferred_element_type=f32)
        polys.append((first - second) / (n + 1.0))

    # ---- fused base + poly projection: ONE matmul, K = (order+1)*F (=128) ----
    # P0's contribution is the precomputed bias p0b; basis = [SiLU(x), P1..P_order].
    basis = jnp.concatenate([sx] + polys[1:], axis=-1).astype(mxu_dtype)  # (TB, (order+1)*F)
    z = jnp.dot(basis, fused_wt_ref[...], preferred_element_type=f32) + p0b_ref[...]  # (TB, H)

    # ---- LayerNorm(base_out + poly_out) + SiLU, in f32 ----
    mean = jnp.mean(z, axis=-1, keepdims=True)
    var = jnp.mean((z - mean) ** 2, axis=-1, keepdims=True)
    zn = (z - mean) * lax.rsqrt(var + 1e-5)
    zn = zn * ln_g_ref[...] + ln_b_ref[...]
    h = _silu(zn)
    # TODO(synk): nn.Dropout is identity in eval mode; training-mode dropout not implemented.

    # ---- final Linear into the lane-dense zero-padded output ----
    out = jnp.dot(h.astype(mxu_dtype), lin_wt_ref[...],
                  preferred_element_type=f32) + lin_b_ref[...]
    out_ref[...] = out.astype(out_ref.dtype)


def prepare_params(raw, *, order, mxu_dtype=jnp.bfloat16):
    """Host-side one-time re-layout of the PyTorch-convention parameters.

    * SiLU(alpha) is applied once here; silu(alpha).T, 2*silu(alpha) and the
      column-sum row ones@(2*silu(alpha)) are precomputed (f32).
    * poly_w (H, F*(order+1)) with interleaved columns (col = f*(order+1)+k):
        - k==0 block (times all-ones P0) is folded into a (1,H) bias `p0_bias`.
        - k>=1 blocks are re-laid out order-major and stacked below base_w.T to
          form one ((order+1)*F, H) matrix contracted against
          concat([SiLU(x), P1..P_order]) in a single matmul.
    * lin_w / lin_b are zero-padded to OUT_PAD (multiple of 128) columns so the
      kernel's output store is lane-dense (no masked partial stores).
    * MXU weights for the two big matmuls are stored in `mxu_dtype` (bf16 default);
      the F x F recurrence operands and all element-wise params stay f32.
    """
    assert order >= 1
    base_w = jnp.asarray(raw["base_w"], jnp.float32)
    poly_w = jnp.asarray(raw["poly_w"], jnp.float32)
    H, F = base_w.shape
    OUT = raw["lin_w"].shape[0]
    OUT_PAD = ((OUT + 127) // 128) * 128

    poly_w3 = poly_w.reshape(H, F, order + 1)                    # [h, f, k]
    p0_bias = poly_w3[:, :, 0].sum(axis=1).reshape(1, H)         # P0 (all-ones) folded in
    poly_k_t = (poly_w3[:, :, 1:]                                # [h, f, k>=1]
                .transpose(2, 1, 0)                              # [k, f, h]
                .reshape(order * F, H))                          # row = (k-1)*F + f
    fused_w_t = jnp.concatenate([base_w.T, poly_k_t], axis=0)    # ((order+1)*F, H)

    alpha = _silu(jnp.asarray(raw["alpha_w"], jnp.float32))      # SiLU(alpha), hoisted
    alpha2 = 2.0 * alpha

    lin_w_t = jnp.zeros((H, OUT_PAD), jnp.float32).at[:, :OUT].set(
        jnp.asarray(raw["lin_w"], jnp.float32).T)
    lin_b = jnp.zeros((1, OUT_PAD), jnp.float32).at[:, :OUT].set(
        jnp.asarray(raw["lin_b"], jnp.float32).reshape(1, OUT))

    return dict(
        alpha_t=alpha.T,                                         # (F, F) f32
        alpha2=alpha2,                                           # (F, F) f32
        alpha2_colsum=alpha2.sum(axis=0).reshape(1, F),          # (1, F) f32
        g_bias=jnp.asarray(raw["g_bias"], jnp.float32).reshape(1, F),
        fused_w_t=fused_w_t.astype(mxu_dtype),                   # ((order+1)*F, H)
        p0_bias=p0_bias,                                         # (1, H) f32
        ln_g=jnp.asarray(raw["ln_g"], jnp.float32).reshape(1, H),
        ln_b=jnp.asarray(raw["ln_b"], jnp.float32).reshape(1, H),
        lin_w_t=lin_w_t.astype(mxu_dtype),                       # (H, OUT_PAD)
        lin_b=lin_b,                                             # (1, OUT_PAD) f32
        out_features=OUT,
    )


def ggb_linear_forward(x, params, *, order, block_b=None, minmax=None):
    """Runs the fused GGB_linear forward.

    block_b: batch tile.  Default (None) -> one big step up to 4096 rows, best on
    single-TC v5e/v6e (avoids ~0.35us/step grid overhead).  On v7x pass roughly
    B // 2 (multiple of 8) so the "parallel" batch axis feeds both TensorCores.
    minmax: optional precomputed (2,) [min(x), max(x)] to avoid a second HBM pass
    over x when its producer can fuse the reduce.
    """
    assert order >= 1
    B, F = x.shape
    KF, H = params["fused_w_t"].shape
    OUT_PAD = params["lin_w_t"].shape[1]
    OUT = params["out_features"]
    mxu_dtype = params["fused_w_t"].dtype

    if minmax is None:
        # Global min/max spans the WHOLE batch (matches PyTorch x.min()/x.max()).
        # TODO(synk): for large B, fuse this reduce into x's producer instead.
        minmax = jnp.stack([jnp.min(x), jnp.max(x)]).astype(jnp.float32)   # (2,)

    if block_b is None:
        block_b = 4096
    tb = min(block_b, B)
    if tb < B:
        tb = max(8, (tb // 8) * 8)      # (8,128) sublane constraint for partial tiles
    grid = (pl.cdiv(B, tb),)

    def block_rows(i):
        return (i, 0)

    def whole(i):
        return (0, 0)

    def resident(arr):
        # Full-array VMEM block whose block index never changes -> DMA'd once,
        # stays VMEM-resident across all grid iterations.
        return pl.BlockSpec(arr.shape, whole)

    in_specs = [
        pl.BlockSpec(memory_space=pltpu.MemorySpace.SMEM),   # minmax scalars
        pl.BlockSpec((tb, F), block_rows),                   # x, tiled over batch
        resident(params["alpha_t"]),
        resident(params["alpha2"]),
        resident(params["alpha2_colsum"]),
        resident(params["g_bias"]),
        resident(params["fused_w_t"]),
        resident(params["p0_bias"]),
        resident(params["ln_g"]),
        resident(params["ln_b"]),
        resident(params["lin_w_t"]),
        resident(params["lin_b"]),
    ]
    out_spec = pl.BlockSpec((tb, OUT_PAD), block_rows)

    # Advisory cost estimate for the XLA scheduler.
    flops = 2 * B * (order * F * F + KF * H + H * OUT_PAD)
    transcendentals = B * (2 * F + H)
    param_keys = ("alpha_t", "alpha2", "alpha2_colsum", "g_bias", "fused_w_t",
                  "p0_bias", "ln_g", "ln_b", "lin_w_t", "lin_b")
    bytes_accessed = int(
        x.size * x.dtype.itemsize + B * OUT_PAD * x.dtype.itemsize
        + sum(int(np.prod(params[k].shape)) * params[k].dtype.itemsize
              for k in param_keys))

    kernel = functools.partial(ggb_kernel, order=order, mxu_dtype=mxu_dtype)
    out_pad = pl.pallas_call(
        kernel,
        out_shape=jax.ShapeDtypeStruct((B, OUT_PAD), x.dtype),
        grid=grid,
        in_specs=in_specs,
        out_specs=out_spec,
        compiler_params=pltpu.CompilerParams(
            dimension_semantics=("parallel",)),   # megacore sharding on v7x; no-op on v5e/v6e
        cost_estimate=pl.CostEstimate(flops=int(flops),
                                      transcendentals=int(transcendentals),
                                      bytes_accessed=bytes_accessed),
    )(minmax, x, params["alpha_t"], params["alpha2"], params["alpha2_colsum"],
      params["g_bias"], params["fused_w_t"], params["p0_bias"],
      params["ln_g"], params["ln_b"], params["lin_w_t"], params["lin_b"])
    return out_pad[:, :OUT]


def reference_forward(x, raw, *, order):
    """Pure-JAX f32 reference mirroring the PyTorch module (eval mode, args['bias']=True)."""
    base_out = _silu(x) @ raw["base_w"].T
    xn = 2.0 * (x - x.min()) / (x.max() - x.min() + 1e-8) - 1.0
    alpha = _silu(raw["alpha_w"])
    P0 = jnp.ones_like(xn)
    P1 = 2.0 * (xn @ alpha.T + raw["g_bias"][0])
    polys = [P0, P1]
    F_ = x.shape[1]
    for n in range(1, order):
        first = 2.0 * (n * xn + xn @ alpha.T) * polys[-1]
        second = polys[-2] @ ((n - 1) * jnp.eye(F_) + 2.0 * alpha)
        polys.append((first - second) / (n + 1))
    basis = jnp.stack(polys, axis=-1).reshape(x.shape[0], -1)
    poly_out = basis @ raw["poly_w"].T
    z = base_out + poly_out
    mean = jnp.mean(z, axis=-1, keepdims=True)
    var = jnp.mean((z - mean) ** 2, axis=-1, keepdims=True)
    zn = (z - mean) / jnp.sqrt(var + 1e-5) * raw["ln_g"][0] + raw["ln_b"][0]
    h = _silu(zn)
    return h @ raw["lin_w"].T + raw["lin_b"][0]


if __name__ == "__main__":
    # Shapes consistent with the module: x is (batch, in_features).
    B, IN_F, OUT_F, ORDER = 256, 32, 16, 3
    H = IN_F  # hidden_size == in_features

    key = jax.random.PRNGKey(0)
    ks = jax.random.split(key, 8)
    x = jax.random.normal(ks[0], (B, IN_F), dtype=jnp.float32)

    # Deterministic parameter init (shapes from __init__); kaiming/xavier-ish scales.
    base_w = jax.random.uniform(ks[1], (H, IN_F), minval=-1.0, maxval=1.0) * (3.0 / IN_F) ** 0.5
    poly_w = jax.random.uniform(ks[2], (H, IN_F * (ORDER + 1)), minval=-1.0, maxval=1.0) \
        * (3.0 / (IN_F * (ORDER + 1))) ** 0.5
    alpha_w = jax.random.uniform(ks[3], (IN_F, IN_F), minval=-1.0, maxval=1.0) * (6.0 / (2 * IN_F)) ** 0.5
    g_bias = jax.random.uniform(ks[4], (1, IN_F), minval=-1.0, maxval=1.0) * 0.1
    ln_g = jnp.ones((1, H), jnp.float32)
    ln_b = jnp.zeros((1, H), jnp.float32)
    lin_w = jax.random.uniform(ks[5], (OUT_F, H), minval=-1.0, maxval=1.0) * (1.0 / H) ** 0.5
    lin_b = jax.random.uniform(ks[6], (1, OUT_F), minval=-1.0, maxval=1.0) * (1.0 / H) ** 0.5

    raw = dict(base_w=base_w, poly_w=poly_w, alpha_w=alpha_w, g_bias=g_bias,
               ln_g=ln_g, ln_b=ln_b, lin_w=lin_w, lin_b=lin_b)

    ref = np.asarray(reference_forward(x, raw, order=ORDER))

    # 1) Exact-math check: f32 MXU operands, single grid step (v5e/v6e-style config).
    #    Validates the host re-layouts (fused K=128 basis weight, P0 bias fold,
    #    hoisted SiLU(alpha), lane-dense padded output) and the recurrence rewrite.
    params_f32 = prepare_params(raw, order=ORDER, mxu_dtype=jnp.float32)
    out_f32 = jax.block_until_ready(
        ggb_linear_forward(x, params_f32, order=ORDER, block_b=B))
    np.testing.assert_allclose(np.asarray(out_f32), ref, rtol=2e-3, atol=2e-3)

    # 2) Performance configuration: bf16 operands for the two big matmuls (f32
    #    accumulation, f32 recurrence + element-wise math), two-step "parallel"
    #    grid (v7x-style config exercising the pipelined path).
    params_bf16 = prepare_params(raw, order=ORDER, mxu_dtype=jnp.bfloat16)
    out_bf16 = jax.block_until_ready(
        ggb_linear_forward(x, params_bf16, order=ORDER, block_b=128))
    max_err = np.max(np.abs(np.asarray(out_bf16) - ref))
    assert np.isfinite(max_err) and max_err <= 5e-2 * (np.max(np.abs(ref)) + 1.0), \
        f"bf16-MXU output error too large: {max_err}"

    print("KERNEL_OK")
</pallas_src>

<mosaic_0001>
module attributes {stable_mosaic.version = 11 : i64} {
  func.func @ggb_kernel(%arg0: i32, %arg1: memref<2xf32, #tpu.memory_space<smem>>, %arg2: memref<256x32xf32, #tpu.memory_space<vmem>>, %arg3: memref<32x32xf32, #tpu.memory_space<vmem>>, %arg4: memref<32x32xf32, #tpu.memory_space<vmem>>, %arg5: memref<1x32xf32, #tpu.memory_space<vmem>>, %arg6: memref<1x32xf32, #tpu.memory_space<vmem>>, %arg7: memref<128x32xf32, #tpu.memory_space<vmem>>, %arg8: memref<1x32xf32, #tpu.memory_space<vmem>>, %arg9: memref<1x32xf32, #tpu.memory_space<vmem>>, %arg10: memref<1x32xf32, #tpu.memory_space<vmem>>, %arg11: memref<32x128xf32, #tpu.memory_space<vmem>>, %arg12: memref<1x128xf32, #tpu.memory_space<vmem>>, %arg13: memref<256x128xf32, #tpu.memory_space<vmem>>) attributes {dimension_semantics = [#tpu.dimension_semantics<parallel>], iteration_bounds = array<i64: 1>, scalar_prefetch = 0 : i64, scratch_operands = 0 : i64, tpu.core_type = #tpu.core_type<tc>, window_params = [{transform_indices = @transform_0, window_bounds = array<i64: 2>}, {transform_indices = @transform_1, window_bounds = array<i64: 256, 32>}, {pipeline_mode = #tpu.pipeline_mode<synchronous>, transform_indices = @transform_2, window_bounds = array<i64: 32, 32>}, {pipeline_mode = #tpu.pipeline_mode<synchronous>, transform_indices = @transform_3, window_bounds = array<i64: 32, 32>}, {pipeline_mode = #tpu.pipeline_mode<synchronous>, transform_indices = @transform_4, window_bounds = array<i64: 1, 32>}, {pipeline_mode = #tpu.pipeline_mode<synchronous>, transform_indices = @transform_5, window_bounds = array<i64: 1, 32>}, {pipeline_mode = #tpu.pipeline_mode<synchronous>, transform_indices = @transform_6, window_bounds = array<i64: 128, 32>}, {pipeline_mode = #tpu.pipeline_mode<synchronous>, transform_indices = @transform_7, window_bounds = array<i64: 1, 32>}, {pipeline_mode = #tpu.pipeline_mode<synchronous>, transform_indices = @transform_8, window_bounds = array<i64: 1, 32>}, {pipeline_mode = #tpu.pipeline_mode<synchronous>, transform_indices = @transform_9, window_bounds = array<i64: 1, 32>}, {pipeline_mode = #tpu.pipeline_mode<synchronous>, transform_indices = @transform_10, window_bounds = array<i64: 32, 128>}, {pipeline_mode = #tpu.pipeline_mode<synchronous>, transform_indices = @transform_11, window_bounds = array<i64: 1, 128>}, {transform_indices = @transform_12, window_bounds = array<i64: 256, 128>}]} {
    %c0 = arith.constant 0 : index
    %c0_0 = arith.constant 0 : index
    %0 = vector.load %arg2[%c0, %c0_0] : memref<256x32xf32, #tpu.memory_space<vmem>>, vector<256x32xf32>
    %1 = arith.negf %0 : vector<256x32xf32>
    %2 = math.exp %1 : vector<256x32xf32>
    %cst = arith.constant 1.000000e+00 : f32
    %3 = vector.broadcast %cst : f32 to vector<256x32xf32>
    %4 = arith.addf %3, %2 : vector<256x32xf32>
    %5 = arith.divf %3, %4 : vector<256x32xf32>
    %6 = arith.mulf %0, %5 : vector<256x32xf32>
    %c0_1 = arith.constant 0 : index
    %7 = memref.load %arg1[%c0_1] : memref<2xf32, #tpu.memory_space<smem>>
    %c1 = arith.constant 1 : index
    %8 = memref.load %arg1[%c1] : memref<2xf32, #tpu.memory_space<smem>>
    %9 = vector.broadcast %7 : f32 to vector<256x32xf32>
    %10 = arith.subf %0, %9 : vector<256x32xf32>
    %cst_2 = arith.constant 2.000000e+00 : f32
    %11 = vector.broadcast %cst_2 : f32 to vector<256x32xf32>
    %12 = arith.mulf %11, %10 : vector<256x32xf32>
    %13 = arith.subf %8, %7 : f32
    %cst_3 = arith.constant 9.99999993E-9 : f32
    %14 = arith.addf %13, %cst_3 : f32
    %15 = vector.broadcast %14 : f32 to vector<256x32xf32>
    %16 = arith.divf %12, %15 : vector<256x32xf32>
    %cst_4 = arith.constant 1.000000e+00 : f32
    %17 = vector.broadcast %cst_4 : f32 to vector<256x32xf32>
    %18 = arith.subf %16, %17 : vector<256x32xf32>
    %c0_5 = arith.constant 0 : index
    %c0_6 = arith.constant 0 : index
    %19 = vector.load %arg3[%c0_5, %c0_6] : memref<32x32xf32, #tpu.memory_space<vmem>>, vector<32x32xf32>
    %cst_7 = arith.constant dense<0.000000e+00> : vector<256x32xf32>
    %20 = tpu.matmul %18, %19, %cst_7 {dimension_numbers = #tpu.dot_dimension_numbers<[1], [0], [0], [1], [0, 0, 1, 1], [], []>} : vector<256x32xf32>, vector<32x32xf32>, vector<256x32xf32> -> vector<256x32xf32>
    %c0_8 = arith.constant 0 : index
    %c0_9 = arith.constant 0 : index
    %21 = vector.load %arg6[%c0_8, %c0_9] : memref<1x32xf32, #tpu.memory_space<vmem>>, vector<1x32xf32>
    %22 = vector.broadcast %21 : vector<1x32xf32> to vector<256x32xf32>
    %23 = arith.addf %20, %22 : vector<256x32xf32>
    %cst_10 = arith.constant 2.000000e+00 : f32
    %24 = vector.broadcast %cst_10 : f32 to vector<256x32xf32>
    %25 = arith.mulf %24, %23 : vector<256x32xf32>
    %cst_11 = arith.constant 1.000000e+00 : f32
    %26 = vector.broadcast %cst_11 : f32 to vector<256x32xf32>
    %27 = arith.mulf %26, %18 : vector<256x32xf32>
    %28 = arith.addf %27, %20 : vector<256x32xf32>
    %cst_12 = arith.constant 2.000000e+00 : f32
    %29 = vector.broadcast %cst_12 : f32 to vector<256x32xf32>
    %30 = arith.mulf %29, %28 : vector<256x32xf32>
    %31 = arith.mulf %30, %25 : vector<256x32xf32>
    %c0_13 = arith.constant 0 : index
    %c0_14 = arith.constant 0 : index
    %32 = vector.load %arg5[%c0_13, %c0_14] : memref<1x32xf32, #tpu.memory_space<vmem>>, vector<1x32xf32>
    %33 = vector.broadcast %32 : vector<1x32xf32> to vector<256x32xf32>
    %34 = arith.subf %31, %33 : vector<256x32xf32>
    %cst_15 = arith.constant 2.000000e+00 : f32
    %35 = vector.broadcast %cst_15 : f32 to vector<256x32xf32>
    %36 = arith.divf %34, %35 : vector<256x32xf32>
    %cst_16 = arith.constant 2.000000e+00 : f32
    %37 = vector.broadcast %cst_16 : f32 to vector<256x32xf32>
    %38 = arith.mulf %37, %18 : vector<256x32xf32>
    %39 = arith.addf %38, %20 : vector<256x32xf32>
    %cst_17 = arith.constant 2.000000e+00 : f32
    %40 = vector.broadcast %cst_17 : f32 to vector<256x32xf32>
    %41 = arith.mulf %40, %39 : vector<256x32xf32>
    %42 = arith.mulf %41, %36 : vector<256x32xf32>
    %cst_18 = arith.constant 1.000000e+00 : f32
    %43 = vector.broadcast %cst_18 : f32 to vector<256x32xf32>
    %44 = arith.mulf %43, %25 : vector<256x32xf32>
    %c0_19 = arith.constant 0 : index
    %c0_20 = arith.constant 0 : index
    %45 = vector.load %arg4[%c0_19, %c0_20] : memref<32x32xf32, #tpu.memory_space<vmem>>, vector<32x32xf32>
    %cst_21 = arith.constant dense<0.000000e+00> : vector<256x32xf32>
    %46 = tpu.matmul %25, %45, %cst_21 {dimension_numbers = #tpu.dot_dimension_numbers<[1], [0], [0], [1], [0, 0, 1, 1], [], []>} : vector<256x32xf32>, vector<32x32xf32>, vector<256x32xf32> -> vector<256x32xf32>
    %47 = arith.addf %44, %46 : vector<256x32xf32>
    %48 = arith.subf %42, %47 : vector<256x32xf32>
    %cst_22 = arith.constant 3.000000e+00 : f32
    %49 = vector.broadcast %cst_22 : f32 to vector<256x32xf32>
    %50 = arith.divf %48, %49 : vector<256x32xf32>
    %51 = tpu.concatenate %6, %25, %36, %50 in 1 : vector<256x32xf32>, vector<256x32xf32>, vector<256x32xf32>, vector<256x32xf32> -> vector<256x128xf32>
    %c0_23 = arith.constant 0 : index
    %c0_24 = arith.constant 0 : index
    %52 = vector.load %arg7[%c0_23, %c0_24] : memref<128x32xf32, #tpu.memory_space<vmem>>, vector<128x32xf32>
    %cst_25 = arith.constant dense<0.000000e+00> : vector<256x32xf32>
    %53 = tpu.matmul %51, %52, %cst_25 {dimension_numbers = #tpu.dot_dimension_numbers<[1], [0], [0], [1], [0, 0, 1, 1], [], []>} : vector<256x128xf32>, vector<128x32xf32>, vector<256x32xf32> -> vector<256x32xf32>
    %c0_26 = arith.constant 0 : index
    %c0_27 = arith.constant 0 : index
    %54 = vector.load %arg8[%c0_26, %c0_27] : memref<1x32xf32, #tpu.memory_space<vmem>>, vector<1x32xf32>
    %55 = vector.broadcast %54 : vector<1x32xf32> to vector<256x32xf32>
    %56 = arith.addf %53, %55 : vector<256x32xf32>
    %cst_28 = arith.constant dense<0.000000e+00> : vector<256xf32>
    %57 = vector.multi_reduction <add>, %56, %cst_28 [1] : vector<256x32xf32> to vector<256xf32>
    %58 = vector.shape_cast %57 : vector<256xf32> to vector<256x1xf32>
    %cst_29 = arith.constant 3.200000e+01 : f32
    %59 = vector.broadcast %cst_29 : f32 to vector<256x1xf32>
    %60 = arith.divf %58, %59 : vector<256x1xf32>
    %61 = vector.broadcast %60 : vector<256x1xf32> to vector<256x32xf32>
    %62 = arith.subf %56, %61 : vector<256x32xf32>
    %63 = arith.mulf %62, %62 : vector<256x32xf32>
    %cst_30 = arith.constant dense<0.000000e+00> : vector<256xf32>
    %64 = vector.multi_reduction <add>, %63, %cst_30 [1] : vector<256x32xf32> to vector<256xf32>
    %65 = vector.shape_cast %64 : vector<256xf32> to vector<256x1xf32>
    %cst_31 = arith.constant 3.200000e+01 : f32
    %66 = vector.broadcast %cst_31 : f32 to vector<256x1xf32>
    %67 = arith.divf %65, %66 : vector<256x1xf32>
    %68 = vector.broadcast %60 : vector<256x1xf32> to vector<256x32xf32>
    %69 = arith.subf %56, %68 : vector<256x32xf32>
    %cst_32 = arith.constant 9.99999974E-6 : f32
    %70 = vector.broadcast %cst_32 : f32 to vector<256x1xf32>
    %71 = arith.addf %67, %70 : vector<256x1xf32>
    %72 = math.rsqrt %71 : vector<256x1xf32>
    %73 = vector.broadcast %72 : vector<256x1xf32> to vector<256x32xf32>
    %74 = arith.mulf %69, %73 : vector<256x32xf32>
    %c0_33 = arith.constant 0 : index
    %c0_34 = arith.constant 0 : index
    %75 = vector.load %arg9[%c0_33, %c0_34] : memref<1x32xf32, #tpu.memory_space<vmem>>, vector<1x32xf32>
    %76 = vector.broadcast %75 : vector<1x32xf32> to vector<256x32xf32>
    %77 = arith.mulf %74, %76 : vector<256x32xf32>
    %c0_35 = arith.constant 0 : index
    %c0_36 = arith.constant 0 : index
    %78 = vector.load %arg10[%c0_35, %c0_36] : memref<1x32xf32, #tpu.memory_space<vmem>>, vector<1x32xf32>
    %79 = vector.broadcast %78 : vector<1x32xf32> to vector<256x32xf32>
    %80 = arith.addf %77, %79 : vector<256x32xf32>
    %81 = arith.negf %80 : vector<256x32xf32>
    %82 = math.exp %81 : vector<256x32xf32>
    %cst_37 = arith.constant 1.000000e+00 : f32
    %83 = vector.broadcast %cst_37 : f32 to vector<256x32xf32>
    %84 = arith.addf %83, %82 : vector<256x32xf32>
    %85 = arith.divf %83, %84 : vector<256x32xf32>
    %86 = arith.mulf %80, %85 : vector<256x32xf32>
    %c0_38 = arith.constant 0 : index
    %c0_39 = arith.constant 0 : index
    %87 = vector.load %arg11[%c0_38, %c0_39] : memref<32x128xf32, #tpu.memory_space<vmem>>, vector<32x128xf32>
    %cst_40 = arith.constant dense<0.000000e+00> : vector<256x128xf32>
    %88 = tpu.matmul %86, %87, %cst_40 {dimension_numbers = #tpu.dot_dimension_numbers<[1], [0], [0], [1], [0, 0, 1, 1], [], []>} : vector<256x32xf32>, vector<32x128xf32>, vector<256x128xf32> -> vector<256x128xf32>
    %c0_41 = arith.constant 0 : index
    %c0_42 = arith.constant 0 : index
    %89 = vector.load %arg12[%c0_41, %c0_42] : memref<1x128xf32, #tpu.memory_space<vmem>>, vector<1x128xf32>
    %90 = vector.broadcast %89 : vector<1x128xf32> to vector<256x128xf32>
    %91 = arith.addf %88, %90 : vector<256x128xf32>
    %c0_43 = arith.constant 0 : index
    %c0_44 = arith.constant 0 : index
    %92 = vector.load %arg13[%c0_43, %c0_44] : memref<256x128xf32, #tpu.memory_space<vmem>>, vector<256x128xf32>
    tpu.vector_store %arg13[%c0_43, %c0_44], %91 {strides = array<i32>} : memref<256x128xf32, #tpu.memory_space<vmem>>, vector<256x128xf32>,
    return
  }
  func.func @transform_0(%arg0: i32) -> i32 {
    %c0_i32 = arith.constant 0 : i32
    %c0_i32_0 = arith.constant 0 : i32
    return %c0_i32 : i32
  }
  func.func @transform_1(%arg0: i32) -> (i32, i32) {
    %c0_i32 = arith.constant 0 : i32
    %c0_i32_0 = arith.constant 0 : i32
    return %arg0, %c0_i32 : i32, i32
  }
  func.func @transform_2(%arg0: i32) -> (i32, i32) {
    %c0_i32 = arith.constant 0 : i32
    %c0_i32_0 = arith.constant 0 : i32
    %c0_i32_1 = arith.constant 0 : i32
    return %c0_i32, %c0_i32_0 : i32, i32
  }
  func.func @transform_3(%arg0: i32) -> (i32, i32) {
    %c0_i32 = arith.constant 0 : i32
    %c0_i32_0 = arith.constant 0 : i32
    %c0_i32_1 = arith.constant 0 : i32
    return %c0_i32, %c0_i32_0 : i32, i32
  }
  func.func @transform_4(%arg0: i32) -> (i32, i32) {
    %c0_i32 = arith.constant 0 : i32
    %c0_i32_0 = arith.constant 0 : i32
    %c0_i32_1 = arith.constant 0 : i32
    return %c0_i32, %c0_i32_0 : i32, i32
  }
  func.func @transform_5(%arg0: i32) -> (i32, i32) {
    %c0_i32 = arith.constant 0 : i32
    %c0_i32_0 = arith.constant 0 : i32
    %c0_i32_1 = arith.constant 0 : i32
    return %c0_i32, %c0_i32_0 : i32, i32
  }
  func.func @transform_6(%arg0: i32) -> (i32, i32) {
    %c0_i32 = arith.constant 0 : i32
    %c0_i32_0 = arith.constant 0 : i32
    %c0_i32_1 = arith.constant 0 : i32
    return %c0_i32, %c0_i32_0 : i32, i32
  }
  func.func @transform_7(%arg0: i32) -> (i32, i32) {
    %c0_i32 = arith.constant 0 : i32
    %c0_i32_0 = arith.constant 0 : i32
    %c0_i32_1 = arith.constant 0 : i32
    return %c0_i32, %c0_i32_0 : i32, i32
  }
  func.func @transform_8(%arg0: i32) -> (i32, i32) {
    %c0_i32 = arith.constant 0 : i32
    %c0_i32_0 = arith.constant 0 : i32
    %c0_i32_1 = arith.constant 0 : i32
    return %c0_i32, %c0_i32_0 : i32, i32
  }
  func.func @transform_9(%arg0: i32) -> (i32, i32) {
    %c0_i32 = arith.constant 0 : i32
    %c0_i32_0 = arith.constant 0 : i32
    %c0_i32_1 = arith.constant 0 : i32
    return %c0_i32, %c0_i32_0 : i32, i32
  }
  func.func @transform_10(%arg0: i32) -> (i32, i32) {
    %c0_i32 = arith.constant 0 : i32
    %c0_i32_0 = arith.constant 0 : i32
    %c0_i32_1 = arith.constant 0 : i32
    return %c0_i32, %c0_i32_0 : i32, i32
  }
  func.func @transform_11(%arg0: i32) -> (i32, i32) {
    %c0_i32 = arith.constant 0 : i32
    %c0_i32_0 = arith.constant 0 : i32
    %c0_i32_1 = arith.constant 0 : i32
    return %c0_i32, %c0_i32_0 : i32, i32
  }
  func.func @transform_12(%arg0: i32) -> (i32, i32) {
    %c0_i32 = arith.constant 0 : i32
    %c0_i32_0 = arith.constant 0 : i32
    return %arg0, %c0_i32 : i32, i32
  }
}

</mosaic_0001>

<bundles_post_ra>
// kernel: tpu_custom_call.1
= control target key start
LH: loop header
LB: loop body
LE: loop exit
PB: predicated region body
PF: predicated region fallthrough
CT: control target
= control target key end

     0   :  { %17 = vsyncpa [#allocation4], 0  ;;  %s8332_s0 = inlined_call_operand.vmem [shape: f32[2], index: 0, kind: input, shape index: {}]   ;;  %s8333_s1 = inlined_call_operand.vmem [shape: f32[256,32], index: 1, kind: input, shape index: {}]   ;;  %s8334_s2 = inlined_call_operand.vmem [shape: f32[32,32], index: 2, kind: input, shape index: {}]   ;;  %s8335_s3 = inlined_call_operand.vmem [shape: f32[32,32], index: 3, kind: input, shape index: {}]   ;;  %s8336_s4 = inlined_call_operand.vmem [shape: f32[1,32], index: 4, kind: input, shape index: {}]   ;;  %s8337_s5 = inlined_call_operand.vmem [shape: f32[1,32], index: 5, kind: input, shape index: {}]   ;;  %s8338_s6 = inlined_call_operand.vmem [shape: f32[128,32], index: 6, kind: input, shape index: {}]   ;;  %s8339_s7 = inlined_call_operand.vmem [shape: f32[1,32], index: 7, kind: input, shape index: {}]   ;;  %s8340_s8 = inlined_call_operand.vmem [shape: f32[1,32], index: 8, kind: input, shape index: {}]   ;;  %s8341_s9 = inlined_call_operand.vmem [shape: f32[1,32], index: 9, kind: input, shape index: {}]   ;;  %s8342_s10 = inlined_call_operand.vmem [shape: f32[32,128], index: 10, kind: input, shape index: {}]   ;;  %s8343_s11 = inlined_call_operand.vmem [shape: f32[1,128], index: 11, kind: input, shape index: {}]   ;;  %s8344_s12 = inlined_call_operand.hbm [shape: f32[256,128], index: 12, kind: output, shape index: {}]  }
   0x1   :  { %18 = vsyncpa [#allocation3], 0  ;;  %s24_s23 = sshll.u32 %s8332_s0, 4  ;;  %s4926_s24 = smov [#allocation2]   ;;  %s25_s23 = int_to_ptr.vmem [resolvable:$true] %s24_s23 }
   0x2   :  { %27 = dma.vmem_to_smem %s25_s23, 16, %s4926_s24, [#allocation4]  }
   0x3   :  { %4922 = dma.done.wait [#allocation4], 16  }
   0x4   :  { %4923 = vsyncadd [#allocation4], 4294967280 }
   0x5   :  { %54 = sfence }
   0x6   :  { %v878_v0 = vld [vmem:[%s8334_s2 + $0x18] sm:$0xff]  ;;  %v877_v1 = vld [vmem:[%s8334_s2 + $0x10] sm:$0xff]  ;;  %s727_s29 = sld [smem:[#allocation2]]  ;;  %v876_v2 = vld [vmem:[%s8334_s2 + $0x8] sm:$0xff]  ;;  %vm879_vm4 = vcmask 261120   ;;  %s4928_s15 = smov 32  }
   0x7   :  { %988 = vmatpush.msra.mxu0 %v878_v0  ;;  %s4078_s30 = sld [smem:[#allocation2 + $0x1]]  ;;  %4239 = vmatpush.msra.mxu1 %v878_v0  ;;  %v875_v3 = vld [vmem:[%s8334_s2] sm:$0xff]  ;;  %v56_v13 = vld [vmem:[%s8333_s1 + $0x8] sm:$0xff]  ;;  %v57_v23 = vld [vmem:[%s8333_s1 + $0x10] sm:$0xff]  ;;  %s4929_s2 = smov 64  }
   0x8   :  { %v55_v5 = vld [vmem:[%s8333_s1] sm:$0xff]  ;;  %v58_v29 = vld [vmem:[%s8333_s1 + $0x18] sm:$0xff]  ;;  %v60_v39 = vld [vmem:[%s8333_s1 + $0x28] sm:$0xff]  ;;  %s4931_s18 = smov 96   ;;  %s4934_s20 = smov 128  }
   0x9   :  { %989 = vmatpush.msra.mxu0 %v877_v1  ;;  %4240 = vmatpush.msra.mxu1 %v877_v1  ;;  %v59_v34 = vld [vmem:[%s8333_s1 + $0x20] sm:$0xff]  ;;  %v61_v44 = vld [vmem:[%s8333_s1 + $0x30] sm:$0xff]  ;;  %v62_v49 = vld [vmem:[%s8333_s1 + $0x38] sm:$0xff] }
   0xa   :  { %v63_v54 = vld [vmem:[%s8333_s1 + $0x40] sm:$0xff]  ;;  %v64_v59 = vld [vmem:[%s8333_s1 + $0x48] sm:$0xff]  ;;  %v65_v0 = vld [vmem:[%s8333_s1 + $0x50] sm:$0xff] }
   0xb   :  { %990 = vmatpush.msra.mxu0 %v876_v2  ;;  %4241 = vmatpush.msra.mxu1 %v876_v2 }
   0xc   :  { %v5019_v6 = vstv %s727_s29 }
   0xd   :  { %991 = vmatpush.msra.mxu0 %v875_v3  ;;  %s794_s16 = ssub.f32 %s4078_s30, %s727_s29  ;;  %4242 = vmatpush.msra.mxu1 %v875_v3  ;;  %v730_v9 = vsub.f32 %v55_v5, %v5019_v6  ;;  %v731_v18 = vsub.f32 %v56_v13, %v5019_v6  ;;  %v732_v26 = vsub.f32 %v57_v23, %v5019_v6  ;;  %v66_v5 = vld [vmem:[%s8333_s1 + $0x58] sm:$0xff]  ;;  %v67_v13 = vld [vmem:[%s8333_s1 + $0x60] sm:$0xff] }
   0xe   :  { %v733_v31 = vsub.f32 %v58_v29, %v5019_v6  ;;  %v734_v36 = vsub.f32 %v59_v34, %v5019_v6  ;;  %v735_v41 = vsub.f32 %v60_v39, %v5019_v6  ;;  %v736_v46 = vsub.f32 %v61_v44, %v5019_v6 }
   0xf   :  { %s795_s17 = sadd.f32 1e-08, %s794_s16  ;;  %v762_v16 = vmul.f32 2.0, %v730_v9  ;;  %v763_v22 = vmul.f32 2.0, %v731_v18  ;;  %v764_v28 = vmul.f32 2.0, %v732_v26  ;;  %v737_v51 = vsub.f32 %v62_v49, %v5019_v6  ;;  %v86_v9 = vld [vmem:[%s8333_s1 + $0xf8] sm:$0xff] }
  0x10   :  { %v765_v33 = vmul.f32 2.0, %v733_v31  ;;  %v766_v38 = vmul.f32 2.0, %v734_v36  ;;  %v767_v43 = vmul.f32 2.0, %v735_v41  ;;  %v768_v48 = vmul.f32 2.0, %v736_v46  ;;  %v1459_v26 = vld [vmem:[%s8335_s3 + $0x18] sm:$0xff]  ;;  %v69_v31 = vld [vmem:[%s8333_s1 + $0x70] sm:$0xff] }
  0x11   :  { %v796_v4 = vstv %s795_s17  ;;  %v769_v53 = vmul.f32 2.0, %v737_v51  ;;  %v738_v56 = vsub.f32 %v63_v54, %v5019_v6  ;;  %v739_v61 = vsub.f32 %v64_v59, %v5019_v6  ;;  %1568 = vmatpush.msrb.mxu1 %v1459_v26  ;;  %v1456_v36 = vld [vmem:[%s8335_s3] sm:$0xff]  ;;  %s4933_s16 = smov [#allocation5]  }
  0x12   :  { %4515 = vrcp.f32 %v796_v4  ;;  %v808_v10 = vand.u32 2147483648, %v796_v4  ;;  %vm802_vm0 = vweird.f32 %v796_v4  ;;  %v806_v12 = vand.u32 2147483647, %v796_v4  ;;  %v71_v46 = vld [vmem:[%s8333_s1 + $0x80] sm:$0xff]  ;;  %s4031_s17 = sshll.u32 %s4933_s16, 4  ;;  %s4032_s17 = int_to_ptr.vmem [resolvable:$true] %s4031_s17 }
  0x13   :  { %v770_v58 = vmul.f32 2.0, %v738_v56  ;;  %v771_v63 = vmul.f32 2.0, %v739_v61  ;;  %v740_v2 = vsub.f32 %v65_v0, %v5019_v6  ;;  %v746_v49 = vsub.f32 %v71_v46, %v5019_v6  ;;  %v73_v0 = vld [vmem:[%s8333_s1 + $0x90] sm:$0xff] }
  0x14   :  { %v809_v15 = vor.u32 1.1754944e-38, %v808_v10  ;;  %vm807_vm3 = vcmp.eq.f32.partialorder %v806_v12, 8.507059e+37  ;;  %v761_v12 = vsub.f32 %v86_v9, %v5019_v6  ;;  %v4927_v54 = vmov 2.0  }
  0x15   :  { %4517 = vrcp.f32 %v4927_v54 }
  0x18   :  { %v4516_v7 = vpop.eup %4515 }
  0x19   :  { %v798_v8 = vmul.f32 %v4516_v7, %v796_v4  ;;  %vm803_vm1 = vweird.f32 %v4516_v7  ;;  %v772_v4 = vmul.f32 2.0, %v740_v2 }
  0x1a   :  { %vm804_vm2 = vmor %vm802_vm0, %vm803_vm1 }
  0x1b   :  { %v799_v11 = vsub.f32 1.0, %v798_v8  ;;  %v741_v8 = vsub.f32 %v66_v5, %v5019_v6  ;;  %v4518_v59 = vpop.eup %4517  ;;  %v748_v5 = vsub.f32 %v73_v0, %v5019_v6  ;;  %v2235_v0 = vld [vmem:[%s8338_s6 + $0x68] sm:$0xff] }
  0x1c   :  { %v1290_v2 = vmul.f32 2.0, %v4518_v59  ;;  %vm1294_vm5 = vweird.f32 %v4518_v59 }
  0x1d   :  { %v800_v14 = vmul.f32 %v4516_v7, %v799_v11  ;;  %v773_v11 = vmul.f32 2.0, %v741_v8 }
  0x1f   :  { %v801_v17 = vadd.f32 %v4516_v7, %v800_v14  ;;  %v793_v14 = vmul.f32 2.0, %v761_v12  ;;  %v2236_v12 = vld [vmem:[%s8338_s6 + $0x70] sm:$0xff] }
  0x21   :  { %v805_v19 = vsel %vm804_vm2, %v4516_v7, %v801_v17 }
  0x22   :  { %v5026_v20 = vsel %vm807_vm3, %v809_v15, %v805_v19 }
  0x23   :  { %v811_v21 = vmul.f32 %v5026_v20, %v762_v16  ;;  %v812_v25 = vmul.f32 %v5026_v20, %v763_v22  ;;  %v813_v30 = vmul.f32 %v5026_v20, %v764_v28  ;;  %v814_v35 = vmul.f32 %v5026_v20, %v765_v33  ;;  %v68_v22 = vld [vmem:[%s8333_s1 + $0x68] sm:$0xff]  ;;  %v1458_v28 = vld [vmem:[%s8335_s3 + $0x10] sm:$0xff] }
  0x24   :  { %v815_v40 = vmul.f32 %v5026_v20, %v766_v38  ;;  %v816_v45 = vmul.f32 %v5026_v20, %v767_v43  ;;  %v817_v50 = vmul.f32 %v5026_v20, %v768_v48  ;;  %v818_v55 = vmul.f32 %v5026_v20, %v769_v53  ;;  %1569 = vmatpush.msrb.mxu1 %v1458_v28  ;;  %v1457_v33 = vld [vmem:[%s8335_s3 + $0x8] sm:$0xff]  ;;  %s4033_s3 = sshll.u32 %s8344_s12, 4  ;;  %s4034_s3 = int_to_ptr.hbm [resolvable:$true] %s4033_s3 }
  0x25   :  { %v5032_v24 = vadd.f32 -1.0, %v811_v21  ;;  %v5038_v27 = vadd.f32 -1.0, %v812_v25  ;;  %v5047_v32 = vadd.f32 -1.0, %v813_v30  ;;  %v5056_v37 = vadd.f32 -1.0, %v814_v35 }
  0x26   :  { %v5065_v42 = vadd.f32 -1.0, %v815_v40  ;;  %v5074_v47 = vadd.f32 -1.0, %v816_v45  ;;  %v5083_v52 = vadd.f32 -1.0, %v817_v50  ;;  %v5092_v57 = vadd.f32 -1.0, %v818_v55  ;;  %1570 = vmatpush.msrb.mxu1 %v1457_v33  ;;  %v70_v40 = vld [vmem:[%s8333_s1 + $0x78] sm:$0xff]  ;;  %v72_v55 = vld [vmem:[%s8333_s1 + $0x88] sm:$0xff] }
  0x27   :  { %4111 = vmatmul.msk.f32.vlgmr.msra.gmra.mxu0 %vm879_vm4, %v5032_v24  ;;  %v819_v60 = vmul.f32 %v5026_v20, %v770_v58  ;;  %v820_v1 = vmul.f32 %v5026_v20, %v771_v63  ;;  %v821_v7 = vmul.f32 %v5026_v20, %v772_v4  ;;  %v822_v15 = vmul.f32 %v5026_v20, %v773_v11  ;;  %v2237_v50 = vld [vmem:[%s8338_s6 + $0x78] sm:$0xff] }
  0x28   :  { %v742_v16 = vsub.f32 %v67_v13, %v5019_v6  ;;  %v842_v17 = vmul.f32 %v5026_v20, %v793_v14  ;;  %v743_v25 = vsub.f32 %v68_v22, %v5019_v6  ;;  %v744_v35 = vsub.f32 %v69_v31, %v5019_v6  ;;  %1571 = vmatpush.msrb.mxu1 %v1456_v36  ;;  %v5244_v31 = vld [vmem:[%s8336_s4] ss:$0 sm:$0xff] }
  0x29   :  { %v5101_v62 = vadd.f32 -1.0, %v819_v60  ;;  %v5110_v3 = vadd.f32 -1.0, %v820_v1  ;;  %v5122_v10 = vadd.f32 -1.0, %v821_v7  ;;  %v5135_v19 = vadd.f32 -1.0, %v822_v15  ;;  %2242 = vmatpush.msrb.mxu0 %v2237_v50  ;;  %4243 = vmatpush.msra.mxu2 %v2237_v50  ;;  %v5200_v60 = vld [vmem:[%s8337_s5] ss:$0 sm:$0xff] }
  0x2a   :  { %v5133_v18 = vadd.f32 -1.0, %v842_v17  ;;  %v774_v21 = vmul.f32 2.0, %v742_v16  ;;  %v775_v30 = vmul.f32 2.0, %v743_v25  ;;  %v776_v39 = vmul.f32 2.0, %v744_v35 }
  0x2b   :  { %8401 = vst [vmem:[#allocation8_spill] sm:$0xff] %v5122_v10  ;;  %v745_v43 = vsub.f32 %v70_v40, %v5019_v6  ;;  %v778_v53 = vmul.f32 2.0, %v746_v49  ;;  %v747_v58 = vsub.f32 %v72_v55, %v5019_v6  ;;  %v1291_v11 = vsub.f32 1.0, %v1290_v2  ;;  %2243 = vmatpush.msrb.mxu0 %v2236_v12  ;;  %4244 = vmatpush.msra.mxu2 %v2236_v12 }
  0x2c   :  { %8402 = vst [vmem:[#allocation9_spill] sm:$0xff] %v5133_v18  ;;  %4142 = vmatmul.msk.f32.vlgmr.msra.gmra.mxu1 %vm879_vm4, %v5133_v18  ;;  %v823_v23 = vmul.f32 %v5026_v20, %v774_v21  ;;  %v824_v34 = vmul.f32 %v5026_v20, %v775_v30  ;;  %v825_v41 = vmul.f32 %v5026_v20, %v776_v39  ;;  %v780_v13 = vmul.f32 2.0, %v748_v5  ;;  %v74_v21 = vld [vmem:[%s8333_s1 + $0x98] sm:$0xff] }
  0x2d   :  { %8403 = vst [vmem:[#allocation10_spill] sm:$0xff] %v5135_v19  ;;  %v777_v45 = vmul.f32 2.0, %v745_v43  ;;  %v827_v56 = vmul.f32 %v5026_v20, %v778_v53  ;;  %v779_v63 = vmul.f32 2.0, %v747_v58  ;;  %v1292_v17 = vmul.f32 %v4518_v59, %v1291_v11  ;;  %2244 = vmatpush.msrb.mxu0 %v2235_v0  ;;  %4245 = vmatpush.msra.mxu2 %v2235_v0 }
  0x2e   :  { %v5152_v29 = vadd.f32 -1.0, %v823_v23  ;;  %v5167_v38 = vadd.f32 -1.0, %v824_v34  ;;  %v5176_v44 = vadd.f32 -1.0, %v825_v41  ;;  %v829_v25 = vmul.f32 %v5026_v20, %v780_v13 }
  0x2f   :  { %4112 = vmatmul.msk.f32.gmra.mxu0 %vm879_vm4, %v5038_v27  ;;  %v826_v48 = vmul.f32 %v5026_v20, %v777_v45  ;;  %v5202_v61 = vadd.f32 -1.0, %v827_v56  ;;  %v828_v9 = vmul.f32 %v5026_v20, %v779_v63  ;;  %v749_v33 = vsub.f32 %v74_v21, %v5019_v6 }
  0x30   :  { %8404 = vst [vmem:[#allocation11_spill] sm:$0xff] %v5152_v29  ;;  %v1293_v34 = vadd.f32 %v4518_v59, %v1292_v17  ;;  %v5253_v39 = vadd.f32 -1.0, %v829_v25 }
  0x31   :  { %8405 = vst [vmem:[#allocation12_spill] sm:$0xff] %v5167_v38  ;;  %v5188_v51 = vadd.f32 -1.0, %v826_v48  ;;  %v5224_v15 = vadd.f32 -1.0, %v828_v9  ;;  %v781_v43 = vmul.f32 2.0, %v749_v33  ;;  %v75_v48 = vld [vmem:[%s8333_s1 + $0xa0] sm:$0xff] }
  0x32   :  { %8406 = vst [vmem:[#allocation13_spill] sm:$0xff] %v5176_v44  ;;  %v5259_v46 = vsel %vm1294_vm5, %v4518_v59, %v1293_v34  ;;  %v750_v58 = vsub.f32 %v75_v48, %v5019_v6  ;;  %v77_v34 = vld [vmem:[%s8333_s1 + $0xb0] sm:$0xff]  ;;  %vm2156_vm5 = vcmask 523264  }
  0x33   :  { %8407 = vst [vmem:[#allocation14_spill] sm:$0xff] %v5188_v51  ;;  %v830_v56 = vmul.f32 %v5026_v20, %v781_v43 }
  0x34   :  { %8408 = vst [vmem:[#allocation15_spill] sm:$0xff] %v5202_v61 }
  0x35   :  { %8409 = vst [vmem:[#allocation16_spill] sm:$0xff] %v5224_v15  ;;  %v5288_v2 = vadd.f32 -1.0, %v830_v56 }
  0x36   :  { %8410 = vst [vmem:[#allocation17_spill] sm:$0xff] %v5259_v46 }
  0x37   :  { %4113 = vmatmul.msk.f32.gmra.mxu0 %vm879_vm4, %v5047_v32 }
  0x3f   :  { %4114 = vmatmul.msk.f32.gmra.mxu0 %vm879_vm4, %v5056_v37 }
  0x47   :  { %4115 = vmatmul.msk.f32.gmra.mxu0 %vm879_vm4, %v5065_v42 }
  0x4f   :  { %4116 = vmatmul.msk.f32.gmra.mxu0 %vm879_vm4, %v5074_v47 }
  0x57   :  { %4117 = vmatmul.msk.f32.gmra.mxu0 %vm879_vm4, %v5083_v52 }
  0x5f   :  { %4118 = vmatmul.msk.f32.gmra.mxu0 %vm879_vm4, %v5092_v57 }
  0x67   :  { %4119 = vmatmul.msk.f32.gmra.mxu0 %vm879_vm4, %v5101_v62 }
  0x6f   :  { %4120 = vmatmul.msk.f32.gmra.mxu0 %vm879_vm4, %v5110_v3 }
  0x77   :  { %4121 = vmatmul.msk.f32.gmra.mxu0 %vm879_vm4, %v5122_v10 }
  0x7f   :  { %4122 = vmatmul.msk.f32.gmra.mxu0 %vm879_vm4, %v5135_v19 }
  0x87   :  { %4123 = vmatmul.msk.f32.gmra.mxu0 %vm879_vm4, %v5152_v29 }
  0x8f   :  { %4124 = vmatmul.msk.f32.gmra.mxu0 %vm879_vm4, %v5167_v38 }
  0x97   :  { %4125 = vmatmul.msk.f32.gmra.mxu0 %vm879_vm4, %v5176_v44 }
  0x9f   :  { %4126 = vmatmul.msk.f32.gmra.mxu0 %vm879_vm4, %v5188_v51 }
  0xa4   :  { %v5207_v1 = vpop.f32.mrf.mxu0 }
  0xa5   :  { %v1093_v4 = vadd.f32 %v5200_v60, %v5207_v1  ;;  %v1157_v8 = vadd.f32 %v5032_v24, %v5207_v1 }
  0xa7   :  { %v5212_v7 = vmul.f32 2.0, %v1093_v4  ;;  %4127 = vmatmul.msk.f32.gmra.mxu0 %vm879_vm4, %v5202_v61  ;;  %v1189_v14 = vmul.f32 2.0, %v1157_v8  ;;  %v782_v4 = vmul.f32 2.0, %v750_v58  ;;  %v76_v8 = vld [vmem:[%s8333_s1 + $0xa8] sm:$0xff] }
  0xa8   :  { %v751_v21 = vsub.f32 %v76_v8, %v5019_v6 }
  0xa9   :  { %4143 = vmatmul.msk.f32.vlgmr.msrb.gmra.mxu1 %vm879_vm4, %v5212_v7  ;;  %v1221_v26 = vmul.f32 %v1189_v14, %v5212_v7  ;;  %v831_v17 = vmul.f32 %v5026_v20, %v782_v4 }
  0xab   :  { %v1257_v40 = vsub.f32 %v1221_v26, %v5244_v31  ;;  %v5310_v25 = vadd.f32 -1.0, %v831_v17  ;;  %v783_v26 = vmul.f32 2.0, %v751_v21 }
  0xac   :  { %v5226_v16 = vpop.f32.mrf.mxu0 }
  0xad   :  { %v1094_v22 = vadd.f32 %v5200_v60, %v5226_v16  ;;  %v1158_v23 = vadd.f32 %v5038_v27, %v5226_v16  ;;  %v5276_v55 = vmul.f32 %v5259_v46, %v1257_v40  ;;  %v832_v43 = vmul.f32 %v5026_v20, %v783_v26 }
  0xaf   :  { %v5237_v28 = vmul.f32 2.0, %v1094_v22  ;;  %v1190_v30 = vmul.f32 2.0, %v1158_v23  ;;  %4128 = vmatmul.msk.f32.gmra.mxu0 %vm879_vm4, %v5224_v15  ;;  %v5340_v56 = vadd.f32 -1.0, %v832_v43 }
  0xb1   :  { %v1222_v35 = vmul.f32 %v1190_v30, %v5237_v28  ;;  %4144 = vmatmul.msk.f32.gmra.mxu1 %vm879_vm4, %v5237_v28  ;;  %v4269_v36 = vpack.i.bf16 %v5237_v28, %v5212_v7 }
  0xb3   :  { %4270 = vrot.lane.b32.xlu0 %v4269_v36, %s4928_s15  ;;  %v1258_v41 = vsub.f32 %v1222_v35, %v5244_v31 }
  0xb4   :  { %v5257_v45 = vpop.f32.mrf.mxu0 }
  0xb5   :  { %v1095_v49 = vadd.f32 %v5200_v60, %v5257_v45  ;;  %v1159_v50 = vadd.f32 %v5047_v32, %v5257_v45  ;;  %v5269_v53 = vmul.f32 %v5259_v46, %v1258_v41 }
  0xb7   :  { %v5271_v54 = vmul.f32 2.0, %v1095_v49  ;;  %4129 = vmatmul.msk.f32.gmra.mxu0 %vm879_vm4, %v5253_v39  ;;  %v1191_v59 = vmul.f32 2.0, %v1159_v50  ;;  %v4274_v63 = vpack.i.bf16 %v5269_v53, %v5276_v55  ;;  %v752_v49 = vsub.f32 %v77_v34, %v5019_v6  ;;  %v2234_v50 = vld [vmem:[%s8338_s6 + $0x60] sm:$0xff] }
  0xb8   :  { %2245 = vmatpush.msrb.mxu0 %v2234_v50  ;;  %4246 = vmatpush.msra.mxu2 %v2234_v50 }
  0xb9   :  { %4145 = vmatmul.msk.f32.gmra.mxu1 %vm879_vm4, %v5271_v54  ;;  %v1223_v12 = vmul.f32 %v1191_v59, %v5271_v54  ;;  %v784_v58 = vmul.f32 2.0, %v752_v49  ;;  %v80_v49 = vld [vmem:[%s8333_s1 + $0xc8] sm:$0xff] }
  0xbb   :  { %4275 = vrot.lane.b32.xlu0 %v4274_v63, %s4929_s2  ;;  %v1259_v23 = vsub.f32 %v1223_v12, %v5244_v31  ;;  %v78_v63 = vld [vmem:[%s8333_s1 + $0xb8] sm:$0xff]  ;;  %v833_v8 = vmul.f32 %v5026_v20, %v784_v58 }
  0xbc   :  { %v5290_v5 = vpop.f32.mrf.mxu0  ;;  %v2233_v12 = vld [vmem:[%s8338_s6 + $0x58] sm:$0xff] }
  0xbd   :  { %v1096_v9 = vadd.f32 %v5200_v60, %v5290_v5  ;;  %v1160_v11 = vadd.f32 %v5056_v37, %v5290_v5  ;;  %v5321_v36 = vmul.f32 %v5259_v46, %v1259_v23  ;;  %2246 = vmatpush.msrb.mxu0 %v2233_v12  ;;  %4247 = vmatpush.msra.mxu2 %v2233_v12 }
  0xbf   :  { %v5300_v13 = vmul.f32 2.0, %v1096_v9  ;;  %v1192_v14 = vmul.f32 2.0, %v1160_v11  ;;  %4130 = vmatmul.msk.f32.gmra.mxu0 %vm879_vm4, %v5288_v2  ;;  %v753_v9 = vsub.f32 %v78_v63, %v5019_v6 }
  0xc1   :  { %4146 = vmatmul.msk.f32.gmra.mxu1 %vm879_vm4, %v5300_v13  ;;  %v1224_v22 = vmul.f32 %v1192_v14, %v5300_v13  ;;  %v5362_v14 = vadd.f32 -1.0, %v833_v8  ;;  %v785_v17 = vmul.f32 2.0, %v753_v9  ;;  %v2232_v9 = vld [vmem:[%s8338_s6 + $0x50] sm:$0xff] }
  0xc2   :  { %2247 = vmatpush.msrb.mxu0 %v2232_v9  ;;  %4248 = vmatpush.msra.mxu2 %v2232_v9 }
  0xc3   :  { %v1260_v30 = vsub.f32 %v1224_v22, %v5244_v31  ;;  %v79_v22 = vld [vmem:[%s8333_s1 + $0xc0] sm:$0xff] }
  0xc4   :  { %v5313_v33 = vpop.f32.mrf.mxu0  ;;  %v754_v34 = vsub.f32 %v79_v22, %v5019_v6  ;;  %v81_v22 = vld [vmem:[%s8333_s1 + $0xd0] sm:$0xff] }
  0xc5   :  { %v1097_v35 = vadd.f32 %v5200_v60, %v5313_v33  ;;  %v5324_v40 = vmul.f32 %v5259_v46, %v1260_v30  ;;  %v834_v30 = vmul.f32 %v5026_v20, %v785_v17 }
  0xc6   :  { %v786_v43 = vmul.f32 2.0, %v754_v34 }
  0xc7   :  { %v5326_v41 = vmul.f32 2.0, %v1097_v35  ;;  %4131 = vmatmul.msk.f32.gmra.mxu0 %vm879_vm4, %v5310_v25  ;;  %v4289_v48 = vpack.i.bf16 %v5324_v40, %v5321_v36  ;;  %v5380_v35 = vadd.f32 -1.0, %v834_v30 }
  0xc8   :  { %v835_v63 = vmul.f32 %v5026_v20, %v786_v43  ;;  %v756_v43 = vsub.f32 %v81_v22, %v5019_v6 }
  0xc9   :  { %4147 = vmatmul.msk.f32.gmra.mxu1 %vm879_vm4, %v5326_v41  ;;  %4290 = vrot.lane.b32.xlu2 %v4289_v48, %s4929_s2 }
  0xcc   :  { %v5342_v59 = vpop.f32.mrf.mxu0 }
  0xcd   :  { %v1098_v0 = vadd.f32 %v5200_v60, %v5342_v59 }
  0xcf   :  { %v5349_v4 = vmul.f32 2.0, %v1098_v0  ;;  %4132 = vmatmul.msk.f32.gmra.mxu0 %vm879_vm4, %v5340_v56  ;;  %v755_v0 = vsub.f32 %v80_v49, %v5019_v6 }
  0xd1   :  { %4148 = vmatmul.msk.f32.gmra.mxu1 %vm879_vm4, %v5349_v4  ;;  %v4299_v11 = vpack.i.bf16 %v5349_v4, %v5326_v41  ;;  %v787_v12 = vmul.f32 2.0, %v755_v0  ;;  %v82_v0 = vld [vmem:[%s8333_s1 + $0xd8] sm:$0xff] }
  0xd2   :  { %v757_v22 = vsub.f32 %v82_v0, %v5019_v6  ;;  %v83_v0 = vld [vmem:[%s8333_s1 + $0xe0] sm:$0xff] }
  0xd3   :  { %4300 = vrot.lane.b32.xlu0 %v4299_v11, %s4928_s15  ;;  %v5402_v11 = vadd.f32 -1.0, %v835_v63  ;;  %v836_v34 = vmul.f32 %v5026_v20, %v787_v12 }
  0xd4   :  { %v5365_v21 = vpop.f32.mrf.mxu0 }
  0xd5   :  { %v1099_v23 = vadd.f32 %v5200_v60, %v5365_v21  ;;  %8411 = vst [vmem:[#allocation18_spill] sm:$0xff] %v5402_v11  ;;  %v5420_v49 = vadd.f32 -1.0, %v836_v34  ;;  %v2231_v34 = vld [vmem:[%s8338_s6 + $0x48] sm:$0xff] }
  0xd6   :  { %2248 = vmatpush.msrb.mxu0 %v2231_v34  ;;  %4249 = vmatpush.msra.mxu2 %v2231_v34 }
  0xd7   :  { %v5372_v26 = vmul.f32 2.0, %v1099_v23  ;;  %4133 = vmatmul.msk.f32.gmra.mxu0 %vm879_vm4, %v5362_v14  ;;  %8412 = vst [vmem:[#allocation19_spill] sm:$0xff] %v5420_v49 }
  0xd9   :  { %4149 = vmatmul.msk.f32.gmra.mxu1 %vm879_vm4, %v5372_v26 }
  0xdc   :  { %v5382_v48 = vpop.f32.mrf.mxu0 }
  0xdd   :  { %v1100_v50 = vadd.f32 %v5200_v60, %v5382_v48 }
  0xdf   :  { %v5389_v58 = vmul.f32 2.0, %v1100_v50  ;;  %4134 = vmatmul.msk.f32.gmra.mxu0 %vm879_vm4, %v5380_v35  ;;  %v788_v50 = vmul.f32 2.0, %v756_v43 }
  0xe1   :  { %4150 = vmatmul.msk.f32.gmra.mxu1 %vm879_vm4, %v5389_v58  ;;  %v4314_v8 = vpack.i.bf16 %v5389_v58, %v5372_v26  ;;  %v837_v12 = vmul.f32 %v5026_v20, %v788_v50 }
  0xe3   :  { %4315 = vrot.lane.b32.xlu0 %v4314_v8, %s4928_s15  ;;  %v5442_v43 = vadd.f32 -1.0, %v837_v12 }
  0xe4   :  { %v5405_v17 = vpop.f32.mrf.mxu0 }
  0xe5   :  { %v1101_v23 = vadd.f32 %v5200_v60, %v5405_v17  ;;  %8413 = vst [vmem:[#allocation20_spill] sm:$0xff] %v5442_v43 }
  0xe7   :  { %v5412_v30 = vmul.f32 2.0, %v1101_v23  ;;  %4135 = vmatmul.msk.f32.gmra.mxu0 %vm879_vm4, %v5402_v11 }
  0xe9   :  { %4151 = vmatmul.msk.f32.gmra.mxu1 %vm879_vm4, %v5412_v30 }
  0xec   :  { %v5422_v63 = vpop.f32.mrf.mxu0 }
  0xed   :  { %v1102_v8 = vadd.f32 %v5200_v60, %v5422_v63 }
  0xef   :  { %v5429_v9 = vmul.f32 2.0, %v1102_v8  ;;  %4136 = vmatmul.msk.f32.gmra.mxu0 %vm879_vm4, %v5420_v49  ;;  %v789_v8 = vmul.f32 2.0, %v757_v22  ;;  %v758_v22 = vsub.f32 %v83_v0, %v5019_v6 }
  0xf1   :  { %4152 = vmatmul.msk.f32.gmra.mxu1 %vm879_vm4, %v5429_v9  ;;  %v4329_v23 = vpack.i.bf16 %v5429_v9, %v5412_v30  ;;  %v838_v12 = vmul.f32 %v5026_v20, %v789_v8  ;;  %v790_v61 = vmul.f32 2.0, %v758_v22 }
  0xf3   :  { %4330 = vrot.lane.b32.xlu0 %v4329_v23, %s4928_s15  ;;  %v5462_v34 = vadd.f32 -1.0, %v838_v12  ;;  %v839_v12 = vmul.f32 %v5026_v20, %v790_v61 }
  0xf4   :  { %v5445_v50 = vpop.f32.mrf.mxu0 }
  0xf5   :  { %8414 = vst [vmem:[#allocation21_spill] sm:$0xff] %v5445_v50  ;;  %v1103_v18 = vadd.f32 %v5200_v60, %v5445_v50  ;;  %v1167_v49 = vadd.f32 %v5122_v10, %v5445_v50 }
  0xf6   :  { %8416 = vst [vmem:[#allocation23_spill] sm:$0xff] %v5462_v34 }
  0xf7   :  { %v5454_v11 = vmul.f32 2.0, %v1103_v18  ;;  %4137 = vmatmul.msk.f32.gmra.mxu0 %vm879_vm4, %v5442_v43  ;;  %v1199_v23 = vmul.f32 2.0, %v1167_v49  ;;  %v84_v18 = vld [vmem:[%s8333_s1 + $0xe8] sm:$0xff] }
  0xf8   :  { %v759_v22 = vsub.f32 %v84_v18, %v5019_v6 }
  0xf9   :  { %8415 = vst [vmem:[#allocation22_spill] sm:$0xff] %v5454_v11  ;;  %4153 = vmatmul.msk.f32.gmra.mxu1 %vm879_vm4, %v5454_v11  ;;  %v1231_v0 = vmul.f32 %v1199_v23, %v5454_v11 }
  0xfa   :  { %v791_v61 = vmul.f32 2.0, %v759_v22 }
  0xfb   :  { %v1267_v23 = vsub.f32 %v1231_v0, %v5244_v31 }
  0xfc   :  { %v5464_v15 = vpop.f32.mrf.mxu0 }
  0xfd   :  { %8417 = vst [vmem:[#allocation24_spill] sm:$0xff] %v5464_v15  ;;  %v1104_v43 = vadd.f32 %v5200_v60, %v5464_v15  ;;  %v1168_v8 = vadd.f32 %v5135_v19, %v5464_v15 }
  0xff   :  { %v5474_v50 = vmul.f32 2.0, %v1104_v43  ;;  %v1200_v49 = vmul.f32 2.0, %v1168_v8  ;;  %4138 = vmatmul.msk.f32.gmra.mxu0 %vm879_vm4, %v5462_v34  ;;  %v2230_v43 = vld [vmem:[%s8338_s6 + $0x40] sm:$0xff]  ;;  %v5489_v8 = vadd.f32 -1.0, %v839_v12  ;;  %v5503_v12 = vmul.f32 %v5259_v46, %v1267_v23 }
 0x100   :  { %2249 = vmatpush.msrb.mxu0 %v2230_v43  ;;  %4250 = vmatpush.msra.mxu2 %v2230_v43 }
 0x101   :  { %8418 = vst [vmem:[#allocation25_spill] sm:$0xff] %v5474_v50  ;;  %v1232_v10 = vmul.f32 %v1200_v49, %v5474_v50  ;;  %4154 = vmatmul.msk.f32.gmra.mxu1 %vm879_vm4, %v5474_v50  ;;  %v4344_v15 = vpack.i.bf16 %v5474_v50, %v5454_v11  ;;  %v85_v50 = vld [vmem:[%s8333_s1 + $0xf0] sm:$0xff] }
 0x102   :  { %8419 = vst [vmem:[#allocation26_spill] sm:$0xff] %v5489_v8  ;;  %v760_v43 = vsub.f32 %v85_v50, %v5019_v6 }
 0x103   :  { %4345 = vrot.lane.b32.xlu0 %v4344_v15, %s4928_s15  ;;  %v1268_v18 = vsub.f32 %v1232_v10, %v5244_v31  ;;  %v840_v10 = vmul.f32 %v5026_v20, %v791_v61 }
 0x104   :  { %v5493_v49 = vpop.f32.mrf.mxu0 }
 0x105   :  { %8420 = vst [vmem:[#allocation27_spill] sm:$0xff] %v5493_v49  ;;  %v1105_v34 = vadd.f32 %v5200_v60, %v5493_v49  ;;  %v1169_v0 = vadd.f32 %v5152_v29, %v5493_v49  ;;  %v5506_v15 = vmul.f32 %v5259_v46, %v1268_v18  ;;  %v5518_v23 = vadd.f32 -1.0, %v840_v10 }
 0x106   :  { %v792_v18 = vmul.f32 2.0, %v760_v43  ;;  %v2229_v43 = vld [vmem:[%s8338_s6 + $0x38] sm:$0xff] }
 0x107   :  { %v5508_v22 = vmul.f32 2.0, %v1105_v34  ;;  %4139 = vmatmul.msk.f32.gmra.mxu0 %vm879_vm4, %v5489_v8  ;;  %v1201_v19 = vmul.f32 2.0, %v1169_v0  ;;  %8422 = vst [vmem:[#allocation29_spill] sm:$0xff] %v5518_v23  ;;  %4251 = vmatpush.msra.mxu2 %v2229_v43 }
 0x108   :  { %v841_v0 = vmul.f32 %v5026_v20, %v792_v18  ;;  %2250 = vmatpush.msrb.mxu0 %v2229_v43 }
 0x109   :  { %8421 = vst [vmem:[#allocation28_spill] sm:$0xff] %v5508_v22  ;;  %4155 = vmatmul.msk.f32.gmra.mxu1 %vm879_vm4, %v5508_v22  ;;  %v1233_v34 = vmul.f32 %v1201_v19, %v5508_v22 }
 0x10c   :  { %v5520_v49 = vpop.f32.mrf.mxu0 }
 0x10d   :  { %8423 = vst [vmem:[#allocation30_spill] sm:$0xff] %v5520_v49  ;;  %v1106_v8 = vadd.f32 %v5200_v60, %v5520_v49  ;;  %v1170_v6 = vadd.f32 %v5167_v38, %v5520_v49 }
 0x10f   :  { %v5527_v50 = vmul.f32 2.0, %v1106_v8  ;;  %v1202_v61 = vmul.f32 2.0, %v1170_v6  ;;  %4140 = vmatmul.msk.f32.gmra.mxu0 %vm879_vm4, %v5518_v23  ;;  %v1269_v8 = vsub.f32 %v1233_v34, %v5244_v31  ;;  %v5541_v6 = vadd.f32 -1.0, %v841_v0 }
 0x111   :  { %8424 = vst [vmem:[#allocation31_spill] sm:$0xff] %v5527_v50  ;;  %v1234_v10 = vmul.f32 %v1202_v61, %v5527_v50  ;;  %4156 = vmatmul.msk.f32.gmra.mxu1 %vm879_vm4, %v5527_v50  ;;  %v4354_v19 = vpack.i.bf16 %v5527_v50, %v5508_v22  ;;  %v5550_v11 = vmul.f32 %v5259_v46, %v1269_v8 }
 0x112   :  { %8425 = vst [vmem:[#allocation32_spill] sm:$0xff] %v5541_v6 }
 0x113   :  { %4355 = vrot.lane.b32.xlu0 %v4354_v19, %s4928_s15  ;;  %v1270_v20 = vsub.f32 %v1234_v10, %v5244_v31  ;;  %v4930_v10 = vmov 3.0  }
 0x114   :  { %v5545_v18 = vpop.f32.mrf.mxu0  ;;  %4519 = vrcp.f32 %v4930_v10 }
 0x115   :  { %8426 = vst [vmem:[#allocation33_spill] sm:$0xff] %v5545_v18  ;;  %v1107_v61 = vadd.f32 %v5200_v60, %v5545_v18  ;;  %v5553_v23 = vmul.f32 %v5259_v46, %v1270_v20  ;;  %v1171_v34 = vadd.f32 %v5176_v44, %v5545_v18  ;;  %v5572_v44 = vpop.f32.mrf.mxu1 }
 0x116   :  { %8429 = vst [vmem:[#allocation36_spill] sm:$0xff] %v5572_v44  ;;  %v1329_v44 = vmul.f32 2.0, %v5038_v27 }
 0x117   :  { %v5557_v0 = vmul.f32 2.0, %v1107_v61  ;;  %4141 = vmatmul.msk.f32.gmra.mxu0 %vm879_vm4, %v5541_v6  ;;  %v1203_v43 = vmul.f32 2.0, %v1171_v34 }
 0x118   :  { %v1361_v27 = vadd.f32 %v1329_v44, %v5226_v16 }
 0x119   :  { %8427 = vst [vmem:[#allocation34_spill] sm:$0xff] %v5557_v0  ;;  %4157 = vmatmul.msk.f32.gmra.mxu1 %vm879_vm4, %v5557_v0  ;;  %v1235_v6 = vmul.f32 %v1203_v43, %v5557_v0 }
 0x11a   :  { %v4520_v20 = vpop.eup %4519  ;;  %v1393_v29 = vmul.f32 2.0, %v1361_v27  ;;  %v1331_v27 = vmul.f32 2.0, %v5056_v37 }
 0x11b   :  { %v1734_v50 = vmul.f32 3.0, %v4520_v20  ;;  %v1271_v49 = vsub.f32 %v1235_v6, %v5244_v31  ;;  %vm1738_vm6 = vweird.f32 %v4520_v20 }
 0x11c   :  { %v5565_v8 = vpop.f32.mrf.mxu0 }
 0x11d   :  { %8428 = vst [vmem:[#allocation35_spill] sm:$0xff] %v5565_v8  ;;  %v1108_v18 = vadd.f32 %v5200_v60, %v5565_v8  ;;  %v1172_v61 = vadd.f32 %v5188_v51, %v5565_v8  ;;  %v1328_v8 = vmul.f32 2.0, %v5032_v24 }
 0x11f   :  { %v5574_v10 = vmul.f32 2.0, %v1108_v18  ;;  %v1204_v19 = vmul.f32 2.0, %v1172_v61  ;;  %v2228_v18 = vld [vmem:[%s8338_s6 + $0x30] sm:$0xff] }
 0x120   :  { %2251 = vmatpush.msrb.mxu0 %v2228_v18  ;;  %4252 = vmatpush.msra.mxu2 %v2228_v18 }
 0x121   :  { %8430 = vst [vmem:[#allocation37_spill] sm:$0xff] %v5574_v10  ;;  %v1236_v22 = vmul.f32 %v1204_v19, %v5574_v10  ;;  %4158 = vmatmul.msk.f32.gmra.mxu1 %vm879_vm4, %v5574_v10  ;;  %v4364_v34 = vpack.i.bf16 %v5574_v10, %v5557_v0  ;;  %v1735_v19 = vsub.f32 1.0, %v1734_v50  ;;  %v5597_v10 = vmul.f32 %v5259_v46, %v1271_v49 }
 0x122   :  { %v1360_v0 = vadd.f32 %v1328_v8, %v5207_v1 }
 0x123   :  { %4365 = vrot.lane.b32.xlu0 %v4364_v34, %s4928_s15  ;;  %v1272_v43 = vsub.f32 %v1236_v22, %v5244_v31  ;;  %8431 = vst [vmem:[#allocation38_spill] sm:$0xff] %v5597_v10  ;;  %v1736_v51 = vmul.f32 %v4520_v20, %v1735_v19  ;;  %v1330_v19 = vmul.f32 2.0, %v5047_v32 }
 0x124   :  { %v5588_v61 = vpop.f32.mrf.mxu0  ;;  %v1392_v18 = vmul.f32 2.0, %v1360_v0  ;;  %v1425_v0 = vmul.f32 %v1393_v29, %v5269_v53 }
 0x125   :  { %v1109_v6 = vadd.f32 %v5200_v60, %v5588_v61  ;;  %v5594_v24 = vmul.f32 %v5259_v46, %v1272_v43  ;;  %v1737_v49 = vadd.f32 %v4520_v20, %v1736_v51  ;;  %v1162_v51 = vadd.f32 %v5074_v47, %v5342_v59 }
 0x126   :  { %v1573_v34 = vpop.f32.mrf.mxu1  ;;  %v1424_v1 = vmul.f32 %v1392_v18, %v5276_v55  ;;  %v1161_v18 = vadd.f32 %v5065_v42, %v5313_v33  ;;  %v1362_v29 = vadd.f32 %v1330_v19, %v5257_v45  ;;  %v1363_v19 = vadd.f32 %v1331_v27, %v5290_v5 }
 0x127   :  { %v5600_v22 = vmul.f32 2.0, %v1109_v6  ;;  %v1669_v43 = vadd.f32 %v1573_v34, %v5212_v7  ;;  %v5620_v34 = vsel %vm1738_vm6, %v4520_v20, %v1737_v49  ;;  %v2227_v20 = vld [vmem:[%s8338_s6 + $0x28] sm:$0xff]  ;;  %vm2189_vm6 = vcmask 785408  }
 0x128   :  { %2252 = vmatpush.msrb.mxu0 %v2227_v20  ;;  %4253 = vmatpush.msra.mxu2 %v2227_v20  ;;  %v1395_v5 = vmul.f32 2.0, %v1363_v19 }
 0x129   :  { %4159 = vmatmul.msk.f32.gmra.mxu1 %vm879_vm4, %v5600_v22  ;;  %v1701_v44 = vsub.f32 %v1424_v1, %v1669_v43  ;;  %v1194_v43 = vmul.f32 2.0, %v1162_v51  ;;  %v1346_v1 = vmul.f32 2.0, %v5253_v39 }
 0x12b   :  { %v1226_v51 = vmul.f32 %v1194_v43, %v5349_v4 }
 0x12c   :  { %v5608_v38 = vpop.f32.mrf.mxu0 }
 0x12d   :  { %v1110_v8 = vadd.f32 %v5200_v60, %v5608_v38 }
 0x12e   :  { %v1576_v6 = vpop.f32.mrf.mxu1 }
 0x12f   :  { %v5614_v16 = vmul.f32 2.0, %v1110_v8  ;;  %v1670_v7 = vadd.f32 %v1576_v6, %v5237_v28  ;;  %v1740_v28 = vmul.f32 %v5620_v34, %v1701_v44  ;;  %v1193_v6 = vmul.f32 2.0, %v1161_v18 }
 0x130   :  { %v1163_v18 = vadd.f32 %v5083_v52, %v5365_v21 }
 0x131   :  { %v1702_v55 = vsub.f32 %v1425_v0, %v1670_v7  ;;  %4160 = vmatmul.msk.f32.gmra.mxu1 %vm879_vm4, %v5614_v16  ;;  %v4374_v32 = vpack.i.bf16 %v5614_v16, %v5600_v22  ;;  %v1394_v0 = vmul.f32 2.0, %v1362_v29  ;;  %v1225_v27 = vmul.f32 %v1193_v6, %v5326_v41 }
 0x132   :  { %v4284_v6 = vpack.i.bf16 %v5300_v13, %v5271_v54 }
 0x133   :  { %v1741_v53 = vmul.f32 %v5620_v34, %v1702_v55  ;;  %4375 = vrot.lane.b32.xlu0 %v4374_v32, %s4928_s15  ;;  %v1164_v32 = vadd.f32 %v5092_v57, %v5382_v48  ;;  %v1426_v29 = vmul.f32 %v1394_v0, %v5321_v36  ;;  %v1427_v0 = vmul.f32 %v1395_v5, %v5324_v40 }
 0x134   :  { %v1047_v49 = vpop.f32.mrf.mxu0  ;;  %v1166_v40 = vadd.f32 %v5110_v3, %v5422_v63 }
 0x135   :  { %v1111_v37 = vadd.f32 %v5200_v60, %v1047_v49  ;;  %v1175_v45 = vadd.f32 %v5253_v39, %v1047_v49  ;;  %v4279_v8 = vpack.i.bf16 %v1741_v53, %v1740_v28  ;;  %v1378_v20 = vadd.f32 %v1346_v1, %v1047_v49 }
 0x136   :  { %v1579_v44 = vpop.f32.mrf.mxu1  ;;  %v1196_v43 = vmul.f32 2.0, %v1164_v32  ;;  %v1347_v1 = vmul.f32 2.0, %v5288_v2 }
 0x137   :  { %v5640_v7 = vmul.f32 2.0, %v1111_v37  ;;  %v1207_v55 = vmul.f32 2.0, %v1175_v45  ;;  %4280 = vrot.lane.b32.xlu1 %v4279_v8, %s4931_s18  ;;  %v1671_v28 = vadd.f32 %v1579_v44, %v5271_v54  ;;  %v1410_v37 = vmul.f32 2.0, %v1378_v20 }
 0x138   :  { %v1262_v45 = vsub.f32 %v1226_v51, %v5244_v31  ;;  %v1332_v44 = vmul.f32 2.0, %v5065_v42  ;;  %v1261_v20 = vsub.f32 %v1225_v27, %v5244_v31  ;;  %v1228_v54 = vmul.f32 %v1196_v43, %v5389_v58 }
 0x139   :  { %v1239_v39 = vmul.f32 %v1207_v55, %v5640_v7  ;;  %4161 = vmatmul.msk.f32.gmra.mxu1 %vm879_vm4, %v5640_v7  ;;  %v1195_v55 = vmul.f32 2.0, %v1163_v18  ;;  %v1333_v18 = vmul.f32 2.0, %v5074_v47 }
 0x13a   :  { %v1301_v10 = vmul.f32 %v5259_v46, %v1262_v45  ;;  %v1300_v43 = vmul.f32 %v5259_v46, %v1261_v20 }
 0x13b   :  { %v1275_v53 = vsub.f32 %v1239_v39, %v5244_v31  ;;  %v1703_v39 = vsub.f32 %v1426_v29, %v1671_v28  ;;  %v1227_v29 = vmul.f32 %v1195_v55, %v5372_v26  ;;  %v1165_v28 = vadd.f32 %v5101_v62, %v5405_v17 }
 0x13c   :  { %v1050_v49 = vpop.f32.mrf.mxu0  ;;  %v1365_v20 = vadd.f32 %v1333_v18, %v5342_v59 }
 0x13d   :  { %v1112_v8 = vadd.f32 %v5200_v60, %v1050_v49  ;;  %v1176_v19 = vadd.f32 %v5288_v2, %v1050_v49  ;;  %v5662_v36 = vmul.f32 %v5259_v46, %v1275_v53  ;;  %v1379_v53 = vadd.f32 %v1347_v1, %v1050_v49  ;;  %v2226_v1 = vld [vmem:[%s8338_s6 + $0x20] sm:$0xff] }
 0x13e   :  { %v1582_v32 = vpop.f32.mrf.mxu1  ;;  %2253 = vmatpush.msrb.mxu0 %v2226_v1  ;;  %4254 = vmatpush.msra.mxu2 %v2226_v1 }
 0x13f   :  { %v5667_v51 = vmul.f32 2.0, %v1112_v8  ;;  %v1208_v50 = vmul.f32 2.0, %v1176_v19  ;;  %v1672_v2 = vadd.f32 %v1582_v32, %v5300_v13  ;;  %4285 = vrot.lane.b32.xlu1 %v4284_v6, %s4928_s15  ;;  %v5674_v42 = vmul.f32 %v1410_v37, %v5662_v36 }
 0x140   :  { %v1364_v37 = vadd.f32 %v1332_v44, %v5313_v33  ;;  %v1411_v45 = vmul.f32 2.0, %v1379_v53  ;;  %v1348_v19 = vmul.f32 2.0, %v5310_v25  ;;  %v4304_v6 = vpack.i.bf16 %v1301_v10, %v1300_v43 }
 0x141   :  { %v1240_v5 = vmul.f32 %v1208_v50, %v5667_v51  ;;  %v1704_v27 = vsub.f32 %v1427_v0, %v1672_v2  ;;  %4162 = vmatmul.msk.f32.gmra.mxu1 %vm879_vm4, %v5667_v51  ;;  %v4384_v13 = vpack.i.bf16 %v5667_v51, %v5640_v7  ;;  %v1742_v50 = vmul.f32 %v5620_v34, %v1703_v39 }
 0x142   :  { %v1264_v0 = vsub.f32 %v1228_v54, %v5244_v31  ;;  %v1198_v33 = vmul.f32 2.0, %v1166_v40  ;;  %v1197_v39 = vmul.f32 2.0, %v1165_v28  ;;  %v1263_v53 = vsub.f32 %v1227_v29, %v5244_v31 }
 0x143   :  { %v1743_v49 = vmul.f32 %v5620_v34, %v1704_v27  ;;  %4385 = vrot.lane.b32.xlu0 %v4384_v13, %s4928_s15  ;;  %v1276_v47 = vsub.f32 %v1240_v5, %v5244_v31  ;;  %v1396_v40 = vmul.f32 2.0, %v1364_v37  ;;  %v1397_v28 = vmul.f32 2.0, %v1365_v20 }
 0x144   :  { %v1053_v8 = vpop.f32.mrf.mxu0  ;;  %v1230_v18 = vmul.f32 %v1198_v33, %v5429_v9 }
 0x145   :  { %v1113_v44 = vadd.f32 %v5200_v60, %v1053_v8  ;;  %v1177_v55 = vadd.f32 %v5310_v25, %v1053_v8  ;;  %v4294_v32 = vpack.i.bf16 %v1743_v49, %v1742_v50  ;;  %v5703_v5 = vmul.f32 %v5259_v46, %v1276_v47 }
 0x146   :  { %v1585_v2 = vpop.f32.mrf.mxu1  ;;  %v1380_v13 = vadd.f32 %v1348_v19, %v1053_v8  ;;  %v5710_v25 = vmul.f32 %v5259_v46, %v1264_v0  ;;  %v1229_v50 = vmul.f32 %v1197_v39, %v5412_v30  ;;  %v5721_v49 = vmul.f32 %v5259_v46, %v1263_v53 }
 0x147   :  { %v5705_v27 = vmul.f32 2.0, %v1113_v44  ;;  %v1209_v54 = vmul.f32 2.0, %v1177_v55  ;;  %4295 = vrot.lane.b32.xlu2 %v4294_v32, %s4931_s18  ;;  %4305 = vrot.lane.b32.xlu1 %v4304_v6, %s4929_s2  ;;  %v5713_v59 = vmul.f32 %v1411_v45, %v5703_v5  ;;  %v1673_v37 = vadd.f32 %v1585_v2, %v5326_v41 }
 0x148   :  { %v1412_v47 = vmul.f32 2.0, %v1380_v13  ;;  %v1428_v45 = vmul.f32 %v1396_v40, %v1300_v43  ;;  %v1349_v19 = vmul.f32 2.0, %v5340_v56  ;;  %v4319_v6 = vpack.i.bf16 %v5710_v25, %v5721_v49 }
 0x149   :  { %v1241_v29 = vmul.f32 %v1209_v54, %v5705_v27  ;;  %4163 = vmatmul.msk.f32.gmra.mxu1 %vm879_vm4, %v5705_v27  ;;  %v1266_v44 = vsub.f32 %v1230_v18, %v5244_v31  ;;  %v1429_v41 = vmul.f32 %v1397_v28, %v1301_v10  ;;  %v1265_v20 = vsub.f32 %v1229_v50, %v5244_v31 }
 0x14a   :  { %v1705_v43 = vsub.f32 %v1428_v45, %v1673_v37  ;;  %v1334_v54 = vmul.f32 2.0, %v5083_v52  ;;  %v2225_v37 = vld [vmem:[%s8338_s6 + $0x18] sm:$0xff] }
 0x14b   :  { %v1277_v1 = vsub.f32 %v1241_v29, %v5244_v31  ;;  %v5747_v18 = vmul.f32 %v5259_v46, %v1266_v44  ;;  %v1335_v29 = vmul.f32 2.0, %v5092_v57  ;;  %v5755_v50 = vmul.f32 %v5259_v46, %v1265_v20  ;;  %2254 = vmatpush.msrb.mxu0 %v2225_v37  ;;  %4255 = vmatpush.msra.mxu2 %v2225_v37 }
 0x14c   :  { %v1056_v8 = vpop.f32.mrf.mxu0  ;;  %v1744_v52 = vmul.f32 %v5620_v34, %v1705_v43  ;;  %v1350_v57 = vmul.f32 2.0, %v5362_v14 }
 0x14d   :  { %v1114_v0 = vadd.f32 %v5200_v60, %v1056_v8  ;;  %v1178_v33 = vadd.f32 %v5340_v56, %v1056_v8  ;;  %v5732_v55 = vmul.f32 %v5259_v46, %v1277_v1  ;;  %v1381_v56 = vadd.f32 %v1349_v19, %v1056_v8 }
 0x14e   :  { %v1588_v32 = vpop.f32.mrf.mxu1  ;;  %v1367_v44 = vadd.f32 %v1335_v29, %v5382_v48 }
 0x14f   :  { %v5735_v39 = vmul.f32 2.0, %v1114_v0  ;;  %v1210_v2 = vmul.f32 2.0, %v1178_v33  ;;  %v1674_v53 = vadd.f32 %v1588_v32, %v5349_v4  ;;  %4320 = vrot.lane.b32.xlu1 %v4319_v6, %s4929_s2  ;;  %v5741_v40 = vmul.f32 %v1412_v47, %v5732_v55 }
 0x150   :  { %v1366_v47 = vadd.f32 %v1334_v54, %v5365_v21  ;;  %v1413_v45 = vmul.f32 2.0, %v1381_v56  ;;  %v4334_v33 = vpack.i.bf16 %v5747_v18, %v5755_v50  ;;  %v1399_v48 = vmul.f32 2.0, %v1367_v44 }
 0x151   :  { %v1242_v13 = vmul.f32 %v1210_v2, %v5735_v39  ;;  %v1706_v10 = vsub.f32 %v1429_v41, %v1674_v53  ;;  %4164 = vmatmul.msk.f32.gmra.mxu1 %vm879_vm4, %v5735_v39  ;;  %v4394_v4 = vpack.i.bf16 %v5735_v39, %v5705_v27 }
 0x152   :  { %v1398_v2 = vmul.f32 2.0, %v1366_v47 }
 0x153   :  { %v1745_v28 = vmul.f32 %v5620_v34, %v1706_v10  ;;  %4395 = vrot.lane.b32.xlu0 %v4394_v4, %s4928_s15  ;;  %v1278_v1 = vsub.f32 %v1242_v13, %v5244_v31  ;;  %v1351_v4 = vmul.f32 2.0, %v5380_v35 }
 0x154   :  { %v1059_v8 = vpop.f32.mrf.mxu0  ;;  %v1430_v29 = vmul.f32 %v1398_v2, %v5721_v49  ;;  %v8433_v49 = vpack.i.bf16 %v5506_v15, %v5503_v12 }
 0x155   :  { %v1115_v19 = vadd.f32 %v5200_v60, %v1059_v8  ;;  %v1179_v6 = vadd.f32 %v5362_v14, %v1059_v8  ;;  %v4309_v0 = vpack.i.bf16 %v1745_v28, %v1744_v52  ;;  %v5770_v32 = vmul.f32 %v5259_v46, %v1278_v1 }
 0x156   :  { %v1591_v41 = vpop.f32.mrf.mxu1  ;;  %v1382_v43 = vadd.f32 %v1350_v57, %v1059_v8  ;;  %v1431_v1 = vmul.f32 %v1399_v48, %v5710_v25  ;;  %v8434_v25 = vld [vmem:[#allocation16_spill] sm:$0xff] }
 0x157   :  { %v5772_v21 = vmul.f32 2.0, %v1115_v19  ;;  %v1211_v20 = vmul.f32 2.0, %v1179_v6  ;;  %4310 = vrot.lane.b32.xlu2 %v4309_v0, %s4931_s18  ;;  %4335 = vrot.lane.b32.xlu1 %v4334_v33, %s4929_s2  ;;  %v5777_v14 = vmul.f32 %v1413_v45, %v5770_v32  ;;  %v1675_v54 = vadd.f32 %v1591_v41, %v5372_v26 }
 0x158   :  { %v1414_v13 = vmul.f32 2.0, %v1382_v43  ;;  %v1336_v19 = vmul.f32 2.0, %v5101_v62  ;;  %v1174_v0 = vadd.f32 %v8434_v25, %v5608_v38  ;;  %v1337_v41 = vmul.f32 2.0, %v5110_v3  ;;  %v8435_v62 = vld [vmem:[#allocation15_spill] sm:$0xff]  ;;  %v8436_v3 = vld [vmem:[#allocation18_spill] sm:$0xff] }
 0x159   :  { %v1243_v53 = vmul.f32 %v1211_v20, %v5772_v21  ;;  %4165 = vmatmul.msk.f32.gmra.mxu1 %vm879_vm4, %v5772_v21  ;;  %v1707_v45 = vsub.f32 %v1430_v29, %v1675_v54  ;;  %v1173_v20 = vadd.f32 %v8435_v62, %v5588_v61 }
 0x15a   :  { %v1368_v54 = vadd.f32 %v1336_v19, %v5405_v17 }
 0x15b   :  { %v1279_v56 = vsub.f32 %v1243_v53, %v5244_v31  ;;  %v1746_v43 = vmul.f32 %v5620_v34, %v1707_v45  ;;  %v2224_v53 = vld [vmem:[%s8338_s6 + $0x10] sm:$0xff] }
 0x15c   :  { %v1062_v10 = vpop.f32.mrf.mxu0  ;;  %2255 = vmatpush.msrb.mxu0 %v2224_v53  ;;  %4256 = vmatpush.msra.mxu2 %v2224_v53  ;;  %v8440_v53 = vld [vmem:[#allocation19_spill] sm:$0xff] }
 0x15d   :  { %v1116_v52 = vadd.f32 %v5200_v60, %v1062_v10  ;;  %v1180_v28 = vadd.f32 %v5380_v35, %v1062_v10  ;;  %v5789_v37 = vmul.f32 %v5259_v46, %v1279_v56  ;;  %v1383_v35 = vadd.f32 %v1351_v4, %v1062_v10 }
 0x15e   :  { %v1594_v47 = vpop.f32.mrf.mxu1  ;;  %v1352_v10 = vmul.f32 2.0, %v8436_v3  ;;  %v1206_v4 = vmul.f32 2.0, %v1174_v0 }
 0x15f   :  { %v5792_v26 = vmul.f32 2.0, %v1116_v52  ;;  %v1212_v8 = vmul.f32 2.0, %v1180_v28  ;;  %v1676_v57 = vadd.f32 %v1594_v47, %v5389_v58  ;;  %4350 = vrot.lane.b32.xlu1 %v8433_v49, %s4929_s2  ;;  %v5801_v6 = vmul.f32 %v1414_v13, %v5789_v37 }
 0x160   :  { %v1415_v56 = vmul.f32 2.0, %v1383_v35  ;;  %v1205_v47 = vmul.f32 2.0, %v1173_v20  ;;  %v8438_v49 = vpack.i.bf16 %v5553_v23, %v5550_v11 }
 0x161   :  { %8432 = vst [vmem:[#allocation39_spill] sm:$0xff] %v5792_v26  ;;  %v1244_v33 = vmul.f32 %v1212_v8, %v5792_v26  ;;  %v1708_v44 = vsub.f32 %v1431_v1, %v1676_v57  ;;  %4166 = vmatmul.msk.f32.gmra.mxu1 %vm879_vm4, %v5792_v26  ;;  %v4404_v58 = vpack.i.bf16 %v5792_v26, %v5772_v21 }
 0x162   :  { %v1369_v1 = vadd.f32 %v1337_v41, %v5422_v63  ;;  %v1238_v63 = vmul.f32 %v1206_v4, %v5614_v16 }
 0x163   :  { %v1747_v2 = vmul.f32 %v5620_v34, %v1708_v44  ;;  %4405 = vrot.lane.b32.xlu0 %v4404_v58, %s4928_s15  ;;  %v1280_v48 = vsub.f32 %v1244_v33, %v5244_v31  ;;  %v1237_v44 = vmul.f32 %v1205_v47, %v5600_v22  ;;  %v8442_v47 = vld [vmem:[#allocation38_spill] sm:$0xff] }
 0x164   :  { %v1065_v13 = vpop.f32.mrf.mxu0  ;;  %v1401_v33 = vmul.f32 2.0, %v1369_v1 }
 0x165   :  { %v1117_v29 = vadd.f32 %v5200_v60, %v1065_v13  ;;  %v1181_v52 = vadd.f32 %v8436_v3, %v1065_v13  ;;  %v4324_v28 = vpack.i.bf16 %v1747_v2, %v1746_v43  ;;  %v5826_v8 = vmul.f32 %v5259_v46, %v1280_v48 }
 0x166   :  { %v1597_v45 = vpop.f32.mrf.mxu1  ;;  %v1400_v60 = vmul.f32 2.0, %v1368_v54  ;;  %v1384_v19 = vadd.f32 %v1352_v10, %v1065_v13  ;;  %v1353_v48 = vmul.f32 2.0, %v8440_v53  ;;  %v5850_v54 = vld [vmem:[%s8337_s5] ss:$0 sm:$0xff]  ;;  %v1274_v3 = vsub.f32 %v1238_v63, %v5244_v31 }
 0x167   :  { %v5828_v17 = vmul.f32 2.0, %v1117_v29  ;;  %v1213_v57 = vmul.f32 2.0, %v1181_v52  ;;  %4325 = vrot.lane.b32.xlu2 %v4324_v28, %s4931_s18  ;;  %4360 = vrot.lane.b32.xlu1 %v8438_v49, %s4929_s2  ;;  %v5836_v35 = vmul.f32 %v1415_v56, %v5826_v8  ;;  %v1677_v58 = vadd.f32 %v1597_v45, %v5412_v30 }
 0x168   :  { %v1416_v20 = vmul.f32 2.0, %v1384_v19  ;;  %v1432_v43 = vmul.f32 %v1400_v60, %v5755_v50  ;;  %v1433_v10 = vmul.f32 %v1401_v33, %v5747_v18  ;;  %v1273_v50 = vsub.f32 %v1237_v44, %v5244_v31  ;;  %v5879_v33 = vld [vmem:[%s8333_s1] sm:$0xff] }
 0x169   :  { %8437 = vst [vmem:[#allocation16_spill] sm:$0xff] %v5828_v17  ;;  %v1245_v0 = vmul.f32 %v1213_v57, %v5828_v17  ;;  %4167 = vmatmul.msk.f32.gmra.mxu1 %vm879_vm4, %v5828_v17  ;;  %v8443_v45 = vpack.i.bf16 %v5594_v24, %v8442_v47  ;;  %v8444_v57 = vld [vmem:[#allocation8_spill] sm:$0xff]  ;;  %v4046_v44 = vmul.f32 -1.442695, %v5879_v33 }
 0x16a   :  { %8439 = vst [vmem:[#allocation15_spill] sm:$0xff] %v5836_v35  ;;  %v1709_v29 = vsub.f32 %v1432_v43, %v1677_v58  ;;  %v1338_v49 = vmul.f32 2.0, %v8444_v57  ;;  %v8446_v58 = vld [vmem:[#allocation10_spill] sm:$0xff]  ;;  %v8470_v35 = vld [vmem:[#allocation35_spill] sm:$0xff] }
 0x16b   :  { %v1281_v41 = vsub.f32 %v1245_v0, %v5244_v31  ;;  %4521 = vpow2.f32 %v4046_v44 }
 0x16c   :  { %v1068_v2 = vpop.f32.mrf.mxu0 }
 0x16d   :  { %v1118_v56 = vadd.f32 %v5850_v54, %v1068_v2  ;;  %v1182_v13 = vadd.f32 %v8440_v53, %v1068_v2  ;;  %v1320_v30 = vmul.f32 %v5259_v46, %v1281_v41  ;;  %v1385_v60 = vadd.f32 %v1353_v48, %v1068_v2  ;;  %v2223_v48 = vld [vmem:[%s8338_s6 + $0x8] sm:$0xff] }
 0x16e   :  { %v1600_v4 = vpop.f32.mrf.mxu1  ;;  %v1339_v41 = vmul.f32 2.0, %v8446_v58  ;;  %v5887_v2 = vmul.f32 %v5259_v46, %v1273_v50  ;;  %2256 = vmatpush.msrb.mxu0 %v2223_v48  ;;  %4257 = vmatpush.msra.mxu2 %v2223_v48  ;;  %v8448_v50 = vld [vmem:[#allocation24_spill] sm:$0xff] }
 0x16f   :  { %v5858_v52 = vmul.f32 2.0, %v1118_v56  ;;  %v1214_v28 = vmul.f32 2.0, %v1182_v13  ;;  %v1678_v1 = vadd.f32 %v1600_v4, %v5429_v9  ;;  %4370 = vrot.lane.b32.xlu1 %v8443_v45, %s4929_s2  ;;  %v5866_v19 = vmul.f32 %v1416_v20, %v1320_v30  ;;  %v8449_v45 = vld [vmem:[#allocation20_spill] sm:$0xff] }
 0x170   :  { %v5874_v9 = vmul.f32 %v5259_v46, %v1274_v3  ;;  %v1748_v20 = vmul.f32 %v5620_v34, %v1709_v29  ;;  %v1417_v56 = vmul.f32 2.0, %v1385_v60  ;;  %v8447_v3 = vld [vmem:[#allocation21_spill] sm:$0xff] }
 0x171   :  { %8441 = vst [vmem:[#allocation18_spill] sm:$0xff] %v5858_v52  ;;  %v1246_v18 = vmul.f32 %v1214_v28, %v5858_v52  ;;  %v1710_v63 = vsub.f32 %v1433_v10, %v1678_v1  ;;  %4168 = vmatmul.msk.f32.gmra.mxu1 %vm879_vm4, %v5858_v52  ;;  %v4414_v0 = vpack.i.bf16 %v5858_v52, %v5828_v17  ;;  %v5903_v60 = vld [vmem:[%s8333_s1 + $0x8] sm:$0xff] }
 0x172   :  { %8445 = vst [vmem:[#allocation19_spill] sm:$0xff] %v5866_v19  ;;  %v1370_v10 = vadd.f32 %v1338_v49, %v8447_v3  ;;  %v4379_v28 = vpack.i.bf16 %v5874_v9, %v5887_v2  ;;  %v1371_v1 = vadd.f32 %v1339_v41, %v8448_v50  ;;  %v4047_v49 = vmul.f32 -1.442695, %v5903_v60  ;;  %v4522_v3 = vpop.eup %4521 }
 0x173   :  { %v1749_v43 = vmul.f32 %v5620_v34, %v1710_v63  ;;  %4415 = vrot.lane.b32.xlu0 %v4414_v0, %s4928_s15  ;;  %v1282_v53 = vsub.f32 %v1246_v18, %v5244_v31 }
 0x174   :  { %v1071_v13 = vpop.f32.mrf.mxu0  ;;  %v1402_v41 = vmul.f32 2.0, %v1370_v10  ;;  %v1403_v44 = vmul.f32 2.0, %v1371_v1  ;;  %4523 = vpow2.f32 %v4047_v49 }
 0x175   :  { %v1119_v4 = vadd.f32 %v5850_v54, %v1071_v13  ;;  %v4339_v29 = vpack.i.bf16 %v1749_v43, %v1748_v20  ;;  %v1183_v31 = vadd.f32 %v8449_v45, %v1071_v13  ;;  %v1321_v18 = vmul.f32 %v5259_v46, %v1282_v53  ;;  %v8452_v43 = vld [vmem:[#allocation22_spill] sm:$0xff] }
 0x176   :  { %v1603_v57 = vpop.f32.mrf.mxu1 }
 0x177   :  { %v5906_v63 = vmul.f32 2.0, %v1119_v4  ;;  %4340 = vrot.lane.b32.xlu2 %v4339_v29, %s4931_s18  ;;  %4380 = vrot.lane.b32.xlu1 %v4379_v28, %s4929_s2  ;;  %v4419_v0 = vpack.i.bf16 %v1321_v18, %v1320_v30  ;;  %v5910_v58 = vmul.f32 %v1417_v56, %v1321_v18  ;;  %v1215_v20 = vmul.f32 2.0, %v1183_v31  ;;  %v8453_v56 = vld [vmem:[#allocation23_spill] sm:$0xff]  ;;  %v5928_v28 = vld [vmem:[%s8333_s1 + $0x10] sm:$0xff] }
 0x178   :  { %v1679_v53 = vadd.f32 %v1603_v57, %v8452_v43  ;;  %v1434_v4 = vmul.f32 %v1402_v41, %v5503_v12  ;;  %v4389_v29 = vpack.i.bf16 %v5703_v5, %v5662_v36  ;;  %v4048_v50 = vmul.f32 -1.442695, %v5928_v28 }
 0x179   :  { %8450 = vst [vmem:[#allocation38_spill] sm:$0xff] %v5906_v63  ;;  %4169 = vmatmul.msk.f32.gmra.mxu1 %vm879_vm4, %v5906_v63  ;;  %v1247_v1 = vmul.f32 %v1215_v20, %v5906_v63  ;;  %v1435_v12 = vmul.f32 %v1403_v44, %v5506_v15  ;;  %v5937_v36 = vadd.f32 1.0, %v4522_v3  ;;  %v1354_v5 = vmul.f32 2.0, %v8449_v45  ;;  %v5947_v15 = vld [vmem:[%s8333_s1 + $0x18] sm:$0xff] }
 0x17a   :  { %8451 = vst [vmem:[#allocation8_spill] sm:$0xff] %v5910_v58  ;;  %v1711_v57 = vsub.f32 %v1434_v4, %v1679_v53  ;;  %v4524_v43 = vpop.eup %4523  ;;  %v8456_v58 = vld [vmem:[#allocation11_spill] sm:$0xff]  ;;  %4525 = vpow2.f32 %v4048_v50  ;;  %v4049_v44 = vmul.f32 -1.442695, %v5947_v15  ;;  %v8457_v53 = vld [vmem:[#allocation12_spill] sm:$0xff] }
 0x17b   :  { %4420 = vrot.lane.b32.xlu0 %v4419_v0, %s4929_s2  ;;  %v8455_v0 = vld [vmem:[#allocation25_spill] sm:$0xff]  ;;  %v1340_v52 = vmul.f32 2.0, %v8456_v58  ;;  %v1341_v3 = vmul.f32 2.0, %v8457_v53  ;;  %v4848_v4 = vld [vmem:[%s8336_s4] ss:$0 sm:$0xff]  ;;  %4527 = vrcp.f32 %v5937_v36  ;;  %v5960_v50 = vadd.f32 1.0, %v4524_v43 }
 0x17c   :  { %v5916_v48 = vpop.f32.mrf.mxu0  ;;  %v1750_v45 = vmul.f32 %v5620_v34, %v1711_v57  ;;  %4529 = vpow2.f32 %v4049_v44  ;;  %v8460_v43 = vld [vmem:[#allocation30_spill] sm:$0xff]  ;;  %v5985_v44 = vld [vmem:[%s8333_s1 + $0x28] sm:$0xff]  ;;  %vm220_vm7 = vweird.f32 %v5937_v36 }
 0x17d   :  { %v1120_v30 = vadd.f32 %v5850_v54, %v5916_v48  ;;  %v1184_v10 = vadd.f32 %v8453_v56, %v5916_v48  ;;  %4531 = vrcp.f32 %v5960_v50  ;;  %vm235_vm10 = vweird.f32 %v5960_v50 }
 0x17e   :  { %v1606_v31 = vpop.f32.mrf.mxu1 }
 0x17f   :  { %v5933_v18 = vmul.f32 2.0, %v1120_v30  ;;  %v1216_v49 = vmul.f32 2.0, %v1184_v10  ;;  %v1680_v41 = vadd.f32 %v1606_v31, %v8455_v0  ;;  %4390 = vrot.lane.b32.xlu1 %v4389_v29, %s4929_s2  ;;  %v1283_v30 = vsub.f32 %v1247_v1, %v4848_v4  ;;  %v2222_v29 = vld [vmem:[%s8338_s6] sm:$0xff]  ;;  %s4935_s6 = smov 8  }
 0x180   :  { %2257 = vmatpush.msrb.mxu0 %v2222_v29  ;;  %4258 = vmatpush.msra.mxu2 %v2222_v29  ;;  %v4399_v0 = vpack.i.bf16 %v5770_v32, %v5732_v55  ;;  %v4526_v32 = vpop.eup %4525  ;;  %v8461_v29 = vld [vmem:[#allocation28_spill] sm:$0xff] }
 0x181   :  { %8454 = vst [vmem:[#allocation10_spill] sm:$0xff] %v5933_v18  ;;  %v1248_v20 = vmul.f32 %v1216_v49, %v5933_v18  ;;  %v1712_v19 = vsub.f32 %v1435_v12, %v1680_v41  ;;  %4170 = vmatmul.msk.f32.gmra.mxu1 %vm879_vm4, %v5933_v18  ;;  %v1386_v12 = vadd.f32 %v1354_v5, %v1071_v13  ;;  %v5972_v41 = vld [vmem:[%s8333_s1 + $0x20] sm:$0xff] }
 0x182   :  { %v4050_v13 = vmul.f32 -1.442695, %v5972_v41 }
 0x183   :  { %v1751_v58 = vmul.f32 %v5620_v34, %v1712_v19  ;;  %v1284_v10 = vsub.f32 %v1248_v20, %v4848_v4  ;;  %v8459_v19 = vld [vmem:[#allocation27_spill] sm:$0xff]  ;;  %v1373_v20 = vadd.f32 %v1341_v3, %v8460_v43  ;;  %v1355_v3 = vmul.f32 2.0, %v8453_v56 }
 0x184   :  { %v5962_v31 = vpop.f32.mrf.mxu0  ;;  %v1372_v57 = vadd.f32 %v1340_v52, %v8459_v19  ;;  %v1322_v52 = vmul.f32 %v5259_v46, %v1283_v30  ;;  %v5992_v30 = vpop.eup %4527  ;;  %4533 = vpow2.f32 %v4050_v13 }
 0x185   :  { %8458 = vst [vmem:[#allocation21_spill] sm:$0xff] %v5962_v31  ;;  %v1121_v49 = vadd.f32 %v5850_v54, %v5962_v31  ;;  %v4429_v1 = vpack.i.bf16 %v1751_v58, %v1750_v45  ;;  %v1323_v55 = vmul.f32 %v5259_v46, %v1284_v10  ;;  %v4051_v45 = vmul.f32 -1.442695, %v5985_v44 }
 0x186   :  { %v1609_v5 = vpop.f32.mrf.mxu1  ;;  %v1418_v58 = vmul.f32 2.0, %v1386_v12  ;;  %v1404_v4 = vmul.f32 2.0, %v1372_v57  ;;  %v1405_v10 = vmul.f32 2.0, %v1373_v20  ;;  %v1387_v12 = vadd.f32 %v1355_v3, %v5916_v48  ;;  %v6012_v20 = vld [vmem:[%s8333_s1 + $0x30] sm:$0xff]  ;;  %v8464_v3 = vld [vmem:[#allocation31_spill] sm:$0xff] }
 0x187   :  { %v5976_v53 = vmul.f32 2.0, %v1121_v49  ;;  %4430 = vrot.lane.b32.xlu2 %v4429_v1, %s4931_s18  ;;  %4400 = vrot.lane.b32.xlu1 %v4399_v0, %s4929_s2  ;;  %v1681_v19 = vadd.f32 %v1609_v5, %v8461_v29  ;;  %v4434_v49 = vpack.i.bf16 %v1323_v55, %v1322_v52  ;;  %v4530_v1 = vpop.eup %4529  ;;  %v5995_v0 = vadd.f32 1.0, %v4526_v32 }
 0x188   :  { %4535 = vpow2.f32 %v4051_v45  ;;  %v6000_v43 = vmul.f32 %v1418_v58, %v1322_v52  ;;  %v216_v57 = vmul.f32 %v5992_v30, %v5937_v36  ;;  %v1436_v46 = vmul.f32 %v1404_v4, %v5550_v11  ;;  %v6015_v32 = vpop.eup %4531 }
 0x189   :  { %4171 = vmatmul.msk.f32.gmra.mxu1 %vm879_vm4, %v5976_v53  ;;  %v4409_v5 = vpack.i.bf16 %v5826_v8, %v5789_v37  ;;  %v4052_v48 = vmul.f32 -1.442695, %v6012_v20  ;;  %v1437_v11 = vmul.f32 %v1405_v10, %v5553_v23  ;;  %v6023_v37 = vadd.f32 1.0, %v4530_v1 }
 0x18a   :  { %8463 = vst [vmem:[#allocation20_spill] sm:$0xff] %v6000_v43  ;;  %v1713_v45 = vsub.f32 %v1436_v46, %v1681_v19  ;;  %v1419_v8 = vmul.f32 2.0, %v1387_v12  ;;  %v4534_v29 = vpop.eup %4533  ;;  %4537 = vrcp.f32 %v5995_v0  ;;  %v8465_v43 = vld [vmem:[#allocation13_spill] sm:$0xff]  ;;  %v217_v31 = vsub.f32 1.0, %v216_v57  ;;  %v8466_v19 = vld [vmem:[#allocation14_spill] sm:$0xff] }
 0x18b   :  { %4539 = vpow2.f32 %v4052_v48  ;;  %v231_v10 = vmul.f32 %v6015_v32, %v5960_v50  ;;  %vm221_vm8 = vweird.f32 %v5992_v30  ;;  %vm236_vm11 = vweird.f32 %v6015_v32 }
 0x18c   :  { %v5998_v56 = vpop.f32.mrf.mxu0  ;;  %v1752_v1 = vmul.f32 %v5620_v34, %v1713_v45  ;;  %4541 = vrcp.f32 %v6023_v37  ;;  %v6045_v48 = vmul.f32 %v1419_v8, %v1323_v55  ;;  %vm6077_vm9 = vmor %vm220_vm7, %vm221_vm8  ;;  %vm250_vm15 = vweird.f32 %v5995_v0 }
 0x18d   :  { %8462 = vst [vmem:[#allocation24_spill] sm:$0xff] %v5998_v56  ;;  %v1122_v13 = vadd.f32 %v5850_v54, %v5998_v56  ;;  %v1342_v56 = vmul.f32 2.0, %v8465_v43  ;;  %v6040_v43 = vld [vmem:[%s8333_s1 + $0x38] sm:$0xff]  ;;  %vm6109_vm13 = vmor %vm235_vm10, %vm236_vm11  ;;  %vm265_vm2 = vweird.f32 %v6023_v37 }
 0x18e   :  { %v1612_v52 = vpop.f32.mrf.mxu1  ;;  %v4536_v23 = vpop.eup %4535  ;;  %v4053_v57 = vmul.f32 -1.442695, %v6040_v43  ;;  %8468 = vst [vmem:[#allocation23_spill] sm:$0xff] %v6045_v48 }
 0x18f   :  { %v6017_v58 = vmul.f32 2.0, %v1122_v13  ;;  %v1682_v4 = vadd.f32 %v1612_v52, %v8464_v3  ;;  %4410 = vrot.lane.b32.xlu1 %v4409_v5, %s4929_s2  ;;  %4435 = vrot.lane.b32.xlu2 %v4434_v49, %s4929_s2  ;;  %v1343_v49 = vmul.f32 2.0, %v8466_v19  ;;  %v4424_v13 = vpack.i.bf16 %v5933_v18, %v5906_v63  ;;  %v8469_v52 = vld [vmem:[#allocation33_spill] sm:$0xff] }
 0x190   :  { %v1374_v45 = vadd.f32 %v1342_v56, %v8469_v52  ;;  %v6053_v19 = vadd.f32 1.0, %v4536_v23  ;;  %v232_v63 = vsub.f32 1.0, %v231_v10  ;;  %v6055_v17 = vpop.eup %4537  ;;  %4543 = vpow2.f32 %v4053_v57  ;;  %v8472_v56 = vld [vmem:[#allocation36_spill] sm:$0xff]  ;;  %v8475_v52 = vld [vmem:[#allocation34_spill] sm:$0xff] }
 0x191   :  { %v1714_v46 = vsub.f32 %v1437_v11, %v1682_v4  ;;  %4172 = vmatmul.msk.f32.gmra.mxu1 %vm879_vm4, %v6017_v58  ;;  %v218_v11 = vmul.f32 %v5992_v30, %v217_v31  ;;  %v1375_v26 = vadd.f32 %v1343_v49, %v8470_v35  ;;  %v4540_v31 = vpop.eup %4539  ;;  %v1124_v8 = vadd.f32 %v5850_v54, %v8472_v56  ;;  %v6073_v49 = vpop.permute.xlu0 %4270 }
 0x192   :  { %v226_v35 = vand.u32 2147483648, %v5937_v36  ;;  %v6070_v10 = vpop.eup %4541  ;;  %vm251_vm0 = vweird.f32 %v6055_v17 }
 0x193   :  { %v1753_v12 = vmul.f32 %v5620_v34, %v1714_v46  ;;  %v6051_v46 = vadd.f32 1.0, %v4534_v29  ;;  %v1406_v29 = vmul.f32 2.0, %v1374_v45  ;;  %v219_v23 = vadd.f32 %v5992_v30, %v218_v11  ;;  %vm6161_vm1 = vmor %vm250_vm15, %vm251_vm0 }
 0x194   :  { %v6043_v5 = vpop.f32.mrf.mxu0  ;;  %v1407_v57 = vmul.f32 2.0, %v1375_v26  ;;  %v6087_v11 = vadd.f32 1.0, %v4540_v31  ;;  %v261_v26 = vmul.f32 %v6070_v10, %v6023_v37  ;;  %vm266_vm3 = vweird.f32 %v6070_v10 }
 0x195   :  { %8467 = vst [vmem:[#allocation22_spill] sm:$0xff] %v6043_v5  ;;  %v1123_v3 = vadd.f32 %v5850_v54, %v6043_v5  ;;  %v4444_v4 = vpack.i.bf16 %v1753_v12, %v1752_v1  ;;  %4545 = vrcp.f32 %v6051_v46  ;;  %v224_v54 = vand.u32 2147483647, %v5937_v36  ;;  %vm6180_vm8 = vmor %vm265_vm2, %vm266_vm3 }
 0x196   :  { %v1615_v18 = vpop.f32.mrf.mxu1  ;;  %v233_v12 = vmul.f32 %v6015_v32, %v232_v63  ;;  %4547 = vrcp.f32 %v6053_v19  ;;  %v223_v63 = vsel %vm6077_vm9, %v5992_v30, %v219_v23  ;;  %v227_v36 = vor.u32 1.1754944e-38, %v226_v35  ;;  %v4544_v5 = vpop.eup %4543  ;;  %v8478_v23 = vld [vmem:[#allocation37_spill] sm:$0xff] }
 0x197   :  { %v6060_v55 = vmul.f32 2.0, %v1123_v3  ;;  %4445 = vrot.lane.b32.xlu2 %v4444_v4, %s4931_s18  ;;  %4425 = vrot.lane.b32.xlu1 %v4424_v13, %s4928_s15  ;;  %v246_v13 = vmul.f32 %v6055_v17, %v5995_v0  ;;  %v1683_v45 = vadd.f32 %v1615_v18, %v8475_v52  ;;  %v6089_v3 = vmul.f32 2.0, %v1124_v8 }
 0x198   :  { %v1438_v4 = vmul.f32 %v1406_v29, %v8442_v47  ;;  %vm6099_vm12 = vcmp.eq.f32.partialorder %v224_v54, 8.507059e+37  ;;  %v234_v8 = vadd.f32 %v6015_v32, %v233_v12  ;;  %v241_v52 = vand.u32 2147483648, %v5960_v50 }
 0x199   :  { %8471 = vst [vmem:[#allocation25_spill] sm:$0xff] %v6060_v55  ;;  %4173 = vmatmul.msk.f32.gmra.mxu1 %vm879_vm4, %v6060_v55  ;;  %v247_v56 = vsub.f32 1.0, %v246_v13  ;;  %v1439_v30 = vmul.f32 %v1407_v57, %v5594_v24  ;;  %v239_v29 = vand.u32 2147483647, %v5960_v50  ;;  %4549 = vrcp.f32 %v6087_v11  ;;  %v6125_v24 = vld [vmem:[%s8333_s1 + $0x40] sm:$0xff] }
 0x19a   :  { %v1715_v55 = vsub.f32 %v1438_v4, %v1683_v45  ;;  %v1344_v54 = vmul.f32 2.0, %v8435_v62  ;;  %v6120_v13 = vadd.f32 1.0, %v4544_v5  ;;  %v4054_v57 = vmul.f32 -1.442695, %v6125_v24 }
 0x19b   :  { %v6114_v1 = vpop.eup %4545  ;;  %v262_v50 = vsub.f32 1.0, %v261_v26  ;;  %v228_v4 = vsel %vm6099_vm12, %v227_v36, %v223_v63  ;;  %v238_v62 = vsel %vm6109_vm13, %v6015_v32, %v234_v8  ;;  %v242_v5 = vor.u32 1.1754944e-38, %v241_v52  ;;  %v6140_v26 = vpop.permute.xlu0 %4275 }
 0x19c   :  { %v6118_v12 = vpop.eup %4547  ;;  %v1754_v48 = vmul.f32 %v5620_v34, %v1715_v55  ;;  %vm240_vm14 = vcmp.eq.f32.partialorder %v239_v29, 8.507059e+37  ;;  %v276_v32 = vmul.f32 %v6114_v1, %v6051_v46  ;;  %v254_v47 = vand.u32 2147483647, %v5995_v0 }
 0x19d   :  { %v263_v55 = vmul.f32 %v6070_v10, %v262_v50  ;;  %v243_v8 = vsel %vm240_vm14, %v242_v5, %v238_v62  ;;  %v6168_v50 = vpop.permute.xlu2 %4290  ;;  %v269_v5 = vand.u32 2147483647, %v6023_v37  ;;  %4551 = vpow2.f32 %v4054_v57 }
 0x19e   :  { %v1618_v31 = vpop.f32.mrf.mxu1  ;;  %vm255_vm7 = vcmp.eq.f32.partialorder %v254_v47, 8.507059e+37  ;;  %vm280_vm10 = vweird.f32 %v6051_v46  ;;  %vm281_vm11 = vweird.f32 %v6114_v1  ;;  %4553 = vrcp.f32 %v6120_v13 }
 0x19f   :  { %v1684_v35 = vadd.f32 %v1618_v31, %v8478_v23  ;;  %v248_v31 = vmul.f32 %v6055_v17, %v247_v56  ;;  %v1345_v23 = vmul.f32 2.0, %v8434_v25  ;;  %v695_v56 = vmul.f32 %v5879_v33, %v228_v4  ;;  %v6149_v36 = vpop.eup %4549  ;;  %vm6221_vm12 = vmor %vm280_vm10, %vm281_vm11 }
 0x1a0   :  { %v256_v25 = vand.u32 2147483648, %v5995_v0  ;;  %v264_v0 = vadd.f32 %v6070_v10, %v263_v55  ;;  %v4273_v55 = vunpack.i.h.bf16 %v6073_v49  ;;  %vm270_vm9 = vcmp.eq.f32.partialorder %v269_v5, 8.507059e+37 }
 0x1a1   :  { %v1716_v45 = vsub.f32 %v1439_v30, %v1684_v35  ;;  %4174 = vmatmul.msk.f32.gmra.mxu1 %vm879_vm4, %v6089_v3  ;;  %v1376_v35 = vadd.f32 %v1344_v54, %v5588_v61  ;;  %v4272_v61 = vunpack.i.l.bf16 %v6073_v49  ;;  %v249_v52 = vadd.f32 %v6055_v17, %v248_v31 }
 0x1a2   :  { %v1377_v29 = vadd.f32 %v1345_v23, %v5608_v38  ;;  %v4277_v54 = vunpack.i.l.bf16 %v6140_v26  ;;  %v271_v38 = vand.u32 2147483648, %v6023_v37  ;;  %v257_v62 = vor.u32 1.1754944e-38, %v256_v25 }
 0x1a3   :  { %v1755_v30 = vmul.f32 %v5620_v34, %v1716_v45  ;;  %v277_v45 = vsub.f32 1.0, %v276_v32  ;;  %v2124_v31 = vsel %vm879_vm4, %v695_v56, %v4272_v61  ;;  %v696_v56 = vmul.f32 %v5903_v60, %v243_v8  ;;  %v6198_v60 = vld [vmem:[%s8333_s1 + $0x48] sm:$0xff] }
 0x1a4   :  { %v1409_v32 = vmul.f32 2.0, %v1377_v29  ;;  %v2157_v25 = vsel %vm2156_vm5, %v2124_v31, %v4277_v54  ;;  %v272_v61 = vor.u32 1.1754944e-38, %v271_v38  ;;  %v4055_v49 = vmul.f32 -1.442695, %v6198_v60 }
 0x1a5   :  { %v4449_v63 = vpack.i.bf16 %v1755_v30, %v1754_v48  ;;  %v1408_v48 = vmul.f32 2.0, %v1376_v35  ;;  %v253_v30 = vsel %vm6161_vm1, %v6055_v17, %v249_v52  ;;  %v291_v52 = vmul.f32 %v6118_v12, %v6053_v19 }
 0x1a6   :  { %v1621_v18 = vpop.f32.mrf.mxu1  ;;  %v258_v47 = vsel %vm255_vm7, %v257_v62, %v253_v30  ;;  %v4278_v29 = vunpack.i.h.bf16 %v6140_v26  ;;  %v1441_v33 = vmul.f32 %v1409_v32, %v5874_v9  ;;  %v284_v9 = vand.u32 2147483647, %v6051_v46  ;;  %v4552_v32 = vpop.eup %4551 }
 0x1a7   :  { %4450 = vrot.lane.b32.xlu2 %v4449_v63, %s4931_s18  ;;  %v1685_v63 = vadd.f32 %v1621_v18, %v5600_v22  ;;  %v1440_v37 = vmul.f32 %v1408_v48, %v5887_v2  ;;  %v268_v22 = vsel %vm6180_vm8, %v6070_v10, %v264_v0  ;;  %v4292_v18 = vunpack.i.l.bf16 %v6168_v50  ;;  %v4296_v0 = vpop.permute.xlu2 %4295 }
 0x1a8   :  { %v278_v2 = vmul.f32 %v6114_v1, %v277_v45  ;;  %v697_v48 = vmul.f32 %v5928_v28, %v258_v47  ;;  %v273_v38 = vsel %vm270_vm9, %v272_v61, %v268_v22  ;;  %v292_v62 = vsub.f32 1.0, %v291_v52 }
 0x1a9   :  { %v4281_v4 = vpop.permute.xlu1 %4280  ;;  %v1717_v54 = vsub.f32 %v1440_v37, %v1685_v63  ;;  %v698_v35 = vmul.f32 %v5947_v15, %v273_v38  ;;  %v4297_v63 = vunpack.i.l.bf16 %v4296_v0  ;;  %vm285_vm13 = vcmp.eq.f32.partialorder %v284_v9, 8.507059e+37  ;;  %v6250_v38 = vpop.eup %4553 }
 0x1aa   :  { %v4282_v23 = vunpack.i.l.bf16 %v4281_v4  ;;  %v4283_v57 = vunpack.i.h.bf16 %v4281_v4  ;;  %v279_v45 = vadd.f32 %v6114_v1, %v278_v2  ;;  %v293_v37 = vmul.f32 %v6118_v12, %v292_v62 }
 0x1ab   :  { %v1756_v28 = vmul.f32 %v5620_v34, %v1717_v54  ;;  %vm295_vm14 = vweird.f32 %v6053_v19  ;;  %vm296_vm15 = vweird.f32 %v6118_v12  ;;  %4555 = vpow2.f32 %v4055_v49 }
 0x1ac   :  { %v2190_v17 = vsel %vm2189_vm6, %v2157_v25, %v4282_v23  ;;  %v2125_v23 = vsel %vm879_vm4, %v696_v56, %v4273_v55  ;;  %v4293_v2 = vunpack.i.h.bf16 %v6168_v50  ;;  %vm6240_vm0 = vmor %vm295_vm14, %vm296_vm15  ;;  %v6252_v50 = vadd.f32 1.0, %v4552_v32 }
 0x1ad   :  { %2258 = vmatmul.f32.vlgmr.msrb.gmra.mxu0 %v2190_v17  ;;  %v2158_v30 = vsel %vm2156_vm5, %v2125_v23, %v4278_v29  ;;  %v294_v29 = vadd.f32 %v6118_v12, %v293_v37  ;;  %v4298_v62 = vunpack.i.h.bf16 %v4296_v0  ;;  %v6259_v23 = vld [vmem:[%s8333_s1 + $0x50] sm:$0xff]  ;;  %v321_v32 = vmul.f32 %v6250_v38, %v6120_v13 }
 0x1ae   :  { %v1624_v8 = vpop.f32.mrf.mxu1  ;;  %v2191_v56 = vsel %vm2189_vm6, %v2158_v30, %v4283_v57  ;;  %4557 = vrcp.f32 %v6252_v50  ;;  %vm310_vm2 = vweird.f32 %v6087_v11  ;;  %vm311_vm3 = vweird.f32 %v6149_v36 }
 0x1af   :  { %v1686_v10 = vadd.f32 %v1624_v8, %v5614_v16  ;;  %v286_v16 = vand.u32 2147483648, %v6051_v46  ;;  %v283_v46 = vsel %vm6221_vm12, %v6114_v1, %v279_v45  ;;  %v306_v8 = vmul.f32 %v6149_v36, %v6087_v11  ;;  %vm6296_vm7 = vmor %vm310_vm2, %vm311_vm3 }
 0x1b0   :  { %v301_v1 = vand.u32 2147483648, %v6053_v19  ;;  %vm325_vm9 = vweird.f32 %v6120_v13  ;;  %vm326_vm10 = vweird.f32 %v6250_v38 }
 0x1b1   :  { %v1718_v5 = vsub.f32 %v1441_v33, %v1686_v10  ;;  %v4286_v31 = vpop.permute.xlu1 %4285  ;;  %v287_v22 = vor.u32 1.1754944e-38, %v286_v16  ;;  %v6245_v10 = vpop.permute.xlu0 %4300  ;;  %vm6334_vm11 = vmor %vm325_vm9, %vm326_vm10 }
 0x1b2   :  { %v4287_v26 = vunpack.i.l.bf16 %v4286_v31  ;;  %v4288_v25 = vunpack.i.h.bf16 %v4286_v31  ;;  %v307_v31 = vsub.f32 1.0, %v306_v8  ;;  %v4556_v45 = vpop.eup %4555  ;;  %v4302_v9 = vunpack.i.l.bf16 %v6245_v10 }
 0x1b3   :  { %v1757_v4 = vmul.f32 %v5620_v34, %v1718_v5  ;;  %v288_v54 = vsel %vm285_vm13, %v287_v22, %v283_v46  ;;  %v6293_v22 = vld [vmem:[%s8333_s1 + $0x58] sm:$0xff]  ;;  %vm340_vm13 = vweird.f32 %v6252_v50 }
 0x1b4   :  { %v2126_v55 = vsel %vm879_vm4, %v697_v48, %v4287_v26  ;;  %v299_v48 = vand.u32 2147483647, %v6053_v19  ;;  %v4056_v26 = vmul.f32 -1.442695, %v6259_v23  ;;  %v298_v19 = vsel %vm6240_vm0, %v6118_v12, %v294_v29 }
 0x1b5   :  { %2261 = vmatmul.f32.gmra.mxu0 %v2191_v56  ;;  %v2159_v61 = vsel %vm2156_vm5, %v2126_v55, %v4292_v18  ;;  %v4454_v52 = vpack.i.bf16 %v1757_v4, %v1756_v28  ;;  %v2127_v18 = vsel %vm879_vm4, %v698_v35, %v4288_v25  ;;  %v302_v28 = vor.u32 1.1754944e-38, %v301_v1  ;;  %v4311_v25 = vpop.permute.xlu2 %4310 }
 0x1b6   :  { %v1627_v15 = vpop.f32.mrf.mxu1  ;;  %v2192_v47 = vsel %vm2189_vm6, %v2159_v61, %v4297_v63  ;;  %v2160_v57 = vsel %vm2156_vm5, %v2127_v18, %v4293_v2  ;;  %v4439_v4 = vpack.i.bf16 %v6017_v58, %v5976_v53  ;;  %vm300_vm1 = vcmp.eq.f32.partialorder %v299_v48, 8.507059e+37  ;;  %v6300_v2 = vpop.eup %4557 }
 0x1b7   :  { %2264 = vmatmul.f32.vlgmr.msra.gmra.mxu2 %v2192_v47  ;;  %4455 = vrot.lane.b32.xlu2 %v4454_v52, %s4931_s18  ;;  %v1687_v49 = vadd.f32 %v1627_v15, %v5640_v7  ;;  %v699_v7 = vmul.f32 %v5972_v41, %v288_v54  ;;  %v2193_v16 = vsel %vm2189_vm6, %v2160_v57, %v4298_v62  ;;  %v6278_v63 = vadd.f32 1.0, %v4556_v45 }
 0x1b8   :  { %v308_v12 = vmul.f32 %v6149_v36, %v307_v31  ;;  %4440 = vrot.lane.b32.xlu0 %v4439_v4, %s4928_s15  ;;  %4559 = vpow2.f32 %v4056_v26  ;;  %v316_v52 = vand.u32 2147483648, %v6087_v11  ;;  %v4312_v37 = vunpack.i.l.bf16 %v4311_v25 }
 0x1b9   :  { %v6254_v5 = vpop.permute.xlu1 %4305  ;;  %v1719_v30 = vsub.f32 %v5674_v42, %v1687_v49  ;;  %v2128_v56 = vsel %vm879_vm4, %v699_v7, %v4302_v9  ;;  %v322_v47 = vsub.f32 1.0, %v321_v32  ;;  %v4057_v46 = vmul.f32 -1.442695, %v6293_v22  ;;  %v6323_v31 = vpop.permute.xlu0 %4315 }
 0x1ba   :  { %v4307_v35 = vunpack.i.l.bf16 %v6254_v5  ;;  %v309_v15 = vadd.f32 %v6149_v36, %v308_v12  ;;  %v4303_v29 = vunpack.i.h.bf16 %v6245_v10  ;;  %v4308_v49 = vunpack.i.h.bf16 %v6254_v5 }
 0x1bb   :  { %v1758_v55 = vmul.f32 %v5620_v34, %v1719_v30  ;;  %v317_v57 = vor.u32 1.1754944e-38, %v316_v52  ;;  %4561 = vrcp.f32 %v6278_v63  ;;  %v323_v10 = vmul.f32 %v6250_v38, %v322_v47 }
 0x1bc   :  { %v2161_v61 = vsel %vm2156_vm5, %v2128_v56, %v4307_v35  ;;  %v313_v48 = vsel %vm6296_vm7, %v6149_v36, %v309_v15  ;;  %4563 = vpow2.f32 %v4057_v46  ;;  %v336_v36 = vmul.f32 %v6300_v2, %v6252_v50 }
 0x1bd   :  { %v331_v45 = vand.u32 2147483648, %v6120_v13  ;;  %v4313_v9 = vunpack.i.h.bf16 %v4311_v25  ;;  %v4317_v35 = vunpack.i.l.bf16 %v6323_v31  ;;  %vm341_vm14 = vweird.f32 %v6300_v2 }
 0x1be   :  { %v1630_v0 = vpop.f32.mrf.mxu1  ;;  %v4560_v1 = vpop.eup %4559  ;;  %v337_v25 = vsub.f32 1.0, %v336_v36  ;;  %vm6383_vm15 = vmor %vm340_vm13, %vm341_vm14 }
 0x1bf   :  { %v1688_v41 = vadd.f32 %v1630_v0, %v5667_v51  ;;  %2267 = vmatmul.f32.gmra.mxu2 %v2193_v16  ;;  %v303_v51 = vsel %vm300_vm1, %v302_v28, %v298_v19  ;;  %v324_v16 = vadd.f32 %v6250_v38, %v323_v10  ;;  %v329_v28 = vand.u32 2147483647, %v6120_v13 }
 0x1c0   :  { %v700_v33 = vmul.f32 %v5985_v44, %v303_v51  ;;  %v6315_v44 = vld [vmem:[%s8333_s1 + $0x60] sm:$0xff]  ;;  %v6332_v4 = vadd.f32 1.0, %v4560_v1  ;;  %v4318_v1 = vunpack.i.h.bf16 %v6323_v31  ;;  %vm355_vm1 = vweird.f32 %v6278_v63 }
 0x1c1   :  { %v1720_v42 = vsub.f32 %v5713_v59, %v1688_v41  ;;  %v314_v59 = vand.u32 2147483647, %v6087_v11  ;;  %v2194_v11 = vsel %vm2189_vm6, %v2161_v61, %v4312_v37  ;;  %v4058_v62 = vmul.f32 -1.442695, %v6315_v44  ;;  %v6328_v0 = vpop.permute.xlu1 %4320  ;;  %v6344_v56 = vpop.permute.xlu2 %4325 }
 0x1c2   :  { %v2129_v5 = vsel %vm879_vm4, %v700_v33, %v4303_v29  ;;  %v4322_v13 = vunpack.i.l.bf16 %v6328_v0  ;;  %v328_v61 = vsel %vm6334_vm11, %v6250_v38, %v324_v16  ;;  %vm330_vm12 = vcmp.eq.f32.partialorder %v329_v28, 8.507059e+37  ;;  %v6404_v30 = vpop.permute.xlu0 %4330 }
 0x1c3   :  { %v1759_v17 = vmul.f32 %v5620_v34, %v1720_v42  ;;  %vm315_vm8 = vcmp.eq.f32.partialorder %v314_v59, 8.507059e+37  ;;  %v2162_v7 = vsel %vm2156_vm5, %v2129_v5, %v4308_v49  ;;  %4565 = vpow2.f32 %v4058_v62 }
 0x1c4   :  { %v318_v19 = vsel %vm315_vm8, %v317_v57, %v313_v48  ;;  %v2195_v12 = vsel %vm2189_vm6, %v2162_v7, %v4313_v9  ;;  %4567 = vrcp.f32 %v6332_v4  ;;  %v4327_v37 = vunpack.i.l.bf16 %v6344_v56 }
 0x1c5   :  { %v4459_v18 = vpack.i.bf16 %v1759_v17, %v1758_v55  ;;  %v701_v32 = vmul.f32 %v6012_v20, %v318_v19  ;;  %v332_v17 = vor.u32 1.1754944e-38, %v331_v45  ;;  %v4323_v5 = vunpack.i.h.bf16 %v6328_v0 }
 0x1c6   :  { %v1633_v54 = vpop.f32.mrf.mxu1  ;;  %v4328_v7 = vunpack.i.h.bf16 %v6344_v56  ;;  %v359_v16 = vand.u32 2147483647, %v6278_v63  ;;  %v361_v28 = vand.u32 2147483648, %v6278_v63  ;;  %vm370_vm8 = vweird.f32 %v6332_v4 }
 0x1c7   :  { %2270 = vmatmul.f32.gmra.mxu2 %v2194_v11  ;;  %4460 = vrot.lane.b32.xlu2 %v4459_v18, %s4931_s18  ;;  %v1689_v26 = vadd.f32 %v1633_v54, %v5705_v27  ;;  %v6338_v27 = vpop.eup %4561  ;;  %v333_v46 = vsel %vm330_vm12, %v332_v17, %v328_v61  ;;  %v344_v54 = vand.u32 2147483647, %v6252_v50  ;;  %v346_v11 = vand.u32 2147483648, %v6252_v50 }
 0x1c8   :  { %v4564_v42 = vpop.eup %4563  ;;  %v351_v52 = vmul.f32 %v6338_v27, %v6278_v63  ;;  %v702_v48 = vmul.f32 %v6040_v43, %v333_v46  ;;  %vm356_vm2 = vweird.f32 %v6338_v27  ;;  %vm6435_vm7 = vcmp.eq.f32.partialorder %v359_v16, 8.507059e+37  ;;  %v8503_v63 = vld [vmem:[#allocation16_spill] sm:$0xff] }
 0x1c9   :  { %v1721_v51 = vsub.f32 %v5741_v40, %v1689_v26  ;;  %v2130_v40 = vsel %vm879_vm4, %v701_v32, %v4317_v35  ;;  %v4566_v15 = vpop.eup %4565  ;;  %v6361_v18 = vadd.f32 1.0, %v4564_v42  ;;  %vm345_vm0 = vcmp.eq.f32.partialorder %v344_v54, 8.507059e+37  ;;  %v6415_v32 = vpop.permute.xlu1 %4335  ;;  %vm6418_vm3 = vmor %vm355_vm1, %vm356_vm2  ;;  %v6453_v54 = vld [vmem:[%s8333_s1 + $0x80] sm:$0xff] }
 0x1ca   :  { %v2163_v38 = vsel %vm2156_vm5, %v2130_v40, %v4322_v13  ;;  %v352_v33 = vsub.f32 1.0, %v351_v52  ;;  %v6377_v62 = vpop.eup %4567  ;;  %v6388_v31 = vadd.f32 1.0, %v4566_v15  ;;  %v347_v43 = vor.u32 1.1754944e-38, %v346_v11 }
 0x1cb   :  { %v1760_v59 = vmul.f32 %v5620_v34, %v1721_v51  ;;  %v2196_v57 = vsel %vm2189_vm6, %v2163_v38, %v4327_v37  ;;  %4569 = vrcp.f32 %v6361_v18  ;;  %v2131_v19 = vsel %vm879_vm4, %v702_v48, %v4318_v1  ;;  %v6426_v51 = vld [vmem:[%s8333_s1 + $0x78] sm:$0xff] }
 0x1cc   :  { %v353_v26 = vmul.f32 %v6338_v27, %v352_v33  ;;  %v366_v45 = vmul.f32 %v6377_v62, %v6332_v4  ;;  %v2164_v0 = vsel %vm2156_vm5, %v2131_v19, %v4323_v5  ;;  %v4332_v37 = vunpack.i.l.bf16 %v6404_v30 }
 0x1cd   :  { %v2197_v42 = vsel %vm2189_vm6, %v2164_v0, %v4328_v7  ;;  %v362_v15 = vor.u32 1.1754944e-38, %v361_v28  ;;  %v4062_v11 = vmul.f32 -1.442695, %v6453_v54  ;;  %vm371_vm9 = vweird.f32 %v6377_v62 }
 0x1ce   :  { %v1636_v41 = vpop.f32.mrf.mxu1  ;;  %v367_v13 = vsub.f32 1.0, %v366_v45  ;;  %v376_v5 = vand.u32 2147483648, %v6332_v4  ;;  %v374_v19 = vand.u32 2147483647, %v6332_v4  ;;  %vm6472_vm10 = vmor %vm370_vm8, %vm371_vm9  ;;  %v4338_v28 = vunpack.i.h.bf16 %v6415_v32 }
 0x1cf   :  { %v1690_v55 = vadd.f32 %v1636_v41, %v5735_v39  ;;  %2273 = vmatmul.f32.gmra.mxu2 %v2195_v12  ;;  %v338_v39 = vmul.f32 %v6300_v2, %v337_v25  ;;  %vm385_vm12 = vweird.f32 %v6361_v18 }
 0x1d0   :  { %vm375_vm11 = vcmp.eq.f32.partialorder %v374_v19, 8.507059e+37 }
 0x1d1   :  { %v1722_v20 = vsub.f32 %v5777_v14, %v1690_v55  ;;  %v6366_v14 = vld [vmem:[%s8333_s1 + $0x68] sm:$0xff]  ;;  %v339_v10 = vadd.f32 %v6300_v2, %v338_v39  ;;  %v6407_v41 = vpop.eup %4569  ;;  %v4061_v55 = vmul.f32 -1.442695, %v6426_v51  ;;  %v6429_v17 = vpop.permute.xlu2 %4340 }
 0x1d2   :  { %v4059_v8 = vmul.f32 -1.442695, %v6366_v14  ;;  %v381_v46 = vmul.f32 %v6407_v41, %v6361_v18  ;;  %vm386_vm13 = vweird.f32 %v6407_v41 }
 0x1d3   :  { %v1761_v47 = vmul.f32 %v5620_v34, %v1722_v20  ;;  %v343_v50 = vsel %vm6383_vm15, %v6300_v2, %v339_v10  ;;  %v354_v2 = vadd.f32 %v6338_v27, %v353_v26  ;;  %v8497_v20 = vld [vmem:[#allocation39_spill] sm:$0xff]  ;;  %vm6517_vm14 = vmor %vm385_vm12, %vm386_vm13 }
 0x1d4   :  { %4571 = vpow2.f32 %v4059_v8  ;;  %v348_v35 = vsel %vm345_vm0, %v347_v43, %v343_v50  ;;  %v382_v36 = vsub.f32 1.0, %v381_v46  ;;  %v8506_v46 = vld [vmem:[#allocation19_spill] sm:$0xff]  ;;  %vm400_vm0 = vweird.f32 %v6388_v31 }
 0x1d5   :  { %v4464_v29 = vpack.i.bf16 %v1761_v47, %v1760_v59  ;;  %4573 = vrcp.f32 %v6388_v31  ;;  %v703_v40 = vmul.f32 %v6125_v24, %v348_v35  ;;  %v4337_v59 = vunpack.i.l.bf16 %v6415_v32  ;;  %v8500_v47 = vld [vmem:[#allocation15_spill] sm:$0xff] }
 0x1d6   :  { %v1639_v49 = vpop.f32.mrf.mxu1  ;;  %v4342_v24 = vunpack.i.l.bf16 %v6429_v17  ;;  %v377_v35 = vor.u32 1.1754944e-38, %v376_v5 }
 0x1d7   :  { %2276 = vmatmul.f32.gmra.mxu2 %v2196_v57  ;;  %4465 = vrot.lane.b32.xlu2 %v4464_v29, %s4931_s18  ;;  %v1691_v9 = vadd.f32 %v1639_v49, %v5772_v21  ;;  %v6412_v21 = vld [vmem:[%s8333_s1 + $0x70] sm:$0xff]  ;;  %v368_v29 = vmul.f32 %v6377_v62, %v367_v13  ;;  %v2132_v1 = vsel %vm879_vm4, %v703_v40, %v4332_v37 }
 0x1d8   :  { %v4060_v12 = vmul.f32 -1.442695, %v6412_v21  ;;  %v2165_v48 = vsel %vm2156_vm5, %v2132_v1, %v4337_v59  ;;  %v6510_v59 = vpop.permute.xlu1 %4350 }
 0x1d9   :  { %v1723_v61 = vsub.f32 %v5801_v6, %v1691_v9  ;;  %v358_v6 = vsel %vm6418_vm3, %v6338_v27, %v354_v2  ;;  %v2198_v26 = vsel %vm2189_vm6, %v2165_v48, %v4342_v24  ;;  %v369_v7 = vadd.f32 %v6377_v62, %v368_v29  ;;  %v8507_v29 = vld [vmem:[#allocation18_spill] sm:$0xff] }
 0x1da   :  { %v4572_v56 = vpop.eup %4571  ;;  %4575 = vpow2.f32 %v4060_v12  ;;  %v363_v49 = vsel %vm6435_vm7, %v362_v15, %v358_v6  ;;  %v4333_v9 = vunpack.i.h.bf16 %v6404_v30  ;;  %v383_v2 = vmul.f32 %v6407_v41, %v382_v36  ;;  %v6485_v12 = vld [vmem:[%s8333_s1 + $0x88] sm:$0xff] }
 0x1db   :  { %v6446_v8 = vadd.f32 1.0, %v4572_v56  ;;  %4577 = vpow2.f32 %v4061_v55  ;;  %v1762_v27 = vmul.f32 %v5620_v34, %v1723_v61  ;;  %v6463_v57 = vpop.eup %4573  ;;  %v704_v0 = vmul.f32 %v6198_v60, %v363_v49 }
 0x1dc   :  { %v396_v4 = vmul.f32 %v6463_v57, %v6388_v31  ;;  %v4343_v30 = vunpack.i.h.bf16 %v6429_v17  ;;  %v373_v60 = vsel %vm6472_vm10, %v6377_v62, %v369_v7  ;;  %v389_v17 = vand.u32 2147483647, %v6361_v18  ;;  %v6504_v62 = vpop.permute.xlu0 %4345 }
 0x1dd   :  { %4579 = vrcp.f32 %v6446_v8  ;;  %v2133_v55 = vsel %vm879_vm4, %v704_v0, %v4333_v9  ;;  %v391_v61 = vand.u32 2147483648, %v6361_v18  ;;  %v384_v37 = vadd.f32 %v6407_v41, %v383_v2  ;;  %v8512_v2 = vld [vmem:[#allocation26_spill] sm:$0xff] }
 0x1de   :  { %v1642_v25 = vpop.f32.mrf.mxu1  ;;  %4581 = vpow2.f32 %v4062_v11  ;;  %v397_v40 = vsub.f32 1.0, %v396_v4  ;;  %vm6528_vm15 = vcmp.eq.f32.partialorder %v389_v17, 8.507059e+37  ;;  %v4352_v48 = vunpack.i.l.bf16 %v6510_v59  ;;  %v8519_v18 = vld [vmem:[#allocation38_spill] sm:$0xff] }
 0x1df   :  { %v1692_v52 = vadd.f32 %v1642_v25, %v8497_v20  ;;  %2279 = vmatmul.f32.gmra.mxu2 %v2197_v42  ;;  %v4063_v25 = vmul.f32 -1.442695, %v6485_v12  ;;  %v2166_v20 = vsel %vm2156_vm5, %v2133_v55, %v4338_v28  ;;  %v392_v49 = vor.u32 1.1754944e-38, %v391_v61  ;;  %v8514_v55 = vld [vmem:[#allocation29_spill] sm:$0xff] }
 0x1e0   :  { %v4576_v45 = vpop.eup %4575  ;;  %v388_v36 = vsel %vm6517_vm14, %v6407_v41, %v384_v37  ;;  %vm401_vm1 = vweird.f32 %v6463_v57  ;;  %v404_v0 = vand.u32 2147483647, %v6388_v31  ;;  %v4348_v6 = vunpack.i.h.bf16 %v6504_v62 }
 0x1e1   :  { %v1724_v38 = vsub.f32 %v8500_v47, %v1692_v52  ;;  %v4578_v16 = vpop.eup %4577  ;;  %v6492_v32 = vadd.f32 1.0, %v4576_v45  ;;  %v6494_v42 = vpop.permute.xlu2 %4430  ;;  %v378_v52 = vsel %vm375_vm11, %v377_v35, %v373_v60  ;;  %4583 = vpow2.f32 %v4063_v25  ;;  %v8511_v35 = vld [vmem:[#allocation21_spill] sm:$0xff]  ;;  %vm6567_vm2 = vmor %vm400_vm0, %vm401_vm1 }
 0x1e2   :  { %v6508_v15 = vadd.f32 1.0, %v4578_v16  ;;  %v705_v1 = vmul.f32 %v6259_v23, %v378_v52  ;;  %v4432_v23 = vunpack.i.l.bf16 %v6494_v42  ;;  %v393_v9 = vsel %vm6528_vm15, %v392_v49, %v388_v36  ;;  %v6616_v36 = vld [vmem:[%s8333_s1 + $0x98] sm:$0xff] }
 0x1e3   :  { %v1763_v33 = vmul.f32 %v5620_v34, %v1724_v38  ;;  %v6499_v56 = vpop.eup %4579  ;;  %v2199_v38 = vsel %vm2189_vm6, %v2166_v20, %v4343_v30  ;;  %4585 = vrcp.f32 %v6492_v32  ;;  %v406_v16 = vand.u32 2147483648, %v6388_v31 }
 0x1e4   :  { %v4582_v39 = vpop.eup %4581  ;;  %4587 = vrcp.f32 %v6508_v15  ;;  %v1185_v4 = vadd.f32 %v8512_v2, %v8511_v35  ;;  %vm6585_vm3 = vcmp.eq.f32.partialorder %v404_v0, 8.507059e+37  ;;  %vm415_vm7 = vweird.f32 %v6446_v8 }
 0x1e5   :  { %v4469_v10 = vpack.i.bf16 %v1763_v33, %v1762_v27  ;;  %v411_v27 = vmul.f32 %v6499_v56, %v6446_v8  ;;  %v4347_v33 = vunpack.i.l.bf16 %v6504_v62  ;;  %vm416_vm8 = vweird.f32 %v6499_v56 }
 0x1e6   :  { %v1645_v43 = vpop.f32.mrf.mxu1  ;;  %v421_v62 = vand.u32 2147483648, %v6446_v8  ;;  %vm6609_vm9 = vmor %vm415_vm7, %vm416_vm8  ;;  %vm430_vm11 = vweird.f32 %v6492_v32  ;;  %vm445_vm15 = vweird.f32 %v6508_v15 }
 0x1e7   :  { %2282 = vmatmul.f32.gmra.mxu2 %v2198_v26  ;;  %4470 = vrot.lane.b32.xlu0 %v4469_v10, %s4931_s18  ;;  %v1693_v13 = vadd.f32 %v1645_v43, %v8503_v63  ;;  %v8510_v10 = vld [vmem:[#allocation8_spill] sm:$0xff]  ;;  %v398_v43 = vmul.f32 %v6463_v57, %v397_v40  ;;  %v6539_v26 = vadd.f32 1.0, %v4582_v39  ;;  %v412_v50 = vsub.f32 1.0, %v411_v27  ;;  %v4584_v45 = vpop.eup %4583  ;;  %v6576_v40 = vld [vmem:[%s8333_s1 + $0x90] sm:$0xff] }
 0x1e8   :  { %v2134_v41 = vsel %vm879_vm4, %v705_v1, %v4347_v33  ;;  %v6571_v37 = vadd.f32 1.0, %v4584_v45  ;;  %v4064_v39 = vmul.f32 -1.442695, %v6576_v40  ;;  %v4433_v33 = vunpack.i.h.bf16 %v6494_v42  ;;  %v6626_v45 = vpop.permute.xlu1 %4360 }
 0x1e9   :  { %v1725_v24 = vsub.f32 %v8506_v46, %v1693_v13  ;;  %v6551_v28 = vpop.eup %4585  ;;  %v6555_v25 = vpop.permute.xlu2 %4435  ;;  %v2167_v30 = vsel %vm2156_vm5, %v2134_v41, %v4352_v48  ;;  %v399_v63 = vadd.f32 %v6463_v57, %v398_v43  ;;  %4589 = vrcp.f32 %v6539_v26  ;;  %v8513_v13 = vld [vmem:[#allocation24_spill] sm:$0xff] }
 0x1ea   :  { %v1186_v17 = vadd.f32 %v8514_v55, %v8513_v13  ;;  %v2200_v20 = vsel %vm2189_vm6, %v2167_v30, %v4432_v23  ;;  %v413_v31 = vmul.f32 %v6499_v56, %v412_v50  ;;  %v426_v1 = vmul.f32 %v6551_v28, %v6492_v32 }
 0x1eb   :  { %v1764_v7 = vmul.f32 %v5620_v34, %v1725_v24  ;;  %v407_v24 = vor.u32 1.1754944e-38, %v406_v16  ;;  %4591 = vpow2.f32 %v4064_v39  ;;  %v4065_v43 = vmul.f32 -1.442695, %v6616_v36 }
 0x1ec   :  { %v1218_v27 = vmul.f32 2.0, %v1186_v17  ;;  %v414_v48 = vadd.f32 %v6499_v56, %v413_v31  ;;  %4593 = vrcp.f32 %v6571_v37  ;;  %v422_v0 = vor.u32 1.1754944e-38, %v421_v62  ;;  %v6644_v31 = vld [vmem:[%s8336_s4] ss:$0 sm:$0xff] }
 0x1ed   :  { %v427_v16 = vsub.f32 1.0, %v426_v1  ;;  %v4362_v46 = vunpack.i.l.bf16 %v6626_v45  ;;  %vm431_vm12 = vweird.f32 %v6551_v28  ;;  %4595 = vpow2.f32 %v4065_v43 }
 0x1ee   :  { %v1648_v47 = vpop.f32.mrf.mxu1  ;;  %v1250_v50 = vmul.f32 %v1218_v27, %v6017_v58  ;;  %v418_v17 = vsel %vm6609_vm9, %v6499_v56, %v414_v48  ;;  %v1357_v56 = vmul.f32 2.0, %v8514_v55  ;;  %vm6678_vm13 = vmor %vm430_vm11, %vm431_vm12 }
 0x1ef   :  { %v1694_v11 = vadd.f32 %v1648_v47, %v8507_v29  ;;  %2285 = vmatmul.f32.gmra.mxu2 %v2199_v38  ;;  %v706_v47 = vmul.f32 %v6293_v22, %v393_v9  ;;  %v6582_v38 = vpop.eup %4587  ;;  %v1217_v29 = vmul.f32 2.0, %v1185_v4  ;;  %v403_v22 = vsel %vm6567_vm2, %v6463_v57, %v399_v63  ;;  %v8522_v4 = vld [vmem:[#allocation20_spill] sm:$0xff] }
 0x1f0   :  { %v1356_v57 = vmul.f32 2.0, %v8512_v2  ;;  %v441_v39 = vmul.f32 %v6582_v38, %v6508_v15  ;;  %v428_v27 = vmul.f32 %v6551_v28, %v427_v16  ;;  %v1389_v48 = vadd.f32 %v1357_v56, %v8513_v13 }
 0x1f1   :  { %v1726_v5 = vsub.f32 %v8510_v10, %v1694_v11  ;;  %v4353_v11 = vunpack.i.h.bf16 %v6510_v59  ;;  %v419_v59 = vand.u32 2147483647, %v6446_v8  ;;  %v6602_v10 = vpop.eup %4589  ;;  %v2135_v42 = vsel %vm879_vm4, %v706_v47, %v4348_v6  ;;  %v6629_v2 = vpop.permute.xlu2 %4445 }
 0x1f2   :  { %v1249_v23 = vmul.f32 %v1217_v29, %v5976_v53  ;;  %v408_v8 = vsel %vm6585_vm3, %v407_v24, %v403_v22  ;;  %v4592_v47 = vpop.eup %4591  ;;  %vm446_vm0 = vweird.f32 %v6582_v38  ;;  %vm460_vm3 = vweird.f32 %v6539_v26 }
 0x1f3   :  { %v1765_v19 = vmul.f32 %v5620_v34, %v1726_v5  ;;  %vm420_vm10 = vcmp.eq.f32.partialorder %v419_v59, 8.507059e+37  ;;  %v707_v52 = vmul.f32 %v6315_v44, %v408_v8  ;;  %v6650_v29 = vpop.eup %4593  ;;  %v1286_v44 = vsub.f32 %v1250_v50, %v6644_v31  ;;  %v8525_v59 = vld [vmem:[#allocation17_spill] sm:$0xff]  ;;  %vm6708_vm1 = vmor %vm445_vm15, %vm446_vm0 }
 0x1f4   :  { %v1285_v6 = vsub.f32 %v1249_v23, %v6644_v31  ;;  %v423_v22 = vsel %vm420_vm10, %v422_v0, %v418_v17  ;;  %v429_v50 = vadd.f32 %v6551_v28, %v428_v27  ;;  %vm461_vm7 = vweird.f32 %v6602_v10 }
 0x1f5   :  { %v4474_v60 = vpack.i.bf16 %v1765_v19, %v1764_v7  ;;  %v6620_v7 = vpop.permute.xlu0 %4355  ;;  %v2168_v19 = vsel %vm2156_vm5, %v2135_v42, %v4353_v11  ;;  %v4447_v11 = vunpack.i.l.bf16 %v6629_v2  ;;  %v6668_v8 = vmul.f32 %v8525_v59, %v1286_v44  ;;  %vm6753_vm8 = vmor %vm460_vm3, %vm461_vm7 }
 0x1f6   :  { %v1651_v61 = vpop.f32.mrf.mxu1  ;;  %v2201_v9 = vsel %vm2189_vm6, %v2168_v19, %v4433_v33  ;;  %v708_v13 = vmul.f32 %v6366_v14, %v423_v22  ;;  %v4358_v0 = vunpack.i.h.bf16 %v6620_v7  ;;  %v433_v17 = vsel %vm6678_vm13, %v6551_v28, %v429_v50  ;;  %v6716_v22 = vld [vmem:[%s8333_s1 + $0xa0] sm:$0xff] }
 0x1f7   :  { %2288 = vmatmul.f32.gmra.mxu2 %v2200_v20  ;;  %4475 = vrot.lane.b32.xlu2 %v4474_v60, %s4931_s18  ;;  %v1695_v49 = vadd.f32 %v1651_v61, %v8519_v18  ;;  %v8523_v60 = vld [vmem:[#allocation10_spill] sm:$0xff]  ;;  %v1388_v61 = vadd.f32 %v1356_v57, %v8511_v35  ;;  %v4357_v20 = vunpack.i.l.bf16 %v6620_v7  ;;  %v8524_v35 = vld [vmem:[#allocation23_spill] sm:$0xff]  ;;  %v436_v18 = vand.u32 2147483648, %v6492_v32 }
 0x1f8   :  { %v6663_v57 = vmul.f32 %v8525_v59, %v1285_v6  ;;  %v456_v7 = vmul.f32 %v6602_v10, %v6539_v26  ;;  %v4066_v27 = vmul.f32 -1.442695, %v6716_v22  ;;  %vm475_vm10 = vweird.f32 %v6571_v37 }
 0x1f9   :  { %v1727_v30 = vsub.f32 %v8522_v4, %v1695_v49  ;;  %v1420_v55 = vmul.f32 2.0, %v1388_v61  ;;  %v2136_v1 = vsel %vm879_vm4, %v707_v52, %v4357_v20  ;;  %v442_v49 = vsub.f32 1.0, %v441_v39  ;;  %v4596_v52 = vpop.eup %4595 }
 0x1fa   :  { %v2169_v42 = vsel %vm2156_vm5, %v2136_v1, %v4362_v46  ;;  %v437_v16 = vor.u32 1.1754944e-38, %v436_v18  ;;  %v4484_v43 = vpack.i.bf16 %v6668_v8, %v6663_v57  ;;  %v6695_v61 = vadd.f32 1.0, %v4592_v47  ;;  %v4371_v46 = vpop.permute.xlu1 %4370 }
 0x1fb   :  { %v1766_v33 = vmul.f32 %v5620_v34, %v1727_v30  ;;  %v2202_v19 = vsel %vm2189_vm6, %v2169_v42, %v4447_v11  ;;  %v443_v4 = vmul.f32 %v6582_v38, %v442_v49  ;;  %v1421_v30 = vmul.f32 2.0, %v1389_v48 }
 0x1fc   :  { %v1452_v14 = vmul.f32 %v1420_v55, %v6663_v57  ;;  %v451_v20 = vand.u32 2147483648, %v6508_v15  ;;  %v457_v11 = vsub.f32 1.0, %v456_v7  ;;  %4597 = vrcp.f32 %v6695_v61 }
 0x1fd   :  { %v4366_v28 = vpop.permute.xlu0 %4365  ;;  %v1453_v6 = vmul.f32 %v1421_v30, %v6668_v8  ;;  %v4372_v18 = vunpack.i.l.bf16 %v4371_v46  ;;  %4599 = vpow2.f32 %v4066_v27  ;;  %vm476_vm11 = vweird.f32 %v6650_v29 }
 0x1fe   :  { %v1654_v41 = vpop.f32.mrf.mxu1  ;;  %v4367_v55 = vunpack.i.l.bf16 %v4366_v28  ;;  %v452_v1 = vor.u32 1.1754944e-38, %v451_v20  ;;  %vm6777_vm12 = vmor %vm475_vm10, %vm476_vm11 }
 0x1ff   :  { %v1696_v63 = vadd.f32 %v1654_v41, %v8523_v60  ;;  %2291 = vmatmul.f32.gmra.mxu2 %v2201_v9  ;;  %v434_v41 = vand.u32 2147483647, %v6492_v32  ;;  %v4363_v60 = vunpack.i.h.bf16 %v6626_v45  ;;  %v4448_v32 = vunpack.i.h.bf16 %v6629_v2 }
 0x200   :  { %v2137_v45 = vsel %vm879_vm4, %v708_v13, %v4358_v0  ;;  %v449_v2 = vand.u32 2147483647, %v6508_v15  ;;  %v464_v9 = vand.u32 2147483647, %v6539_v26  ;;  %v466_v0 = vand.u32 2147483648, %v6539_v26 }
 0x201   :  { %v1728_v24 = vsub.f32 %v8524_v35, %v1696_v63  ;;  %vm435_vm14 = vcmp.eq.f32.partialorder %v434_v41, 8.507059e+37  ;;  %v2170_v47 = vsel %vm2156_vm5, %v2137_v45, %v4363_v60  ;;  %v4368_v26 = vunpack.i.h.bf16 %v4366_v28 }
 0x202   :  { %v438_v56 = vsel %vm435_vm14, %v437_v16, %v433_v17  ;;  %vm450_vm2 = vcmp.eq.f32.partialorder %v449_v2, 8.507059e+37  ;;  %v4373_v45 = vunpack.i.h.bf16 %v4371_v46  ;;  %vm465_vm9 = vcmp.eq.f32.partialorder %v464_v9, 8.507059e+37 }
 0x203   :  { %v1767_v62 = vmul.f32 %v5620_v34, %v1728_v24  ;;  %v2203_v24 = vsel %vm2189_vm6, %v2170_v47, %v4448_v32  ;;  %v709_v15 = vmul.f32 %v6412_v21, %v438_v56  ;;  %v481_v46 = vand.u32 2147483648, %v6571_v37 }
 0x204   :  { %vm490_vm14 = vweird.f32 %v6695_v61 }
 0x205   :  { %v4479_v5 = vpack.i.bf16 %v1767_v62, %v1766_v33  ;;  %v4451_v33 = vpop.permute.xlu2 %4450  ;;  %v2138_v50 = vsel %vm879_vm4, %v709_v15, %v4367_v55 }
 0x206   :  { %v1657_v23 = vpop.f32.mrf.mxu1  ;;  %v2171_v13 = vsel %vm2156_vm5, %v2138_v50, %v4372_v18  ;;  %v4453_v2 = vunpack.i.h.bf16 %v4451_v33 }
 0x207   :  { %2294 = vmatmul.f32.gmra.mxu2 %v2202_v19  ;;  %4480 = vrot.lane.b32.xlu0 %v4479_v5, %s4931_s18  ;;  %v1697_v63 = vadd.f32 %v1657_v23, %v5976_v53  ;;  %v444_v53 = vadd.f32 %v6582_v38, %v443_v4  ;;  %v4452_v5 = vunpack.i.l.bf16 %v4451_v33  ;;  %v458_v23 = vmul.f32 %v6602_v10, %v457_v11 }
 0x208   :  { %v6730_v19 = vadd.f32 1.0, %v4596_v52 }
 0x209   :  { %v1729_v39 = vsub.f32 %v1452_v14, %v1697_v63  ;;  %v448_v42 = vsel %vm6708_vm1, %v6582_v38, %v444_v53  ;;  %v6738_v38 = vpop.eup %4597  ;;  %v2204_v4 = vsel %vm2189_vm6, %v2171_v13, %v4452_v5  ;;  %v459_v30 = vadd.f32 %v6602_v10, %v458_v23  ;;  %v6750_v14 = vld [vmem:[%s8333_s1 + $0xa8] sm:$0xff] }
 0x20a   :  { %v453_v41 = vsel %vm450_vm2, %v452_v1, %v448_v42  ;;  %v4067_v63 = vmul.f32 -1.442695, %v6750_v14  ;;  %v4600_v7 = vpop.eup %4599  ;;  %4601 = vrcp.f32 %v6730_v19  ;;  %v467_v53 = vor.u32 1.1754944e-38, %v466_v0  ;;  %v6786_v1 = vld [vmem:[%s8333_s1 + $0xb0] sm:$0xff] }
 0x20b   :  { %v6722_v49 = vmul.f32 %v5620_v34, %v1729_v39  ;;  %v710_v17 = vmul.f32 %v6426_v51, %v453_v41  ;;  %v463_v20 = vsel %vm6753_vm8, %v6602_v10, %v459_v30  ;;  %v486_v39 = vmul.f32 %v6738_v38, %v6695_v61 }
 0x20c   :  { %4603 = vpow2.f32 %v4067_v63  ;;  %v6765_v28 = vadd.f32 1.0, %v4600_v7  ;;  %v468_v56 = vsel %vm465_vm9, %v467_v53, %v463_v20  ;;  %v479_v10 = vand.u32 2147483647, %v6571_v37 }
 0x20d   :  { %v2139_v51 = vsel %vm879_vm4, %v710_v17, %v4368_v26  ;;  %v487_v11 = vsub.f32 1.0, %v486_v39  ;;  %v711_v15 = vmul.f32 %v6453_v54, %v468_v56  ;;  %v4068_v18 = vmul.f32 -1.442695, %v6786_v1  ;;  %v6812_v26 = vld [vmem:[%s8339_s7] ss:$0 sm:$0xff] }
 0x20e   :  { %v1660_v35 = vpop.f32.mrf.mxu1  ;;  %v2172_v47 = vsel %vm2156_vm5, %v2139_v51, %v4373_v45  ;;  %4605 = vrcp.f32 %v6765_v28  ;;  %vm480_vm13 = vcmp.eq.f32.partialorder %v479_v10, 8.507059e+37  ;;  %v482_v42 = vor.u32 1.1754944e-38, %v481_v46 }
 0x20f   :  { %v1698_v62 = vadd.f32 %v1660_v35, %v6017_v58  ;;  %2297 = vmatmul.f32.gmra.mxu2 %v2203_v24  ;;  %v471_v58 = vmul.f32 %v6650_v29, %v6571_v37  ;;  %v4381_v35 = vpop.permute.xlu1 %4380  ;;  %v2205_v24 = vsel %vm2189_vm6, %v2172_v47, %v4453_v2  ;;  %vm491_vm15 = vweird.f32 %v6738_v38 }
 0x210   :  { %v6775_v27 = vpop.eup %4601  ;;  %4607 = vpow2.f32 %v4068_v18  ;;  %vm6814_vm0 = vmor %vm490_vm14, %vm491_vm15  ;;  %v4383_v45 = vunpack.i.h.bf16 %v4381_v35  ;;  %vm505_vm2 = vweird.f32 %v6730_v19  ;;  %vm520_vm9 = vweird.f32 %v6765_v28 }
 0x211   :  { %v1730_v48 = vsub.f32 %v1453_v6, %v1698_v62  ;;  %v472_v60 = vsub.f32 1.0, %v471_v58  ;;  %v4376_v6 = vpop.permute.xlu0 %4375  ;;  %v4456_v33 = vpop.permute.xlu2 %4455  ;;  %v488_v58 = vmul.f32 %v6738_v38, %v487_v11  ;;  %v501_v54 = vmul.f32 %v6775_v27, %v6730_v19 }
 0x212   :  { %v4377_v55 = vunpack.i.l.bf16 %v4376_v6  ;;  %v4604_v37 = vpop.eup %4603  ;;  %v4457_v5 = vunpack.i.l.bf16 %v4456_v33  ;;  %v4378_v7 = vunpack.i.h.bf16 %v4376_v6  ;;  %v4458_v20 = vunpack.i.h.bf16 %v4456_v33 }
 0x213   :  { %v6733_v21 = vmul.f32 %v5620_v34, %v1730_v48  ;;  %v473_v52 = vmul.f32 %v6650_v29, %v472_v60  ;;  %v4382_v48 = vunpack.i.l.bf16 %v4381_v35  ;;  %v6795_v50 = vadd.f32 1.0, %v4604_v37 }
 0x214   :  { %v2140_v41 = vsel %vm879_vm4, %v711_v15, %v4377_v55  ;;  %v6805_v30 = vpop.eup %4605  ;;  %v489_v63 = vadd.f32 %v6738_v38, %v488_v58  ;;  %v502_v32 = vsub.f32 1.0, %v501_v54  ;;  %vm506_vm3 = vweird.f32 %v6775_v27 }
 0x215   :  { %v4489_v16 = vpack.i.bf16 %v6733_v21, %v6722_v49  ;;  %v474_v44 = vadd.f32 %v6650_v29, %v473_v52  ;;  %v2173_v9 = vsel %vm2156_vm5, %v2140_v41, %v4382_v48  ;;  %4609 = vrcp.f32 %v6795_v50  ;;  %vm6863_vm7 = vmor %vm505_vm2, %vm506_vm3 }
 0x216   :  { %v2206_v60 = vsel %vm2189_vm6, %v2173_v9, %v4457_v5  ;;  %v493_v39 = vsel %vm6814_vm0, %v6738_v38, %v489_v63  ;;  %v503_v51 = vmul.f32 %v6775_v27, %v502_v32  ;;  %v516_v6 = vmul.f32 %v6805_v30, %v6765_v28  ;;  %v4608_v10 = vpop.eup %4607  ;;  %v6887_v63 = vld [vmem:[%s8333_s1 + $0xc0] sm:$0xff] }
 0x217   :  { %2300 = vmatmul.f32.gmra.mxu2 %v2204_v4  ;;  %v478_v23 = vsel %vm6777_vm12, %v6650_v29, %v474_v44  ;;  %v494_v29 = vand.u32 2147483647, %v6695_v61  ;;  %v496_v4 = vand.u32 2147483648, %v6695_v61  ;;  %v509_v38 = vand.u32 2147483647, %v6730_v19  ;;  %v6851_v62 = vpop.permute.xlu1 %4390 }
 0x218   :  { %v483_v0 = vsel %vm480_vm13, %v482_v42, %v478_v23  ;;  %v511_v33 = vand.u32 2147483648, %v6730_v19  ;;  %v504_v15 = vadd.f32 %v6775_v27, %v503_v51  ;;  %v517_v37 = vsub.f32 1.0, %v516_v6 }
 0x219   :  { %v6800_v13 = vpop.permute.xlu0 %4385  ;;  %v712_v61 = vmul.f32 %v6485_v12, %v483_v0  ;;  %vm6820_vm1 = vcmp.eq.f32.partialorder %v494_v29, 8.507059e+37  ;;  %v497_v2 = vor.u32 1.1754944e-38, %v496_v4  ;;  %v6833_v12 = vld [vmem:[%s8333_s1 + $0xb8] sm:$0xff]  ;;  %v6857_v48 = vadd.f32 1.0, %v4608_v10 }
 0x21a   :  { %v4069_v47 = vmul.f32 -1.442695, %v6833_v12  ;;  %v4387_v23 = vunpack.i.l.bf16 %v6800_v13  ;;  %v4392_v54 = vunpack.i.l.bf16 %v6851_v62  ;;  %vm6870_vm8 = vcmp.eq.f32.partialorder %v509_v38, 8.507059e+37 }
 0x21b   :  { %v2141_v46 = vsel %vm879_vm4, %v712_v61, %v4378_v7  ;;  %v498_v11 = vsel %vm6820_vm1, %v497_v2, %v493_v39  ;;  %v6855_v18 = vpop.eup %4609  ;;  %v512_v9 = vor.u32 1.1754944e-38, %v511_v33  ;;  %v508_v19 = vsel %vm6863_vm7, %v6775_v27, %v504_v15 }
 0x21c   :  { %v2174_v44 = vsel %vm2156_vm5, %v2141_v46, %v4383_v45  ;;  %4611 = vpow2.f32 %v4069_v47  ;;  %v713_v58 = vmul.f32 %v6576_v40, %v498_v11  ;;  %v518_v4 = vmul.f32 %v6805_v30, %v517_v37 }
 0x21d   :  { %v2207_v55 = vsel %vm2189_vm6, %v2174_v44, %v4458_v20  ;;  %4613 = vrcp.f32 %v6857_v48  ;;  %v4070_v32 = vmul.f32 -1.442695, %v6887_v63  ;;  %vm521_vm10 = vweird.f32 %v6805_v30 }
 0x21e   :  { %v2142_v17 = vsel %vm879_vm4, %v713_v58, %v4387_v23  ;;  %v513_v53 = vsel %vm6870_vm8, %v512_v9, %v508_v19  ;;  %v526_v2 = vand.u32 2147483648, %v6765_v28  ;;  %v524_v39 = vand.u32 2147483647, %v6765_v28  ;;  %vm6904_vm11 = vmor %vm520_vm9, %vm521_vm10 }
 0x21f   :  { %2303 = vmatmul.f32.gmra.mxu2 %v2205_v24  ;;  %v2175_v45 = vsel %vm2156_vm5, %v2142_v17, %v4392_v54  ;;  %4615 = vpow2.f32 %v4070_v32  ;;  %v4388_v10 = vunpack.i.h.bf16 %v6800_v13  ;;  %v714_v46 = vmul.f32 %v6616_v36, %v513_v53  ;;  %v6922_v13 = vld [vmem:[%s8333_s1 + $0xc8] sm:$0xff]  ;;  %v4401_v54 = vpop.permute.xlu1 %4400 }
 0x220   :  { %v527_v44 = vor.u32 1.1754944e-38, %v526_v2  ;;  %vm525_vm12 = vcmp.eq.f32.partialorder %v524_v39, 8.507059e+37  ;;  %v4071_v36 = vmul.f32 -1.442695, %v6922_v13  ;;  %vm535_vm13 = vweird.f32 %v6795_v50 }
 0x221   :  { %v6843_v35 = vpop.permute.xlu0 %4395  ;;  %v4461_v42 = vpop.permute.xlu2 %4460  ;;  %vm536_vm14 = vweird.f32 %v6855_v18  ;;  %v541_v23 = vand.u32 2147483648, %v6795_v50  ;;  %vm550_vm1 = vweird.f32 %v6857_v48  ;;  %v4438_v49 = vunpack.i.h.bf16 %v6555_v25 }
 0x222   :  { %v4462_v0 = vunpack.i.l.bf16 %v4461_v42  ;;  %v4612_v27 = vpop.eup %4611  ;;  %v4463_v11 = vunpack.i.h.bf16 %v4461_v42  ;;  %vm6945_vm15 = vmor %vm535_vm13, %vm536_vm14 }
 0x223   :  { %v6908_v47 = vadd.f32 1.0, %v4612_v27  ;;  %v6912_v38 = vpop.eup %4613  ;;  %v4402_v27 = vunpack.i.l.bf16 %v4401_v54 }
 0x224   :  { %v2208_v20 = vsel %vm2189_vm6, %v2175_v45, %v4462_v0  ;;  %v539_v0 = vand.u32 2147483647, %v6795_v50  ;;  %vm551_vm2 = vweird.f32 %v6912_v38 }
 0x225   :  { %4617 = vrcp.f32 %v6908_v47  ;;  %v4616_v58 = vpop.eup %4615  ;;  %vm7002_vm3 = vmor %vm550_vm1, %vm551_vm2  ;;  %vm565_vm8 = vweird.f32 %v6908_v47 }
 0x226   :  { %4619 = vpow2.f32 %v4071_v36  ;;  %v6953_v17 = vadd.f32 1.0, %v4616_v58  ;;  %vm540_vm0 = vcmp.eq.f32.partialorder %v539_v0, 8.507059e+37 }
 0x227   :  { %2306 = vmatmul.f32.gmra.mxu2 %v2206_v60  ;;  %v531_v60 = vmul.f32 %v6855_v18, %v6795_v50 }
 0x228   :  { %4621 = vrcp.f32 %v6953_v17 }
 0x229   :  { %v6893_v7 = vpop.permute.xlu0 %4405  ;;  %v532_v51 = vsub.f32 1.0, %v531_v60  ;;  %v4397_v60 = vunpack.i.l.bf16 %v6843_v35 }
 0x22a   :  { %v2259_v52 = vpop.f32.mrf.mxu0 }
 0x22b   :  { %v6837_v56 = vadd.f32 %v6812_v26, %v2259_v52  ;;  %v519_v52 = vadd.f32 %v6805_v30, %v518_v4  ;;  %v546_v4 = vmul.f32 %v6912_v38, %v6857_v48  ;;  %v6955_v45 = vpop.eup %4617 }
 0x22c   :  { %v4620_v6 = vpop.eup %4619  ;;  %vm566_vm9 = vweird.f32 %v6955_v45 }
 0x22d   :  { %v2355_v24 = vsel %vm879_vm4, %v6837_v56, 0.0  ;;  %v523_v33 = vsel %vm6904_vm11, %v6805_v30, %v519_v52  ;;  %v547_v39 = vsub.f32 1.0, %v546_v4  ;;  %vm7033_vm10 = vmor %vm565_vm8, %vm566_vm9 }
 0x22e   :  { %2356 = vadd.xlane.f32.xlu2 %v2355_v24  ;;  %v4393_v24 = vunpack.i.h.bf16 %v6851_v62  ;;  %v2143_v62 = vsel %vm879_vm4, %v714_v46, %v4388_v10  ;;  %v528_v5 = vsel %vm525_vm12, %v527_v44, %v523_v33  ;;  %v561_v44 = vmul.f32 %v6955_v45, %v6908_v47  ;;  %v6987_v58 = vpop.eup %4621 }
 0x22f   :  { %2309 = vmatmul.f32.gmra.mxu2 %v2207_v55  ;;  %v533_v55 = vmul.f32 %v6855_v18, %v532_v51  ;;  %v715_v32 = vmul.f32 %v6716_v22, %v528_v5  ;;  %v6980_v33 = vadd.f32 1.0, %v4620_v6  ;;  %v556_v5 = vand.u32 2147483648, %v6857_v48 }
 0x230   :  { %v2176_v42 = vsel %vm2156_vm5, %v2143_v62, %v4393_v24  ;;  %v4403_v62 = vunpack.i.h.bf16 %v4401_v54  ;;  %vm580_vm12 = vweird.f32 %v6953_v17  ;;  %vm581_vm13 = vweird.f32 %v6987_v58 }
 0x231   :  { %v6932_v30 = vpop.permute.xlu0 %4415  ;;  %v2209_v41 = vsel %vm2189_vm6, %v2176_v42, %v4463_v11  ;;  %v534_v9 = vadd.f32 %v6855_v18, %v533_v55  ;;  %v2144_v51 = vsel %vm879_vm4, %v715_v32, %v4397_v60  ;;  %v4398_v55 = vunpack.i.h.bf16 %v6843_v35  ;;  %vm7062_vm14 = vmor %vm580_vm12, %vm581_vm13 }
 0x232   :  { %v2262_v29 = vpop.f32.mrf.mxu0  ;;  %v2177_v10 = vsel %vm2156_vm5, %v2144_v51, %v4402_v27  ;;  %v557_v27 = vor.u32 1.1754944e-38, %v556_v5  ;;  %v571_v51 = vand.u32 2147483648, %v6908_v47  ;;  %v4407_v5 = vunpack.i.l.bf16 %v6893_v7 }
 0x233   :  { %v6882_v40 = vadd.f32 %v6812_v26, %v2262_v29  ;;  %v4466_v29 = vpop.permute.xlu2 %4465  ;;  %v538_v50 = vsel %vm6945_vm15, %v6855_v18, %v534_v9  ;;  %v554_v9 = vand.u32 2147483647, %v6857_v48 }
 0x234   :  { %v4467_v53 = vunpack.i.l.bf16 %v4466_v29 }
 0x235   :  { %v2358_v61 = vsel %vm879_vm4, %v6882_v40, 0.0  ;;  %vm555_vm7 = vcmp.eq.f32.partialorder %v554_v9, 8.507059e+37 }
 0x236   :  { %2359 = vadd.xlane.f32.xlu1 %v2358_v61  ;;  %v542_v61 = vor.u32 1.1754944e-38, %v541_v23  ;;  %v2210_v24 = vsel %vm2189_vm6, %v2177_v10, %v4467_v53  ;;  %v562_v23 = vsub.f32 1.0, %v561_v44 }
 0x237   :  { %2312 = vmatmul.f32.gmra.mxu2 %v2208_v20  ;;  %v6963_v20 = vld [vmem:[%s8333_s1 + $0xd0] sm:$0xff] }
 0x238   :  { %v4072_v22 = vmul.f32 -1.442695, %v6963_v20  ;;  %v543_v46 = vsel %vm540_vm0, %v542_v61, %v538_v50  ;;  %v563_v48 = vmul.f32 %v6955_v45, %v562_v23  ;;  %v576_v61 = vmul.f32 %v6987_v58, %v6953_v17 }
 0x239   :  { %v6977_v11 = vpop.permute.xlu0 %4420  ;;  %v716_v36 = vmul.f32 %v6750_v14, %v543_v46  ;;  %v569_v46 = vand.u32 2147483647, %v6908_v47  ;;  %vm595_vm0 = vweird.f32 %v6980_v33 }
 0x23a   :  { %v2265_v28 = vpop.f32.mrf.mxu2  ;;  %4623 = vpow2.f32 %v4072_v22  ;;  %v8548_v22 = vld [vmem:[#allocation25_spill] sm:$0xff] }
 0x23b   :  { %v6926_v15 = vadd.f32 %v6812_v26, %v2265_v28  ;;  %v548_v28 = vmul.f32 %v6912_v38, %v547_v39  ;;  %4625 = vrcp.f32 %v6980_v33  ;;  %v2145_v0 = vsel %vm879_vm4, %v716_v36, %v4398_v55  ;;  %v4411_v55 = vpop.permute.xlu1 %4410 }
 0x23c   :  { %v2178_v60 = vsel %vm2156_vm5, %v2145_v0, %v4403_v62  ;;  %v4494_v39 = vpack.i.bf16 %v6089_v3, %v8548_v22  ;;  %vm570_vm11 = vcmp.eq.f32.partialorder %v569_v46, 8.507059e+37  ;;  %v4408_v46 = vunpack.i.h.bf16 %v6893_v7 }
 0x23d   :  { %v2361_v37 = vsel %vm879_vm4, %v6926_v15, 0.0  ;;  %v549_v54 = vadd.f32 %v6912_v38, %v548_v28 }
 0x23e   :  { %2362 = vadd.xlane.f32.xlu0 %v2361_v37  ;;  %v4468_v37 = vunpack.i.h.bf16 %v4466_v29  ;;  %v586_v29 = vand.u32 2147483648, %v6953_v17 }
 0x23f   :  { %2315 = vmatmul.f32.gmra.mxu2 %v2209_v41  ;;  %v6992_v41 = vld [vmem:[%s8333_s1 + $0xd8] sm:$0xff] }
 0x240   :  { %v4073_v35 = vmul.f32 -1.442695, %v6992_v41  ;;  %v4624_v19 = vpop.eup %4623  ;;  %v2211_v32 = vsel %vm2189_vm6, %v2178_v60, %v4468_v37 }
 0x241   :  { %v7013_v53 = vpop.permute.xlu0 %4440  ;;  %v7018_v50 = vadd.f32 1.0, %v4624_v19  ;;  %v7025_v6 = vpop.eup %4625 }
 0x242   :  { %v2268_v2 = vpop.f32.mrf.mxu2  ;;  %4627 = vpow2.f32 %v4073_v35  ;;  %v591_v47 = vmul.f32 %v7025_v6, %v6980_v33  ;;  %vm596_vm1 = vweird.f32 %v7025_v6 }
 0x243   :  { %v6967_v52 = vadd.f32 %v6812_v26, %v2268_v2  ;;  %v553_v2 = vsel %vm7002_vm3, %v6912_v38, %v549_v54  ;;  %v564_v38 = vadd.f32 %v6955_v45, %v563_v48  ;;  %4629 = vrcp.f32 %v7018_v50  ;;  %vm7087_vm2 = vmor %vm595_vm0, %vm596_vm1 }
 0x244   :  { %v558_v10 = vsel %vm555_vm7, %v557_v27, %v553_v2  ;;  %v4412_v54 = vunpack.i.l.bf16 %v4411_v55  ;;  %v592_v19 = vsub.f32 1.0, %v591_v47  ;;  %v584_v48 = vand.u32 2147483647, %v6953_v17 }
 0x245   :  { %v2364_v18 = vsel %vm879_vm4, %v6967_v52, 0.0  ;;  %v717_v37 = vmul.f32 %v6786_v1, %v558_v10  ;;  %v568_v23 = vsel %vm7033_vm10, %v6955_v45, %v564_v38  ;;  %v587_v17 = vor.u32 1.1754944e-38, %v586_v29 }
 0x246   :  { %2365 = vadd.xlane.f32.xlu1 %v2364_v18  ;;  %v593_v38 = vmul.f32 %v7025_v6, %v592_v19  ;;  %vm585_vm15 = vcmp.eq.f32.partialorder %v584_v48, 8.507059e+37  ;;  %vm610_vm7 = vweird.f32 %v7018_v50  ;;  %v616_v8 = vand.u32 2147483648, %v7018_v50 }
 0x247   :  { %2318 = vmatmul.f32.gmra.mxu2 %v2210_v24  ;;  %v577_v24 = vsub.f32 1.0, %v576_v61  ;;  %v2146_v45 = vsel %vm879_vm4, %v717_v37, %v4407_v5  ;;  %v601_v37 = vand.u32 2147483648, %v6980_v33 }
 0x248   :  { %v4628_v36 = vpop.eup %4627  ;;  %v2179_v2 = vsel %vm2156_vm5, %v2146_v45, %v4412_v54  ;;  %v594_v47 = vadd.f32 %v7025_v6, %v593_v38  ;;  %v4423_v38 = vunpack.i.h.bf16 %v6977_v11 }
 0x249   :  { %v578_v35 = vmul.f32 %v6987_v58, %v577_v24  ;;  %v7048_v9 = vadd.f32 1.0, %v4628_v36  ;;  %v4413_v36 = vunpack.i.h.bf16 %v4411_v55  ;;  %v602_v29 = vor.u32 1.1754944e-38, %v601_v37 }
 0x24a   :  { %v2271_v42 = vpop.f32.mrf.mxu2 }
 0x24b   :  { %v6996_v14 = vadd.f32 %v6812_v26, %v2271_v42  ;;  %v572_v42 = vor.u32 1.1754944e-38, %v571_v51  ;;  %v579_v27 = vadd.f32 %v6987_v58, %v578_v35  ;;  %4631 = vrcp.f32 %v7048_v9 }
 0x24c   :  { %v4417_v35 = vunpack.i.l.bf16 %v6932_v30 }
 0x24d   :  { %v2367_v4 = vsel %vm879_vm4, %v6996_v14, 0.0  ;;  %v573_v0 = vsel %vm570_vm11, %v572_v42, %v568_v23  ;;  %v583_v24 = vsel %vm7062_vm14, %v6987_v58, %v579_v27  ;;  %v599_v58 = vand.u32 2147483647, %v6980_v33 }
 0x24e   :  { %2368 = vadd.xlane.f32.xlu2 %v2367_v4  ;;  %v7053_v4 = vpop.eup %4629  ;;  %v718_v10 = vmul.f32 %v6833_v12, %v573_v0  ;;  %v588_v12 = vsel %vm585_vm15, %v587_v17, %v583_v24  ;;  %v598_v33 = vsel %vm7087_vm2, %v7025_v6, %v594_v47  ;;  %v614_v6 = vand.u32 2147483647, %v7018_v50 }
 0x24f   :  { %2321 = vmatmul.f32.gmra.mxu2 %v2211_v32  ;;  %v606_v28 = vmul.f32 %v7053_v4, %v7018_v50  ;;  %vm600_vm3 = vcmp.eq.f32.partialorder %v599_v58, 8.507059e+37  ;;  %vm611_vm8 = vweird.f32 %v7053_v4  ;;  %vm625_vm11 = vweird.f32 %v7048_v9 }
 0x250   :  { %v2147_v7 = vsel %vm879_vm4, %v718_v10, %v4408_v46  ;;  %v603_v57 = vsel %vm600_vm3, %v602_v29, %v598_v33  ;;  %vm7112_vm9 = vmor %vm610_vm7, %vm611_vm8  ;;  %v617_v10 = vor.u32 1.1754944e-38, %v616_v8  ;;  %vm615_vm10 = vcmp.eq.f32.partialorder %v614_v6, 8.507059e+37 }
 0x251   :  { %v7081_v42 = vpop.eup %4631  ;;  %v607_v5 = vsub.f32 1.0, %v606_v28  ;;  %v2180_v23 = vsel %vm2156_vm5, %v2147_v7, %v4413_v36  ;;  %v4476_v0 = vpop.permute.xlu2 %4475  ;;  %v631_v28 = vand.u32 2147483648, %v7048_v9 }
 0x252   :  { %v2274_v18 = vpop.f32.mrf.mxu2  ;;  %4495 = vrot.lane.b32.xlu0 %v4494_v39, %s4928_s15  ;;  %v4418_v39 = vunpack.i.h.bf16 %v6932_v30  ;;  %v4478_v46 = vunpack.i.h.bf16 %v4476_v0  ;;  %vm626_vm12 = vweird.f32 %v7081_v42  ;;  %v4426_v30 = vpop.permute.xlu1 %4425 }
 0x253   :  { %v7031_v44 = vadd.f32 %v6812_v26, %v2274_v18  ;;  %v608_v19 = vmul.f32 %v7053_v4, %v607_v5  ;;  %vm627_vm13 = vmor %vm625_vm11, %vm626_vm12  ;;  %v632_v47 = vor.u32 1.1754944e-38, %v631_v28  ;;  %v4437_v5 = vunpack.i.l.bf16 %v6555_v25 }
 0x255   :  { %v2370_v62 = vsel %vm879_vm4, %v7031_v44, 0.0 }
 0x256   :  { %2371 = vadd.xlane.f32.xlu1 %v2370_v62 }
 0x259   :  { %v4471_v1 = vpop.permute.xlu0 %4470 }
 0x25a   :  { %v4472_v60 = vunpack.i.l.bf16 %v4471_v1  ;;  %v2277_v32 = vpop.f32.mrf.mxu2  ;;  %v4473_v62 = vunpack.i.h.bf16 %v4471_v1  ;;  %v719_v1 = vmul.f32 %v6887_v63, %v588_v12  ;;  %v4422_v63 = vunpack.i.l.bf16 %v6977_v11 }
 0x25b   :  { %v7059_v61 = vadd.f32 %v6812_v26, %v2277_v32  ;;  %v4477_v32 = vunpack.i.l.bf16 %v4476_v0  ;;  %v4427_v12 = vunpack.i.l.bf16 %v4426_v30 }
 0x25c   :  { %v2212_v51 = vsel %vm2189_vm6, %v2179_v2, %v4472_v60  ;;  %v2213_v54 = vsel %vm2189_vm6, %v2180_v23, %v4473_v62  ;;  %v621_v60 = vmul.f32 %v7081_v42, %v7048_v9  ;;  %v2148_v45 = vsel %vm879_vm4, %v719_v1, %v4417_v35  ;;  %v8558_v2 = vld [vmem:[#allocation9_spill] sm:$0xff] }
 0x25d   :  { %2324 = vmatmul.f32.gmra.mxu2 %v2212_v51  ;;  %v2373_v18 = vsel %vm879_vm4, %v7059_v61, 0.0  ;;  %v2181_v48 = vsel %vm2156_vm5, %v2148_v45, %v4422_v63  ;;  %v4428_v1 = vunpack.i.h.bf16 %v4426_v30 }
 0x25e   :  { %2374 = vadd.xlane.f32.xlu1 %v2373_v18  ;;  %v622_v27 = vsub.f32 1.0, %v621_v60  ;;  %v2214_v51 = vsel %vm2189_vm6, %v2181_v48, %v4477_v32  ;;  %v720_v18 = vmul.f32 %v6922_v13, %v603_v57  ;;  %v4932_v60 = vmov 32.0   ;;  %v8557_v48 = vld [vmem:[#allocation36_spill] sm:$0xff] }
 0x25f   :  { %4633 = vrcp.f32 %v4932_v60 }
 0x260   :  { %v623_v50 = vmul.f32 %v7081_v42, %v622_v27  ;;  %v2149_v24 = vsel %vm879_vm4, %v720_v18, %v4418_v39  ;;  %v1188_v39 = vadd.f32 %v8558_v2, %v8557_v48  ;;  %v8560_v18 = vld [vmem:[#allocation32_spill] sm:$0xff] }
 0x261   :  { %v2182_v62 = vsel %vm2156_vm5, %v2149_v24, %v4423_v38  ;;  %v1358_v28 = vmul.f32 2.0, %v8560_v18 }
 0x262   :  { %v624_v36 = vadd.f32 %v7081_v42, %v623_v50  ;;  %v2280_v11 = vpop.f32.mrf.mxu2  ;;  %v2215_v37 = vsel %vm2189_vm6, %v2182_v62, %v4478_v46  ;;  %v1220_v38 = vmul.f32 2.0, %v1188_v39  ;;  %v1359_v62 = vmul.f32 2.0, %v8558_v2 }
 0x263   :  { %v7136_v23 = vadd.f32 %v6812_v26, %v2280_v11 }
 0x264   :  { %v628_v58 = vsel %vm627_vm13, %v7081_v42, %v624_v36 }
 0x265   :  { %2327 = vmatmul.f32.gmra.mxu2 %v2213_v54  ;;  %v2376_v54 = vsel %vm879_vm4, %v7136_v23, 0.0  ;;  %v4634_v63 = vpop.eup %4633 }
 0x266   :  { %4485 = vrot.lane.b32.xlu2 %v4484_v43, %s4929_s2  ;;  %v609_v43 = vadd.f32 %v7053_v4, %v608_v19  ;;  %v2452_v32 = vmul.f32 32.0, %v4634_v63  ;;  %vm2456_vm15 = vweird.f32 %v4634_v63 }
 0x268   :  { %v613_v17 = vsel %vm7112_vm9, %v7053_v4, %v609_v43  ;;  %v629_v4 = vand.u32 2147483647, %v7048_v9  ;;  %v2453_v45 = vsub.f32 1.0, %v2452_v32 }
 0x269   :  { %v618_v13 = vsel %vm615_vm10, %v617_v10, %v613_v17 }
 0x26a   :  { %v721_v7 = vmul.f32 %v6963_v20, %v618_v13  ;;  %vm630_vm14 = vcmp.eq.f32.partialorder %v629_v4, 8.507059e+37  ;;  %v2454_v57 = vmul.f32 %v4634_v63, %v2453_v45  ;;  %v1663_v13 = vpop.f32.mrf.mxu1  ;;  %v1252_v4 = vmul.f32 %v1220_v38, %v6089_v3 }
 0x26b   :  { %v633_v35 = vsel %vm630_vm14, %v632_v47, %v628_v58  ;;  %v1391_v47 = vadd.f32 %v1359_v62, %v8557_v48 }
 0x26c   :  { %v2150_v9 = vsel %vm879_vm4, %v721_v7, %v4427_v12  ;;  %v722_v29 = vmul.f32 %v6992_v41, %v633_v35  ;;  %v2455_v8 = vadd.f32 %v4634_v63, %v2454_v57  ;;  %v2283_v41 = vpop.f32.mrf.mxu2 }
 0x26d   :  { %2330 = vmatmul.f32.gmra.mxu2 %v2214_v51  ;;  %v2183_v42 = vsel %vm2156_vm5, %v2150_v9, %v4437_v5  ;;  %v8559_v51 = vld [vmem:[#allocation22_spill] sm:$0xff] }
 0x26e   :  { %v7152_v43 = vsel %vm2456_vm15, %v4634_v63, %v2455_v8  ;;  %v1187_v10 = vadd.f32 %v8560_v18, %v8559_v51 }
 0x270   :  { %v1219_v46 = vmul.f32 2.0, %v1187_v10 }
 0x272   :  { %v1251_v12 = vmul.f32 %v1219_v46, %v8548_v22 }
 0x274   :  { %v7165_v24 = vpop.f32.mrf.mxu2  ;;  %v1287_v58 = vsub.f32 %v1251_v12, %v6644_v31 }
 0x275   :  { %2333 = vmatmul.f32.gmra.mxu2 %v2215_v37  ;;  %v1390_v37 = vadd.f32 %v1358_v28, %v8559_v51 }
 0x277   :  { %4490 = vrot.lane.b32.xlu1 %v4489_v16, %s4931_s18  ;;  %v2151_v16 = vsel %vm879_vm4, %v722_v29, %v4428_v1  ;;  %v1423_v1 = vmul.f32 2.0, %v1391_v47 }
 0x278   :  { %v2184_v33 = vsel %vm2156_vm5, %v2151_v16, %v4438_v49 }
 0x279   :  { %v4481_v55 = vpop.permute.xlu0 %4480 }
 0x27a   :  { %v4482_v20 = vunpack.i.l.bf16 %v4481_v55  ;;  %v4483_v21 = vunpack.i.h.bf16 %v4481_v55  ;;  %v1422_v55 = vmul.f32 2.0, %v1390_v37 }
 0x27c   :  { %2377 = vadd.xlane.f32.xlu0 %v2376_v54  ;;  %v2216_v0 = vsel %vm2189_vm6, %v2183_v42, %v4482_v20  ;;  %v2217_v19 = vsel %vm2189_vm6, %v2184_v33, %v4483_v21  ;;  %v2289_v35 = vpop.f32.mrf.mxu2  ;;  %v1666_v20 = vpop.f32.mrf.mxu1  ;;  %v7184_v54 = vadd.f32 %v6812_v26, %v2283_v41  ;;  %v1699_v33 = vadd.f32 %v1663_v13, %v8548_v22 }
 0x27d   :  { %2336 = vmatmul.f32.gmra.mxu2 %v2216_v0  ;;  %v1326_v0 = vmul.f32 %v8525_v59, %v1287_v58  ;;  %v7206_v41 = vadd.f32 %v6812_v26, %v2289_v35 }
 0x27f   :  { %v1454_v16 = vmul.f32 %v1422_v55, %v1326_v0 }
 0x281   :  { %v1731_v45 = vsub.f32 %v1454_v16, %v1699_v33 }
 0x283   :  { %v1770_v2 = vmul.f32 %v5620_v34, %v1731_v45 }
 0x284   :  { %v2292_v22 = vpop.f32.mrf.mxu2 }
 0x285   :  { %2339 = vmatmul.f32.gmra.mxu2 %v2217_v19  ;;  %v7227_v46 = vadd.f32 %v6812_v26, %v2292_v22 }
 0x287   :  { %v2388_v28 = vsel %vm879_vm4, %v7227_v46, 0.0 }
 0x28c   :  { %v2295_v13 = vpop.f32.mrf.mxu2 }
 0x2a1   :  { %v2357_v25 = vpop.xlane.xlu2 %2356 }
 0x2a2   :  { %v2458_v6 = vmul.f32 %v7152_v43, %v2357_v25  ;;  %v7215_v25 = vld [vmem:[%s8333_s1 + $0xe8] sm:$0xff] }
 0x2a4   :  { %v7156_v27 = vsub.f32 %v6837_v56, %v2458_v6  ;;  %v4075_v6 = vmul.f32 -1.442695, %v7215_v25 }
 0x2a6   :  { %v2522_v17 = vmul.f32 %v7156_v27, %v7156_v27 }
 0x2a8   :  { %v2554_v50 = vsel %vm879_vm4, %v2522_v17, 0.0 }
 0x2a9   :  { %v2360_v30 = vpop.xlane.xlu1 %2359  ;;  %2555 = vadd.xlane.f32.xlu0 %v2554_v50 }
 0x2aa   :  { %v2459_v56 = vmul.f32 %v7152_v43, %v2360_v30 }
 0x2ac   :  { %v7170_v36 = vsub.f32 %v6882_v40, %v2459_v56  ;;  %v1288_v40 = vsub.f32 %v1252_v4, %v6644_v31  ;;  %v7194_v31 = vld [vmem:[%s8333_s1 + $0xe0] sm:$0xff] }
 0x2ad   :  { %v4074_v49 = vmul.f32 -1.442695, %v7194_v31 }
 0x2ae   :  { %v2523_v11 = vmul.f32 %v7170_v36, %v7170_v36  ;;  %v1327_v29 = vmul.f32 %v8525_v59, %v1288_v40  ;;  %v2379_v59 = vsel %vm879_vm4, %v7184_v54, 0.0 }
 0x2af   :  { %4635 = vpow2.f32 %v4074_v49 }
 0x2b0   :  { %v2557_v7 = vsel %vm879_vm4, %v2523_v11, 0.0  ;;  %v1455_v60 = vmul.f32 %v1423_v1, %v1327_v29  ;;  %v4499_v8 = vpack.i.bf16 %v1327_v29, %v1326_v0  ;;  %4637 = vpow2.f32 %v4075_v6 }
 0x2b1   :  { %v2363_v5 = vpop.xlane.xlu0 %2362  ;;  %2558 = vadd.xlane.f32.xlu2 %v2557_v7  ;;  %v7240_v11 = vadd.f32 %v6812_v26, %v2295_v13 }
 0x2b2   :  { %v2460_v9 = vmul.f32 %v7152_v43, %v2363_v5 }
 0x2b3   :  { %v2391_v58 = vsel %vm879_vm4, %v7240_v11, 0.0 }
 0x2b4   :  { %v7187_v42 = vsub.f32 %v6926_v15, %v2460_v9  ;;  %v1700_v15 = vadd.f32 %v1666_v20, %v6089_v3  ;;  %v2298_v9 = vpop.f32.mrf.mxu2 }
 0x2b5   :  { %v4636_v51 = vpop.eup %4635 }
 0x2b6   :  { %v2524_v21 = vmul.f32 %v7187_v42, %v7187_v42  ;;  %v1732_v57 = vsub.f32 %v1455_v60, %v1700_v15  ;;  %v211_v50 = vadd.f32 1.0, %v4636_v51  ;;  %v4638_v56 = vpop.eup %4637 }
 0x2b8   :  { %v2560_v19 = vsel %vm879_vm4, %v2524_v21, 0.0  ;;  %v1771_v39 = vmul.f32 %v5620_v34, %v1732_v57  ;;  %4639 = vrcp.f32 %v211_v50  ;;  %vm640_vm0 = vweird.f32 %v211_v50 }
 0x2b9   :  { %2561 = vadd.xlane.f32.xlu1 %v2560_v19  ;;  %v2366_v63 = vpop.xlane.xlu1 %2365  ;;  %2380 = vadd.xlane.f32.xlu2 %v2379_v59  ;;  %v646_v15 = vand.u32 2147483648, %v211_v50 }
 0x2ba   :  { %v2461_v32 = vmul.f32 %v7152_v43, %v2366_v63  ;;  %v4504_v38 = vpack.i.bf16 %v1771_v39, %v1770_v2 }
 0x2bb   :  { %v647_v60 = vor.u32 1.1754944e-38, %v646_v15 }
 0x2bc   :  { %v7209_v3 = vsub.f32 %v6967_v52, %v2461_v32  ;;  %v2385_v52 = vsel %vm879_vm4, %v7206_v41, 0.0 }
 0x2bd   :  { %4500 = vrot.lane.b32.xlu0 %v4499_v8, %s4929_s2 }
 0x2be   :  { %v2525_v48 = vmul.f32 %v7209_v3, %v7209_v3  ;;  %v4640_v7 = vpop.eup %4639 }
 0x2bf   :  { %v636_v5 = vmul.f32 %v4640_v7, %v211_v50  ;;  %vm641_vm1 = vweird.f32 %v4640_v7 }
 0x2c0   :  { %v2563_v18 = vsel %vm879_vm4, %v2525_v48, 0.0  ;;  %vm642_vm2 = vmor %vm640_vm0, %vm641_vm1  ;;  %v4442_v48 = vunpack.i.l.bf16 %v7013_v53 }
 0x2c1   :  { %2386 = vadd.xlane.f32.xlu1 %v2385_v52  ;;  %2564 = vadd.xlane.f32.xlu2 %v2563_v18  ;;  %v2369_v10 = vpop.xlane.xlu2 %2368  ;;  %v637_v1 = vsub.f32 1.0, %v636_v5 }
 0x2c2   :  { %v2462_v17 = vmul.f32 %v7152_v43, %v2369_v10 }
 0x2c3   :  { %v638_v16 = vmul.f32 %v4640_v7, %v637_v1 }
 0x2c4   :  { %v7230_v30 = vsub.f32 %v6996_v14, %v2462_v17  ;;  %v212_v14 = vadd.f32 1.0, %v4638_v56  ;;  %v7264_v39 = vpop.permute.xlu0 %4495  ;;  %v7268_v17 = vadd.f32 %v6812_v26, %v7165_v24 }
 0x2c5   :  { %4505 = vrot.lane.b32.xlu0 %v4504_v38, %s4931_s18  ;;  %v639_v19 = vadd.f32 %v4640_v7, %v638_v16 }
 0x2c6   :  { %v2526_v34 = vmul.f32 %v7230_v30, %v7230_v30  ;;  %4641 = vrcp.f32 %v212_v14  ;;  %vm655_vm7 = vweird.f32 %v212_v14  ;;  %v661_v57 = vand.u32 2147483648, %v212_v14 }
 0x2c7   :  { %v643_v63 = vsel %vm642_vm2, %v4640_v7, %v639_v19  ;;  %v659_v6 = vand.u32 2147483647, %v212_v14 }
 0x2c8   :  { %v2566_v4 = vsel %vm879_vm4, %v2526_v34, 0.0  ;;  %v662_v52 = vor.u32 1.1754944e-38, %v661_v57 }
 0x2c9   :  { %2389 = vadd.xlane.f32.xlu1 %v2388_v28  ;;  %v2372_v62 = vpop.xlane.xlu1 %2371  ;;  %2567 = vadd.xlane.f32.xlu2 %v2566_v4  ;;  %v4486_v8 = vpop.permute.xlu2 %4485  ;;  %vm660_vm10 = vcmp.eq.f32.partialorder %v659_v6, 8.507059e+37  ;;  %v2382_v28 = vsel %vm879_vm4, %v7268_v17, 0.0 }
 0x2ca   :  { %v2463_v12 = vmul.f32 %v7152_v43, %v2372_v62  ;;  %v4487_v51 = vunpack.i.l.bf16 %v4486_v8  ;;  %v2301_v62 = vpop.f32.mrf.mxu2 }
 0x2cc   :  { %v7243_v37 = vsub.f32 %v7031_v44, %v2463_v12  ;;  %v7252_v44 = vadd.f32 %v6812_v26, %v2298_v9  ;;  %v4642_v0 = vpop.eup %4641  ;;  %v4488_v12 = vunpack.i.h.bf16 %v4486_v8 }
 0x2cd   :  { %v651_v33 = vmul.f32 %v4642_v0, %v212_v14  ;;  %vm656_vm8 = vweird.f32 %v4642_v0 }
 0x2ce   :  { %v2527_v47 = vmul.f32 %v7243_v37, %v7243_v37  ;;  %v2394_v49 = vsel %vm879_vm4, %v7252_v44, 0.0  ;;  %vm657_vm9 = vmor %vm655_vm7, %vm656_vm8 }
 0x2cf   :  { %v652_v59 = vsub.f32 1.0, %v651_v33 }
 0x2d0   :  { %v2569_v40 = vsel %vm879_vm4, %v2527_v47, 0.0  ;;  %v7279_v47 = vadd.f32 %v6812_v26, %v2301_v62  ;;  %v7295_v26 = vld [vmem:[%s8333_s1 + $0xf0] sm:$0xff] }
 0x2d1   :  { %2392 = vadd.xlane.f32.xlu1 %v2391_v58  ;;  %v2375_v55 = vpop.xlane.xlu1 %2374  ;;  %2570 = vadd.xlane.f32.xlu2 %v2569_v40  ;;  %v653_v32 = vmul.f32 %v4642_v0, %v652_v59 }
 0x2d2   :  { %v2464_v35 = vmul.f32 %v7152_v43, %v2375_v55  ;;  %v2397_v9 = vsel %vm879_vm4, %v7279_v47, 0.0  ;;  %v7306_v16 = vpop.f32.mrf.mxu2 }
 0x2d3   :  { %v654_v22 = vadd.f32 %v4642_v0, %v653_v32 }
 0x2d4   :  { %v7255_v20 = vsub.f32 %v7059_v61, %v2464_v35  ;;  %v644_v61 = vand.u32 2147483647, %v211_v50  ;;  %v7301_v35 = vld [vmem:[%s8333_s1 + $0xf8] sm:$0xff] }
 0x2d5   :  { %v658_v18 = vsel %vm657_vm9, %v4642_v0, %v654_v22  ;;  %v4077_v1 = vmul.f32 -1.442695, %v7301_v35 }
 0x2d6   :  { %v2528_v29 = vmul.f32 %v7255_v20, %v7255_v20  ;;  %vm645_vm3 = vcmp.eq.f32.partialorder %v644_v61, 8.507059e+37  ;;  %v663_v13 = vsel %vm660_vm10, %v662_v52, %v658_v18 }
 0x2d7   :  { %v648_v45 = vsel %vm645_vm3, %v647_v60, %v643_v63  ;;  %v724_v4 = vmul.f32 %v7215_v25, %v663_v13 }
 0x2d8   :  { %v2572_v21 = vsel %vm879_vm4, %v2528_v29, 0.0  ;;  %v723_v2 = vmul.f32 %v7194_v31, %v648_v45  ;;  %v4443_v31 = vunpack.i.h.bf16 %v7013_v53 }
 0x2d9   :  { %2395 = vadd.xlane.f32.xlu1 %v2394_v49  ;;  %2573 = vadd.xlane.f32.xlu2 %v2572_v21 }
 0x2da   :  { %v2152_v38 = vsel %vm879_vm4, %v723_v2, %v4442_v48  ;;  %v2153_v53 = vsel %vm879_vm4, %v724_v4, %v4443_v31  ;;  %v7312_v63 = vpop.f32.mrf.mxu2 }
 0x2db   :  { %v2185_v34 = vsel %vm2156_vm5, %v2152_v38, %v4487_v51  ;;  %v2186_v40 = vsel %vm2156_vm5, %v2153_v53, %v4488_v12 }
 0x2e2   :  { %v7320_v38 = vpop.f32.mrf.mxu2 }
 0x2e9   :  { %v4491_v10 = vpop.permute.xlu1 %4490 }
 0x2ea   :  { %v4492_v50 = vunpack.i.l.bf16 %v4491_v10  ;;  %v4493_v14 = vunpack.i.h.bf16 %v4491_v10 }
 0x2ec   :  { %v2218_v56 = vsel %vm2189_vm6, %v2185_v34, %v4492_v50  ;;  %v2219_v5 = vsel %vm2189_vm6, %v2186_v40, %v4493_v14 }
 0x2ed   :  { %2342 = vmatmul.f32.gmra.mxu2 %v2218_v56 }
 0x2ef   :  { %v2378_v24 = vpop.xlane.xlu0 %2377  ;;  %2383 = vadd.xlane.f32.xlu0 %v2382_v28 }
 0x2f0   :  { %v2465_v7 = vmul.f32 %v7152_v43, %v2378_v24 }
 0x2f2   :  { %v7282_v58 = vsub.f32 %v7136_v23, %v2465_v7  ;;  %v4076_v23 = vmul.f32 -1.442695, %v7295_v26 }
 0x2f4   :  { %v2529_v25 = vmul.f32 %v7282_v58, %v7282_v58  ;;  %4643 = vpow2.f32 %v4076_v23 }
 0x2f5   :  { %2345 = vmatmul.f32.gmra.mxu2 %v2219_v5  ;;  %4645 = vpow2.f32 %v4077_v1 }
 0x2f6   :  { %v2575_v55 = vsel %vm879_vm4, %v2529_v25, 0.0 }
 0x2f7   :  { %2398 = vadd.xlane.f32.xlu0 %v2397_v9  ;;  %2576 = vadd.xlane.f32.xlu2 %v2575_v55 }
 0x2fa   :  { %v4644_v0 = vpop.eup %4643 }
 0x2fb   :  { %v213_v29 = vadd.f32 1.0, %v4644_v0  ;;  %v4646_v49 = vpop.eup %4645 }
 0x2fc   :  { %v7304_v21 = vadd.f32 1.0, %v4646_v49  ;;  %v7356_v49 = vld [vmem:[%s8340_s8] ss:$0 sm:$0xff] }
 0x2fd   :  { %4647 = vrcp.f32 %v213_v29  ;;  %vm670_vm11 = vweird.f32 %v213_v29  ;;  %v676_v52 = vand.u32 2147483648, %v213_v29  ;;  %v674_v50 = vand.u32 2147483647, %v213_v29 }
 0x2fe   :  { %4649 = vrcp.f32 %v7304_v21  ;;  %vm685_vm14 = vweird.f32 %v7304_v21  ;;  %v691_v9 = vand.u32 2147483648, %v7304_v21  ;;  %v689_v0 = vand.u32 2147483647, %v7304_v21 }
 0x2ff   :  { %v677_v4 = vor.u32 1.1754944e-38, %v676_v52  ;;  %vm675_vm1 = vcmp.eq.f32.partialorder %v674_v50, 8.507059e+37 }
 0x300   :  { %vm7369_vm8 = vcmp.eq.f32.partialorder %v689_v0, 8.507059e+37 }
 0x303   :  { %v4648_v33 = vpop.eup %4647 }
 0x304   :  { %v666_v61 = vmul.f32 %v4648_v33, %v213_v29  ;;  %v7310_v60 = vpop.eup %4649  ;;  %vm671_vm12 = vweird.f32 %v4648_v33 }
 0x305   :  { %v681_v45 = vmul.f32 %v7310_v60, %v7304_v21  ;;  %vm7322_vm13 = vmor %vm670_vm11, %vm671_vm12  ;;  %vm686_vm15 = vweird.f32 %v7310_v60  ;;  %v7363_v21 = vld [vmem:[%s8341_s9] ss:$0 sm:$0xff] }
 0x306   :  { %v667_v32 = vsub.f32 1.0, %v666_v61  ;;  %vm7345_vm3 = vmor %vm685_vm14, %vm686_vm15 }
 0x307   :  { %v682_v2 = vsub.f32 1.0, %v681_v45 }
 0x308   :  { %v668_v22 = vmul.f32 %v4648_v33, %v667_v32 }
 0x309   :  { %v683_v13 = vmul.f32 %v7310_v60, %v682_v2  ;;  %v4497_v2 = vunpack.i.l.bf16 %v7264_v39 }
 0x30a   :  { %v669_v10 = vadd.f32 %v4648_v33, %v668_v22 }
 0x30b   :  { %v684_v25 = vadd.f32 %v7310_v60, %v683_v13 }
 0x30c   :  { %v673_v14 = vsel %vm7322_vm13, %v4648_v33, %v669_v10 }
 0x30d   :  { %v678_v29 = vsel %vm675_vm1, %v677_v4, %v673_v14  ;;  %v688_v22 = vsel %vm7345_vm3, %v7310_v60, %v684_v25  ;;  %v7385_v60 = vld [vmem:[%s8339_s7] ss:$0 sm:$0xff] }
 0x30e   :  { %v7389_v34 = vadd.f32 %v7385_v60, %v7306_v16 }
 0x310   :  { %v2400_v0 = vsel %vm879_vm4, %v7389_v34, 0.0 }
 0x31c   :  { %v2556_v15 = vpop.xlane.xlu0 %2555 }
 0x31d   :  { %v2650_v19 = vmul.f32 %v2556_v15, %v7152_v43 }
 0x31f   :  { %v2682_v59 = vadd.f32 1e-05, %v2650_v19 }
 0x321   :  { %4651 = vrsqrt.f32 %v2682_v59  ;;  %vm2720_vm2 = vweird.f32 %v2682_v59 }
 0x324   :  { %v2559_v57 = vpop.xlane.xlu2 %2558 }
 0x325   :  { %v2651_v8 = vmul.f32 %v2559_v57, %v7152_v43 }
 0x327   :  { %v4652_v6 = vpop.eup %4651  ;;  %v7317_v48 = vadd.f32 1e-05, %v2651_v8  ;;  %v725_v8 = vmul.f32 %v7295_v26, %v678_v29 }
 0x328   :  { %v2715_v51 = vmul.f32 %v4652_v6, %v2682_v59  ;;  %vm2721_vm0 = vweird.f32 %v4652_v6  ;;  %v692_v59 = vor.u32 1.1754944e-38, %v691_v9 }
 0x329   :  { %4653 = vrsqrt.f32 %v7317_v48  ;;  %vm2722_vm7 = vmor %vm2720_vm2, %vm2721_vm0  ;;  %vm2730_vm10 = vweird.f32 %v7317_v48  ;;  %v2154_v16 = vsel %vm879_vm4, %v725_v8, %v4497_v2 }
 0x32a   :  { %v2716_v18 = vmul.f32 %v4652_v6, %v2715_v51 }
 0x32c   :  { %v2717_v56 = vmul.f32 0.5, %v2716_v18  ;;  %v2562_v31 = vpop.xlane.xlu1 %2561  ;;  %v2381_v28 = vpop.xlane.xlu2 %2380 }
 0x32d   :  { %v2652_v62 = vmul.f32 %v2562_v31, %v7152_v43  ;;  %v2466_v12 = vmul.f32 %v7152_v43, %v2381_v28 }
 0x32e   :  { %v2718_v24 = vsub.f32 1.5, %v2717_v56 }
 0x32f   :  { %v4654_v7 = vpop.eup %4653  ;;  %v7333_v53 = vadd.f32 1e-05, %v2652_v62  ;;  %v7336_v40 = vsub.f32 %v7184_v54, %v2466_v12  ;;  %v7338_v5 = vpop.permute.xlu0 %4500  ;;  %v693_v12 = vsel %vm7369_vm8, %v692_v59, %v688_v22 }
 0x330   :  { %v2719_v55 = vmul.f32 %v4652_v6, %v2718_v24  ;;  %v2725_v23 = vmul.f32 %v4654_v7, %v7317_v48  ;;  %vm2731_vm9 = vweird.f32 %v4654_v7  ;;  %v4502_v26 = vunpack.i.l.bf16 %v7338_v5 }
 0x331   :  { %4655 = vrsqrt.f32 %v7333_v53  ;;  %v2530_v54 = vmul.f32 %v7336_v40, %v7336_v40  ;;  %vm2732_vm11 = vmor %vm2730_vm10, %vm2731_vm9  ;;  %vm2740_vm13 = vweird.f32 %v7333_v53 }
 0x332   :  { %v2723_v33 = vsel %vm2722_vm7, %v4652_v6, %v2719_v55  ;;  %v2726_v15 = vmul.f32 %v4654_v7, %v2725_v23  ;;  %v7373_v6 = vpop.f32.mrf.mxu2  ;;  %v2187_v48 = vsel %vm2156_vm5, %v2154_v16, %v4502_v26 }
 0x333   :  { %v3034_v19 = vmul.f32 %v2723_v33, %v7156_v27  ;;  %v2578_v61 = vsel %vm879_vm4, %v2530_v54, 0.0  ;;  %v4498_v54 = vunpack.i.h.bf16 %v7264_v39  ;;  %v7424_v39 = vadd.f32 %v7385_v60, %v7320_v38 }
 0x334   :  { %v2727_v32 = vmul.f32 0.5, %v2726_v15  ;;  %v2387_v45 = vpop.xlane.xlu1 %2386  ;;  %2579 = vadd.xlane.f32.xlu2 %v2578_v61  ;;  %v2565_v57 = vpop.xlane.xlu2 %2564  ;;  %v726_v15 = vmul.f32 %v7301_v35, %v693_v12  ;;  %v3781_v35 = vld [vmem:[%s8342_s10 + $0x18] sm:$0xff]  ;;  %v3779_v12 = vld [vmem:[%s8342_s10 + $0x8] sm:$0xff] }
 0x335   :  { %v2468_v51 = vmul.f32 %v7152_v43, %v2387_v45  ;;  %v2653_v52 = vmul.f32 %v2565_v57, %v7152_v43  ;;  %v3070_v18 = vmul.f32 %v7356_v49, %v3034_v19  ;;  %v4503_v19 = vunpack.i.h.bf16 %v7338_v5  ;;  %3894 = vmatpush.msra.mxu3 %v3781_v35 }
 0x336   :  { %v2728_v10 = vsub.f32 1.5, %v2727_v32 }
 0x337   :  { %v7380_v50 = vpop.eup %4655  ;;  %v7392_v13 = vsub.f32 %v7206_v41, %v2468_v51  ;;  %v7394_v56 = vadd.f32 1e-05, %v2653_v52  ;;  %v4506_v31 = vpop.permute.xlu0 %4505  ;;  %v7397_v28 = vadd.f32 %v7363_v21, %v3070_v18  ;;  %v2155_v51 = vsel %vm879_vm4, %v726_v15, %v4498_v54  ;;  %v3780_v52 = vld [vmem:[%s8342_s10 + $0x10] sm:$0xff] }
 0x338   :  { %v2729_v4 = vmul.f32 %v4654_v7, %v2728_v10  ;;  %v2735_v62 = vmul.f32 %v7380_v50, %v7333_v53  ;;  %v4507_v41 = vunpack.i.l.bf16 %v4506_v31  ;;  %vm2741_vm12 = vweird.f32 %v7380_v50  ;;  %3895 = vmatpush.msra.mxu3 %v3780_v52 }
 0x339   :  { %4657 = vrsqrt.f32 %v7394_v56  ;;  %v2532_v24 = vmul.f32 %v7392_v13, %v7392_v13  ;;  %v4175_v9 = vmul.f32 -1.442695, %v7397_v28  ;;  %v4508_v45 = vunpack.i.h.bf16 %v4506_v31  ;;  %vm2742_vm14 = vmor %vm2740_vm13, %vm2741_vm12 }
 0x33a   :  { %v2733_v14 = vsel %vm2732_vm11, %v4654_v7, %v2729_v4  ;;  %v2736_v25 = vmul.f32 %v7380_v50, %v2735_v62  ;;  %v2220_v23 = vsel %vm2189_vm6, %v2187_v48, %v4507_v41  ;;  %v7430_v57 = vpop.f32.mrf.mxu2  ;;  %v2406_v62 = vsel %vm879_vm4, %v7424_v39, 0.0  ;;  %3896 = vmatpush.msra.mxu3 %v3779_v12 }
 0x33b   :  { %v3035_v55 = vmul.f32 %v2733_v14, %v7170_v36  ;;  %v2584_v1 = vsel %vm879_vm4, %v2532_v24, 0.0  ;;  %2348 = vmatmul.f32.gmra.mxu2 %v2220_v23  ;;  %4659 = vpow2.f32 %v4175_v9  ;;  %v3778_v24 = vld [vmem:[%s8342_s10] sm:$0xff] }
 0x33c   :  { %v2737_v29 = vmul.f32 0.5, %v2736_v25  ;;  %v2390_v7 = vpop.xlane.xlu1 %2389  ;;  %2585 = vadd.xlane.f32.xlu0 %v2584_v1  ;;  %v2568_v33 = vpop.xlane.xlu2 %2567  ;;  %2401 = vadd.xlane.f32.xlu2 %v2400_v0  ;;  %v7473_v1 = vadd.f32 %v7385_v60, %v7373_v6 }
 0x33d   :  { %v2469_v36 = vmul.f32 %v7152_v43, %v2390_v7  ;;  %v2654_v61 = vmul.f32 %v2568_v33, %v7152_v43  ;;  %v3071_v59 = vmul.f32 %v7356_v49, %v3035_v55  ;;  %3897 = vmatpush.msra.mxu3 %v3778_v24 }
 0x33e   :  { %v2738_v32 = vsub.f32 1.5, %v2737_v29 }
 0x33f   :  { %v4658_v5 = vpop.eup %4657  ;;  %v7433_v8 = vsub.f32 %v7227_v46, %v2469_v36  ;;  %v7435_v22 = vadd.f32 1e-05, %v2654_v61  ;;  %v7438_v38 = vadd.f32 %v7363_v21, %v3071_v59  ;;  %v2188_v46 = vsel %vm2156_vm5, %v2155_v51, %v4503_v19 }
 0x340   :  { %v2739_v27 = vmul.f32 %v7380_v50, %v2738_v32  ;;  %v2745_v2 = vmul.f32 %v4658_v5, %v7394_v56  ;;  %v2221_v4 = vsel %vm2189_vm6, %v2188_v46, %v4508_v45  ;;  %vm2751_vm5 = vweird.f32 %v4658_v5 }
 0x341   :  { %4661 = vrsqrt.f32 %v7435_v22  ;;  %v2533_v18 = vmul.f32 %v7433_v8, %v7433_v8  ;;  %v4176_v10 = vmul.f32 -1.442695, %v7438_v38  ;;  %v4660_v53 = vpop.eup %4659  ;;  %vm2750_vm6 = vweird.f32 %v7394_v56 }
 0x342   :  { %v2743_v26 = vsel %vm2742_vm14, %v7380_v50, %v2739_v27  ;;  %v2746_v31 = vmul.f32 %v4658_v5, %v2745_v2  ;;  %v7464_v50 = vadd.f32 1.0, %v4660_v53  ;;  %v2319_v33 = vpop.f32.mrf.mxu2  ;;  %vm2752_vm15 = vmor %vm2750_vm6, %vm2751_vm5  ;;  %v2409_v56 = vsel %vm879_vm4, %v7473_v1, 0.0 }
 0x343   :  { %v3036_v41 = vmul.f32 %v2743_v26, %v7187_v42  ;;  %v2587_v16 = vsel %vm879_vm4, %v2533_v18, 0.0  ;;  %4663 = vpow2.f32 %v4176_v10  ;;  %2351 = vmatmul.f32.gmra.mxu2 %v2221_v4  ;;  %v7490_v45 = vadd.f32 %v7385_v60, %v2319_v33 }
 0x344   :  { %v2747_v14 = vmul.f32 0.5, %v2746_v31  ;;  %v7466_v25 = vpop.xlane.xlu1 %2392  ;;  %2407 = vadd.xlane.f32.xlu0 %v2406_v62  ;;  %v2571_v48 = vpop.xlane.xlu2 %2570  ;;  %2588 = vadd.xlane.f32.xlu2 %v2587_v16  ;;  %4665 = vrcp.f32 %v7464_v50  ;;  %vm2760_vm0 = vweird.f32 %v7435_v22  ;;  %v3275_v52 = vand.u32 2147483647, %v7464_v50 }
 0x345   :  { %v2655_v9 = vmul.f32 %v2571_v48, %v7152_v43  ;;  %v3072_v55 = vmul.f32 %v7356_v49, %v3036_v41  ;;  %v3277_v31 = vand.u32 2147483648, %v7464_v50  ;;  %vm3271_vm7 = vweird.f32 %v7464_v50 }
 0x346   :  { %v2748_v42 = vsub.f32 1.5, %v2747_v14  ;;  %vm7512_vm8 = vcmp.eq.f32.partialorder %v3275_v52, 8.507059e+37 }
 0x347   :  { %v4662_v23 = vpop.eup %4661  ;;  %v7475_v0 = vadd.f32 1e-05, %v2655_v9  ;;  %v7481_v15 = vadd.f32 %v7363_v21, %v3072_v55 }
 0x348   :  { %v2749_v54 = vmul.f32 %v4658_v5, %v2748_v42  ;;  %v2755_v29 = vmul.f32 %v4662_v23, %v7435_v22  ;;  %vm2761_vm1 = vweird.f32 %v4662_v23 }
 0x349   :  { %v4664_v7 = vpop.eup %4663  ;;  %4667 = vrsqrt.f32 %v7475_v0  ;;  %v4177_v32 = vmul.f32 -1.442695, %v7481_v15  ;;  %vm2762_vm3 = vmor %vm2760_vm0, %vm2761_vm1  ;;  %vm2770_vm12 = vweird.f32 %v7475_v0 }
 0x34a   :  { %v2753_v19 = vsel %vm2752_vm15, %v4658_v5, %v2749_v54  ;;  %v2756_v36 = vmul.f32 %v4662_v23, %v2755_v29  ;;  %v7483_v61 = vadd.f32 1.0, %v4664_v7  ;;  %v4666_v6 = vpop.eup %4665  ;;  %v3278_v54 = vor.u32 1.1754944e-38, %v3277_v31 }
 0x34b   :  { %v3037_v59 = vmul.f32 %v2753_v19, %v7209_v3  ;;  %v3267_v51 = vmul.f32 %v4666_v6, %v7464_v50  ;;  %vm3272_vm2 = vweird.f32 %v4666_v6 }
 0x34c   :  { %v2757_v35 = vmul.f32 0.5, %v2756_v36  ;;  %v2396_v27 = vpop.xlane.xlu1 %2395  ;;  %v2574_v2 = vpop.xlane.xlu2 %2573  ;;  %4669 = vrcp.f32 %v7483_v61  ;;  %2410 = vadd.xlane.f32.xlu2 %v2409_v56  ;;  %vm3273_vm9 = vmor %vm3271_vm7, %vm3272_vm2  ;;  %v3292_v19 = vand.u32 2147483648, %v7483_v61  ;;  %vm3286_vm14 = vweird.f32 %v7483_v61 }
 0x34d   :  { %v2471_v5 = vmul.f32 %v7152_v43, %v2396_v27  ;;  %v2656_v3 = vmul.f32 %v2574_v2, %v7152_v43  ;;  %v3268_v18 = vsub.f32 1.0, %v3267_v51  ;;  %4671 = vpow2.f32 %v4177_v32 }
 0x34e   :  { %v2758_v46 = vsub.f32 1.5, %v2757_v35  ;;  %v3073_v4 = vmul.f32 %v7356_v49, %v3037_v59  ;;  %v3293_v31 = vor.u32 1.1754944e-38, %v3292_v19 }
 0x34f   :  { %v4668_v10 = vpop.eup %4667  ;;  %v7499_v53 = vsub.f32 %v7252_v44, %v2471_v5  ;;  %v7501_v26 = vadd.f32 1e-05, %v2656_v3  ;;  %v3269_v41 = vmul.f32 %v4666_v6, %v3268_v18  ;;  %v2415_v18 = vsel %vm879_vm4, %v7490_v45, 0.0 }
 0x350   :  { %v2759_v62 = vmul.f32 %v4662_v23, %v2758_v46  ;;  %v2765_v12 = vmul.f32 %v4668_v10, %v7475_v0  ;;  %v7517_v42 = vadd.f32 %v7363_v21, %v3073_v4  ;;  %vm2771_vm10 = vweird.f32 %v4668_v10 }
 0x351   :  { %4673 = vrsqrt.f32 %v7501_v26  ;;  %v2535_v44 = vmul.f32 %v7499_v53, %v7499_v53  ;;  %v3270_v9 = vadd.f32 %v4666_v6, %v3269_v41  ;;  %vm2772_vm13 = vmor %vm2770_vm12, %vm2771_vm10  ;;  %vm2780_vm0 = vweird.f32 %v7501_v26 }
 0x352   :  { %v4670_v24 = vpop.eup %4669  ;;  %v2763_v14 = vsel %vm2762_vm3, %v4662_v23, %v2759_v62  ;;  %v2766_v48 = vmul.f32 %v4668_v10, %v2765_v12  ;;  %v4178_v23 = vmul.f32 -1.442695, %v7517_v42 }
 0x353   :  { %v3038_v22 = vmul.f32 %v2763_v14, %v7230_v30  ;;  %v2593_v55 = vsel %vm879_vm4, %v2535_v44, 0.0  ;;  %v3282_v29 = vmul.f32 %v4670_v24, %v7483_v61  ;;  %v4672_v50 = vpop.eup %4671  ;;  %v3274_v33 = vsel %vm3273_vm9, %v4666_v6, %v3270_v9 }
 0x354   :  { %v2767_v7 = vmul.f32 0.5, %v2766_v48  ;;  %2594 = vadd.xlane.f32.xlu0 %v2593_v55  ;;  %v3279_v36 = vsel %vm7512_vm8, %v3278_v54, %v3274_v33  ;;  %v7526_v56 = vadd.f32 1.0, %v4672_v50  ;;  %4675 = vpow2.f32 %v4178_v23 }
 0x355   :  { %v3283_v59 = vsub.f32 1.0, %v3282_v29  ;;  %v3074_v30 = vmul.f32 %v7356_v49, %v3038_v22  ;;  %v3746_v35 = vmul.f32 %v3279_v36, %v7397_v28  ;;  %vm3287_vm11 = vweird.f32 %v4670_v24 }
 0x356   :  { %v2768_v32 = vsub.f32 1.5, %v2767_v7  ;;  %v3290_v6 = vand.u32 2147483647, %v7483_v61  ;;  %4677 = vrcp.f32 %v7526_v56  ;;  %vm3288_vm5 = vmor %vm3286_vm14, %vm3287_vm11  ;;  %v3307_v55 = vand.u32 2147483648, %v7526_v56 }
 0x357   :  { %v4674_v27 = vpop.eup %4673  ;;  %v3284_v2 = vmul.f32 %v4670_v24, %v3283_v59  ;;  %4207 = vmatmul.msk.f32.vlgmr.msra.gmra.mxu3 %vm879_vm4, %v3746_v35  ;;  %v7537_v28 = vadd.f32 %v7363_v21, %v3074_v30  ;;  %vm3301_vm3 = vweird.f32 %v7526_v56 }
 0x358   :  { %v2769_v51 = vmul.f32 %v4668_v10, %v2768_v32  ;;  %v2775_v5 = vmul.f32 %v4674_v27, %v7501_v26  ;;  %vm3291_vm6 = vcmp.eq.f32.partialorder %v3290_v6, 8.507059e+37  ;;  %vm2781_vm15 = vweird.f32 %v4674_v27 }
 0x359   :  { %v3285_v3 = vadd.f32 %v4670_v24, %v3284_v2  ;;  %v4179_v62 = vmul.f32 -1.442695, %v7537_v28  ;;  %vm2782_vm1 = vmor %vm2780_vm0, %vm2781_vm15  ;;  %v3308_v32 = vor.u32 1.1754944e-38, %v3307_v55 }
 0x35a   :  { %v2773_v52 = vsel %vm2772_vm13, %v4668_v10, %v2769_v51  ;;  %v2776_v46 = vmul.f32 %v4674_v27, %v2775_v5  ;;  %v4676_v12 = vpop.eup %4675 }
 0x35b   :  { %v3039_v0 = vmul.f32 %v2773_v52, %v7243_v37  ;;  %v3289_v4 = vsel %vm3288_vm5, %v4670_v24, %v3285_v3  ;;  %v7544_v10 = vadd.f32 1.0, %v4676_v12  ;;  %4679 = vpow2.f32 %v4179_v62 }
 0x35c   :  { %v2777_v41 = vmul.f32 0.5, %v2776_v46  ;;  %2416 = vadd.xlane.f32.xlu0 %v2415_v18  ;;  %v3294_v61 = vsel %vm3291_vm6, %v3293_v31, %v3289_v4  ;;  %v4678_v44 = vpop.eup %4677  ;;  %v7581_v4 = vadd.f32 %v7385_v60, %v7312_v63 }
 0x35d   :  { %v3747_v16 = vmul.f32 %v3294_v61, %v7438_v38  ;;  %v3075_v14 = vmul.f32 %v7356_v49, %v3039_v0  ;;  %v3297_v37 = vmul.f32 %v4678_v44, %v7526_v56  ;;  %4681 = vrcp.f32 %v7544_v10 }
 0x35e   :  { %v2778_v48 = vsub.f32 1.5, %v2777_v41  ;;  %v3305_v38 = vand.u32 2147483647, %v7526_v56  ;;  %vm3302_vm2 = vweird.f32 %v4678_v44  ;;  %v3322_v3 = vand.u32 2147483648, %v7544_v10 }
 0x35f   :  { %4208 = vmatmul.msk.f32.gmra.mxu3 %vm879_vm4, %v3747_v16  ;;  %v3298_v9 = vsub.f32 1.0, %v3297_v37  ;;  %v7552_v22 = vadd.f32 %v7363_v21, %v3075_v14  ;;  %vm3303_vm7 = vmor %vm3301_vm3, %vm3302_vm2  ;;  %v3320_v0 = vand.u32 2147483647, %v7544_v10  ;;  %vm3316_vm10 = vweird.f32 %v7544_v10 }
 0x360   :  { %v2779_v24 = vmul.f32 %v4674_v27, %v2778_v48  ;;  %vm3306_vm8 = vcmp.eq.f32.partialorder %v3305_v38, 8.507059e+37  ;;  %v3323_v63 = vor.u32 1.1754944e-38, %v3322_v3  ;;  %v2403_v55 = vsel %vm879_vm4, %v7581_v4, 0.0 }
 0x361   :  { %v3299_v50 = vmul.f32 %v4678_v44, %v3298_v9  ;;  %v4180_v7 = vmul.f32 -1.442695, %v7552_v22  ;;  %v4680_v33 = vpop.eup %4679  ;;  %vm3321_vm12 = vcmp.eq.f32.partialorder %v3320_v0, 8.507059e+37 }
 0x362   :  { %v2783_v54 = vsel %vm2782_vm1, %v4674_v27, %v2779_v24  ;;  %v2384_v29 = vpop.xlane.xlu0 %2383  ;;  %v7560_v36 = vadd.f32 1.0, %v4680_v33 }
 0x363   :  { %v3040_v26 = vmul.f32 %v2783_v54, %v7255_v20  ;;  %v2467_v19 = vmul.f32 %v7152_v43, %v2384_v29  ;;  %v3300_v23 = vadd.f32 %v4678_v44, %v3299_v50  ;;  %4683 = vpow2.f32 %v4180_v7  ;;  %v4682_v59 = vpop.eup %4681 }
 0x364   :  { %v3312_v20 = vmul.f32 %v4682_v59, %v7544_v10  ;;  %4685 = vrcp.f32 %v7560_v36  ;;  %vm3317_vm9 = vweird.f32 %v4682_v59  ;;  %v3337_v29 = vand.u32 2147483648, %v7560_v36 }
 0x365   :  { %v7563_v30 = vsub.f32 %v7268_v17, %v2467_v19  ;;  %v3076_v35 = vmul.f32 %v7356_v49, %v3040_v26  ;;  %v3304_v27 = vsel %vm3303_vm7, %v4678_v44, %v3300_v23  ;;  %v2470_v44 = vmul.f32 %v7152_v43, %v7466_v25  ;;  %vm3318_vm11 = vmor %vm3316_vm10, %vm3317_vm9 }
 0x366   :  { %v3309_v2 = vsel %vm3306_vm8, %v3308_v32, %v3304_v27  ;;  %v3313_v51 = vsub.f32 1.0, %v3312_v20  ;;  %v3335_v33 = vand.u32 2147483647, %v7560_v36  ;;  %vm3331_vm14 = vweird.f32 %v7560_v36 }
 0x367   :  { %v2531_v56 = vmul.f32 %v7563_v30, %v7563_v30  ;;  %v3748_v6 = vmul.f32 %v3309_v2, %v7481_v15  ;;  %v7572_v17 = vadd.f32 %v7363_v21, %v3076_v35  ;;  %v7602_v38 = vsub.f32 %v7240_v11, %v2470_v44 }
 0x368   :  { %v3314_v31 = vmul.f32 %v4682_v59, %v3313_v51  ;;  %vm3336_vm6 = vcmp.eq.f32.partialorder %v3335_v33, 8.507059e+37 }
 0x369   :  { %v2581_v5 = vsel %vm879_vm4, %v2531_v56, 0.0  ;;  %v4684_v52 = vpop.eup %4683  ;;  %4209 = vmatmul.msk.f32.gmra.mxu3 %vm879_vm4, %v3748_v6  ;;  %v4181_v15 = vmul.f32 -1.442695, %v7572_v17  ;;  %v2534_v32 = vmul.f32 %v7602_v38, %v7602_v38 }
 0x36a   :  { %2582 = vadd.xlane.f32.xlu1 %v2581_v5  ;;  %v2399_v46 = vpop.xlane.xlu0 %2398  ;;  %v2577_v18 = vpop.xlane.xlu2 %2576  ;;  %v7585_v41 = vadd.f32 1.0, %v4684_v52  ;;  %v3315_v16 = vadd.f32 %v4682_v59, %v3314_v31 }
 0x36b   :  { %v2472_v62 = vmul.f32 %v7152_v43, %v2399_v46  ;;  %v2657_v12 = vmul.f32 %v2577_v18, %v7152_v43  ;;  %v4686_v61 = vpop.eup %4685  ;;  %4687 = vpow2.f32 %v4181_v15  ;;  %v2590_v3 = vsel %vm879_vm4, %v2534_v32, 0.0 }
 0x36c   :  { %v3327_v37 = vmul.f32 %v4686_v61, %v7560_v36  ;;  %v3319_v24 = vsel %vm3318_vm11, %v4682_v59, %v3315_v16  ;;  %4689 = vrcp.f32 %v7585_v41  ;;  %vm3332_vm13 = vweird.f32 %v4686_v61 }
 0x36d   :  { %v7591_v14 = vsub.f32 %v7279_v47, %v2472_v62  ;;  %v7593_v48 = vadd.f32 1e-05, %v2657_v12  ;;  %v3324_v25 = vsel %vm3321_vm12, %v3323_v63, %v3319_v24  ;;  %vm3333_vm5 = vmor %vm3331_vm14, %vm3332_vm13  ;;  %v3338_v59 = vor.u32 1.1754944e-38, %v3337_v29 }
 0x36e   :  { %v3749_v9 = vmul.f32 %v3324_v25, %v7517_v42  ;;  %v3328_v47 = vsub.f32 1.0, %v3327_v37  ;;  %v2322_v42 = vpop.f32.mrf.mxu2  ;;  %v3352_v5 = vand.u32 2147483648, %v7585_v41  ;;  %v3350_v46 = vand.u32 2147483647, %v7585_v41 }
 0x36f   :  { %4691 = vrsqrt.f32 %v7593_v48  ;;  %v2536_v10 = vmul.f32 %v7591_v14, %v7591_v14  ;;  %v7615_v27 = vadd.f32 %v7385_v60, %v2322_v42  ;;  %vm3346_vm0 = vweird.f32 %v7585_v41 }
 0x370   :  { %v3329_v7 = vmul.f32 %v4686_v61, %v3328_v47  ;;  %v3353_v62 = vor.u32 1.1754944e-38, %v3352_v5  ;;  %vm3351_vm3 = vcmp.eq.f32.partialorder %v3350_v46, 8.507059e+37  ;;  %vm2790_vm7 = vweird.f32 %v7593_v48 }
 0x371   :  { %v2596_v54 = vsel %vm879_vm4, %v2536_v10, 0.0  ;;  %v4688_v50 = vpop.eup %4687  ;;  %4210 = vmatmul.msk.f32.gmra.mxu3 %vm879_vm4, %v3749_v9  ;;  %v2418_v31 = vsel %vm879_vm4, %v7615_v27, 0.0 }
 0x372   :  { %2404 = vadd.xlane.f32.xlu1 %v2403_v55  ;;  %2597 = vadd.xlane.f32.xlu2 %v2596_v54  ;;  %v3240_v26 = vadd.f32 1.0, %v4688_v50  ;;  %v4690_v11 = vpop.eup %4689  ;;  %v3330_v19 = vadd.f32 %v4686_v61, %v3329_v7 }
 0x373   :  { %v3342_v35 = vmul.f32 %v4690_v11, %v7585_v41  ;;  %vm3347_vm15 = vweird.f32 %v4690_v11 }
 0x374   :  { %4693 = vrcp.f32 %v3240_v26  ;;  %v3334_v2 = vsel %vm3333_vm5, %v4686_v61, %v3330_v19  ;;  %vm3348_vm2 = vmor %vm3346_vm0, %vm3347_vm15  ;;  %v7628_v61 = vadd.f32 %v7385_v60, %v7430_v57  ;;  %v3367_v41 = vand.u32 2147483648, %v3240_v26 }
 0x375   :  { %v4692_v23 = vpop.eup %4691  ;;  %v3339_v56 = vsel %vm3336_vm6, %v3338_v59, %v3334_v2  ;;  %v3343_v6 = vsub.f32 1.0, %v3342_v35  ;;  %v3365_v9 = vand.u32 2147483647, %v3240_v26  ;;  %vm3361_vm10 = vweird.f32 %v3240_v26 }
 0x376   :  { %v2785_v20 = vmul.f32 %v4692_v23, %v7593_v48  ;;  %v3750_v36 = vmul.f32 %v3339_v56, %v7537_v28  ;;  %vm2791_vm1 = vweird.f32 %v4692_v23  ;;  %v2412_v57 = vsel %vm879_vm4, %v7628_v61, 0.0  ;;  %v2325_v56 = vpop.f32.mrf.mxu2 }
 0x377   :  { %v3344_v52 = vmul.f32 %v4690_v11, %v3343_v6  ;;  %vm2792_vm8 = vmor %vm2790_vm7, %vm2791_vm1  ;;  %v3368_v48 = vor.u32 1.1754944e-38, %v3367_v41  ;;  %vm3366_vm12 = vcmp.eq.f32.partialorder %v3365_v9, 8.507059e+37 }
 0x378   :  { %v2786_v51 = vmul.f32 %v4692_v23, %v2785_v20 }
 0x379   :  { %4211 = vmatmul.msk.f32.gmra.mxu3 %vm879_vm4, %v3750_v36  ;;  %v3345_v15 = vadd.f32 %v4690_v11, %v3344_v52 }
 0x37a   :  { %v2787_v18 = vmul.f32 0.5, %v2786_v51  ;;  %2591 = vadd.xlane.f32.xlu1 %v2590_v3  ;;  %v4694_v0 = vpop.eup %4693  ;;  %2419 = vadd.xlane.f32.xlu2 %v2418_v31 }
 0x37b   :  { %v3357_v12 = vmul.f32 %v4694_v0, %v3240_v26  ;;  %v3349_v44 = vsel %vm3348_vm2, %v4690_v11, %v3345_v15  ;;  %vm3362_vm9 = vweird.f32 %v4694_v0 }
 0x37c   :  { %v2788_v28 = vsub.f32 1.5, %v2787_v18  ;;  %v3354_v63 = vsel %vm3351_vm3, %v3353_v62, %v3349_v44  ;;  %vm3363_vm11 = vmor %vm3361_vm10, %vm3362_vm9 }
 0x37d   :  { %v3358_v37 = vsub.f32 1.0, %v3357_v12  ;;  %v3751_v24 = vmul.f32 %v3354_v63, %v7552_v22 }
 0x37e   :  { %v2789_v16 = vmul.f32 %v4692_v23, %v2788_v28  ;;  %v7642_v3 = vpop.f32.mrf.mxu2 }
 0x37f   :  { %v3359_v10 = vmul.f32 %v4694_v0, %v3358_v37 }
 0x380   :  { %v2793_v25 = vsel %vm2792_vm8, %v4692_v23, %v2789_v16 }
 0x381   :  { %v3041_v47 = vmul.f32 %v2793_v25, %v7282_v58  ;;  %4212 = vmatmul.msk.f32.gmra.mxu3 %vm879_vm4, %v3751_v24  ;;  %v3360_v55 = vadd.f32 %v4694_v0, %v3359_v10  ;;  %v7657_v10 = vadd.f32 %v7385_v60, %v2325_v56 }
 0x382   :  { %2413 = vadd.xlane.f32.xlu1 %v2412_v57 }
 0x383   :  { %v3077_v54 = vmul.f32 %v7356_v49, %v3041_v47  ;;  %v3364_v22 = vsel %vm3363_vm11, %v4694_v0, %v3360_v55 }
 0x384   :  { %v3369_v29 = vsel %vm3366_vm12, %v3368_v48, %v3364_v22 }
 0x385   :  { %v3113_v50 = vadd.f32 %v7363_v21, %v3077_v54  ;;  %v3752_v7 = vmul.f32 %v3369_v29, %v7572_v17 }
 0x386   :  { %v2331_v12 = vpop.f32.mrf.mxu2 }
 0x387   :  { %v4182_v58 = vmul.f32 -1.442695, %v3113_v50 }
 0x389   :  { %4695 = vpow2.f32 %v4182_v58  ;;  %4213 = vmatmul.msk.f32.gmra.mxu3 %vm879_vm4, %v3752_v7 }
 0x38e   :  { %v2334_v7 = vpop.f32.mrf.mxu2 }
 0x38f   :  { %v4696_v33 = vpop.eup %4695 }
 0x390   :  { %v3241_v42 = vadd.f32 1.0, %v4696_v33  ;;  %v7672_v33 = vadd.f32 %v7385_v60, %v2331_v12 }
 0x392   :  { %4697 = vrcp.f32 %v3241_v42  ;;  %v3382_v23 = vand.u32 2147483648, %v3241_v42  ;;  %v3380_v32 = vand.u32 2147483647, %v3241_v42  ;;  %vm3376_vm14 = vweird.f32 %v3241_v42 }
 0x394   :  { %v3383_v20 = vor.u32 1.1754944e-38, %v3382_v23  ;;  %vm3381_vm6 = vcmp.eq.f32.partialorder %v3380_v32, 8.507059e+37 }
 0x398   :  { %v4698_v11 = vpop.eup %4697 }
 0x399   :  { %v3372_v26 = vmul.f32 %v4698_v11, %v3241_v42  ;;  %vm3377_vm13 = vweird.f32 %v4698_v11 }
 0x39a   :  { %vm3378_vm5 = vmor %vm3376_vm14, %vm3377_vm13 }
 0x39b   :  { %v3373_v19 = vsub.f32 1.0, %v3372_v26 }
 0x39d   :  { %v3374_v59 = vmul.f32 %v4698_v11, %v3373_v19 }
 0x39f   :  { %v3375_v35 = vadd.f32 %v4698_v11, %v3374_v59  ;;  %v2427_v59 = vsel %vm879_vm4, %v7672_v33, 0.0 }
 0x3a1   :  { %v3379_v2 = vsel %vm3378_vm5, %v4698_v11, %v3375_v35 }
 0x3a2   :  { %v3384_v17 = vsel %vm3381_vm6, %v3383_v20, %v3379_v2  ;;  %v7694_v20 = vadd.f32 %v7385_v60, %v2334_v7  ;;  %v7696_v2 = vpop.f32.mrf.mxu2 }
 0x3a3   :  { %v3753_v6 = vmul.f32 %v3384_v17, %v3113_v50 }
 0x3a5   :  { %4214 = vmatmul.msk.f32.gmra.mxu3 %vm879_vm4, %v3753_v6 }
 0x3a7   :  { %v2580_v51 = vpop.xlane.xlu2 %2579 }
 0x3a8   :  { %v2658_v36 = vmul.f32 %v2580_v51, %v7152_v43 }
 0x3aa   :  { %v2690_v5 = vadd.f32 1e-05, %v2658_v36  ;;  %v2340_v12 = vpop.f32.mrf.mxu2 }
 0x3ac   :  { %4699 = vrsqrt.f32 %v2690_v5  ;;  %vm2800_vm0 = vweird.f32 %v2690_v5 }
 0x3af   :  { %v2586_v52 = vpop.xlane.xlu0 %2585  ;;  %v2402_v46 = vpop.xlane.xlu2 %2401 }
 0x3b0   :  { %v2473_v18 = vmul.f32 %v7152_v43, %v2402_v46  ;;  %v2660_v37 = vmul.f32 %v2586_v52, %v7152_v43 }
 0x3b2   :  { %v4700_v31 = vpop.eup %4699  ;;  %v7646_v15 = vsub.f32 %v7389_v34, %v2473_v18  ;;  %v7659_v47 = vadd.f32 1e-05, %v2660_v37 }
 0x3b3   :  { %v2795_v0 = vmul.f32 %v4700_v31, %v2690_v5  ;;  %vm2801_vm15 = vweird.f32 %v4700_v31  ;;  %v2430_v5 = vsel %vm879_vm4, %v7694_v20, 0.0 }
 0x3b4   :  { %v2537_v62 = vmul.f32 %v7646_v15, %v7646_v15  ;;  %vm2802_vm1 = vmor %vm2800_vm0, %vm2801_vm15  ;;  %4701 = vrsqrt.f32 %v7659_v47  ;;  %vm2820_vm7 = vweird.f32 %v7659_v47 }
 0x3b5   :  { %v2796_v28 = vmul.f32 %v4700_v31, %v2795_v0 }
 0x3b6   :  { %v2599_v63 = vsel %vm879_vm4, %v2537_v62, 0.0 }
 0x3b7   :  { %v2797_v44 = vmul.f32 0.5, %v2796_v28  ;;  %v2408_v16 = vpop.xlane.xlu0 %2407  ;;  %2600 = vadd.xlane.f32.xlu1 %v2599_v63  ;;  %v2589_v41 = vpop.xlane.xlu2 %2588 }
 0x3b8   :  { %v2475_v24 = vmul.f32 %v7152_v43, %v2408_v16  ;;  %v2661_v22 = vmul.f32 %v2589_v41, %v7152_v43  ;;  %v7717_v41 = vadd.f32 %v7385_v60, %v2340_v12 }
 0x3b9   :  { %v2798_v25 = vsub.f32 1.5, %v2797_v44 }
 0x3ba   :  { %v7654_v34 = vsub.f32 %v7424_v39, %v2475_v24  ;;  %v2421_v39 = vsel %vm879_vm4, %v7657_v10, 0.0  ;;  %v7680_v11 = vadd.f32 1e-05, %v2661_v22  ;;  %v7685_v23 = vpop.eup %4701 }
 0x3bb   :  { %v2799_v9 = vmul.f32 %v4700_v31, %v2798_v25  ;;  %vm2821_vm2 = vweird.f32 %v7685_v23 }
 0x3bc   :  { %v2539_v57 = vmul.f32 %v7654_v34, %v7654_v34  ;;  %vm7728_vm8 = vmor %vm2820_vm7, %vm2821_vm2  ;;  %vm2830_vm13 = vweird.f32 %v7680_v11 }
 0x3bd   :  { %v2803_v55 = vsel %vm2802_vm1, %v4700_v31, %v2799_v9 }
 0x3be   :  { %v3042_v48 = vmul.f32 %v2803_v55, %v7336_v40  ;;  %v2605_v54 = vsel %vm879_vm4, %v2539_v57, 0.0 }
 0x3bf   :  { %2606 = vadd.xlane.f32.xlu2 %v2605_v54  ;;  %2422 = vadd.xlane.f32.xlu1 %v2421_v39  ;;  %v2411_v29 = vpop.xlane.xlu2 %2410 }
 0x3c0   :  { %v3078_v50 = vmul.f32 %v7356_v49, %v3042_v48  ;;  %v2476_v58 = vmul.f32 %v7152_v43, %v2411_v29 }
 0x3c2   :  { %v7675_v40 = vadd.f32 %v7363_v21, %v3078_v50  ;;  %v7678_v42 = vsub.f32 %v7473_v1, %v2476_v58  ;;  %v2815_v1 = vmul.f32 %v7685_v23, %v7659_v47 }
 0x3c4   :  { %v4183_v26 = vmul.f32 -1.442695, %v7675_v40  ;;  %v2540_v19 = vmul.f32 %v7678_v42, %v7678_v42  ;;  %v2816_v56 = vmul.f32 %v7685_v23, %v2815_v1 }
 0x3c6   :  { %4703 = vpow2.f32 %v4183_v26  ;;  %v2608_v35 = vsel %vm879_vm4, %v2540_v19, 0.0  ;;  %v2817_v46 = vmul.f32 0.5, %v2816_v56  ;;  %v2436_v26 = vsel %vm879_vm4, %v7717_v41, 0.0 }
 0x3c7   :  { %v2595_v32 = vpop.xlane.xlu0 %2594  ;;  %2428 = vadd.xlane.f32.xlu2 %v2427_v59  ;;  %4705 = vrsqrt.f32 %v7680_v11  ;;  %2609 = vadd.xlane.f32.xlu1 %v2608_v35 }
 0x3c8   :  { %v2663_v31 = vmul.f32 %v2595_v32, %v7152_v43  ;;  %v2818_v44 = vsub.f32 1.5, %v2817_v46 }
 0x3ca   :  { %v7713_v63 = vadd.f32 1e-05, %v2663_v31  ;;  %v2819_v9 = vmul.f32 %v7685_v23, %v2818_v44 }
 0x3cc   :  { %v4704_v17 = vpop.eup %4703  ;;  %v2823_v7 = vsel %vm7728_vm8, %v7685_v23, %v2819_v9  ;;  %vm2850_vm1 = vweird.f32 %v7713_v63 }
 0x3cd   :  { %v3242_v6 = vadd.f32 1.0, %v4704_v17  ;;  %v7699_v51 = vpop.eup %4705  ;;  %v3044_v17 = vmul.f32 %v2823_v7, %v7392_v13 }
 0x3ce   :  { %v2825_v18 = vmul.f32 %v7699_v51, %v7680_v11  ;;  %vm2831_vm12 = vweird.f32 %v7699_v51 }
 0x3cf   :  { %v2417_v36 = vpop.xlane.xlu0 %2416  ;;  %4707 = vrcp.f32 %v3242_v6  ;;  %2431 = vadd.xlane.f32.xlu1 %v2430_v5  ;;  %v3397_v55 = vand.u32 2147483648, %v3242_v6  ;;  %v3395_v54 = vand.u32 2147483647, %v3242_v6  ;;  %vm3391_vm9 = vweird.f32 %v3242_v6  ;;  %vm2832_vm14 = vmor %vm2830_vm13, %vm2831_vm12 }
 0x3d0   :  { %v2478_v52 = vmul.f32 %v7152_v43, %v2417_v36  ;;  %v2826_v16 = vmul.f32 %v7699_v51, %v2825_v18  ;;  %4709 = vrsqrt.f32 %v7713_v63  ;;  %v3080_v13 = vmul.f32 %v7356_v49, %v3044_v17 }
 0x3d1   :  { %v3398_v19 = vor.u32 1.1754944e-38, %v3397_v55  ;;  %vm3396_vm11 = vcmp.eq.f32.partialorder %v3395_v54, 8.507059e+37 }
 0x3d2   :  { %v7708_v0 = vsub.f32 %v7490_v45, %v2478_v52  ;;  %v7722_v45 = vld [vmem:[%s8343_s11] ss:$0 sm:$0xff]  ;;  %v2827_v57 = vmul.f32 0.5, %v2826_v16  ;;  %v7759_v11 = vadd.f32 %v7363_v21, %v3080_v13 }
 0x3d4   :  { %v2542_v28 = vmul.f32 %v7708_v0, %v7708_v0  ;;  %v2828_v47 = vsub.f32 1.5, %v2827_v57 }
 0x3d5   :  { %v4708_v62 = vpop.eup %4707 }
 0x3d6   :  { %v2614_v37 = vsel %vm879_vm4, %v2542_v28, 0.0  ;;  %v3387_v24 = vmul.f32 %v4708_v62, %v3242_v6  ;;  %vm3392_vm3 = vweird.f32 %v4708_v62  ;;  %v7739_v1 = vpop.eup %4709  ;;  %v2829_v6 = vmul.f32 %v7699_v51, %v2828_v47 }
 0x3d7   :  { %2615 = vadd.xlane.f32.xlu2 %v2614_v37  ;;  %vm3393_vm10 = vmor %vm3391_vm9, %vm3392_vm3  ;;  %v2845_v36 = vmul.f32 %v7739_v1, %v7713_v63  ;;  %vm2851_vm0 = vweird.f32 %v7739_v1 }
 0x3d8   :  { %v3388_v25 = vsub.f32 1.0, %v3387_v24  ;;  %vm7811_vm2 = vmor %vm2850_vm1, %vm2851_vm0 }
 0x3d9   :  { %v2846_v28 = vmul.f32 %v7739_v1, %v2845_v36 }
 0x3da   :  { %v3389_v48 = vmul.f32 %v4708_v62, %v3388_v25  ;;  %v3899_v39 = vpop.f32.mrf.mxu3 }
 0x3db   :  { %v3900_v29 = vadd.f32 %v7722_v45, %v3899_v39  ;;  %v2847_v24 = vmul.f32 0.5, %v2846_v28 }
 0x3dc   :  { %v3390_v50 = vadd.f32 %v4708_v62, %v3389_v48 }
 0x3dd   :  { %v2583_v58 = vpop.xlane.xlu1 %2582  ;;  %3995 = vst [vmem:[#allocation5] sm:$0xff] %v3900_v29  ;;  %v2848_v29 = vsub.f32 1.5, %v2847_v24  ;;  %v7830_v24 = vld [vmem:[%s8339_s7] ss:$0 sm:$0xff] }
 0x3de   :  { %v2659_v59 = vmul.f32 %v2583_v58, %v7152_v43  ;;  %v3394_v32 = vsel %vm3393_vm10, %v4708_v62, %v3390_v50  ;;  %v7780_v58 = vadd.f32 %v7385_v60, %v7642_v3 }
 0x3df   :  { %2437 = vadd.xlane.f32.xlu2 %v2436_v26  ;;  %v3399_v35 = vsel %vm3396_vm11, %v3398_v19, %v3394_v32  ;;  %v7792_v32 = vld [vmem:[%s8341_s9] ss:$0 sm:$0xff]  ;;  %v2849_v3 = vmul.f32 %v7739_v1, %v2848_v29 }
 0x3e0   :  { %v2691_v56 = vadd.f32 1e-05, %v2659_v59  ;;  %v3754_v23 = vmul.f32 %v3399_v35, %v7675_v40  ;;  %v2833_v40 = vsel %vm2832_vm14, %v7699_v51, %v2829_v6  ;;  %v2424_v6 = vsel %vm879_vm4, %v7780_v58, 0.0 }
 0x3e1   :  { %v3045_v49 = vmul.f32 %v2833_v40, %v7433_v8  ;;  %v7772_v8 = vld [vmem:[%s8340_s8] ss:$0 sm:$0xff]  ;;  %v2343_v40 = vpop.f32.mrf.mxu2 }
 0x3e2   :  { %4711 = vrsqrt.f32 %v2691_v56  ;;  %4215 = vmatmul.msk.f32.gmra.mxu3 %vm879_vm4, %v3754_v23  ;;  %v3902_v5 = vpop.f32.mrf.mxu3  ;;  %vm2810_vm6 = vweird.f32 %v2691_v56 }
 0x3e3   :  { %v3903_v52 = vadd.f32 %v7722_v45, %v3902_v5  ;;  %v3081_v48 = vmul.f32 %v7772_v8, %v3045_v49 }
 0x3e5   :  { %v2405_v46 = vpop.xlane.xlu1 %2404  ;;  %3996 = vst [vmem:[#allocation5 + $0x8] sm:$0xff] %v3903_v52  ;;  %v2598_v31 = vpop.xlane.xlu2 %2597  ;;  %v7795_v35 = vadd.f32 %v7792_v32, %v3081_v48 }
 0x3e6   :  { %v2474_v18 = vmul.f32 %v7152_v43, %v2405_v46  ;;  %v2664_v62 = vmul.f32 %v2598_v31, %v7152_v43 }
 0x3e7   :  { %v4186_v13 = vmul.f32 -1.442695, %v7795_v35 }
 0x3e8   :  { %v4712_v12 = vpop.eup %4711  ;;  %v7756_v44 = vsub.f32 %v7581_v4, %v2474_v18  ;;  %v7762_v37 = vadd.f32 1e-05, %v2664_v62  ;;  %v4185_v4 = vmul.f32 -1.442695, %v7759_v11  ;;  %v2853_v62 = vsel %vm7811_vm2, %v7739_v1, %v2849_v3 }
 0x3e9   :  { %v2805_v16 = vmul.f32 %v4712_v12, %v2691_v56  ;;  %vm2811_vm5 = vweird.f32 %v4712_v12 }
 0x3ea   :  { %v2538_v51 = vmul.f32 %v7756_v44, %v7756_v44  ;;  %4713 = vrsqrt.f32 %v7762_v37  ;;  %vm2812_vm15 = vmor %vm2810_vm6, %vm2811_vm5  ;;  %vm2860_vm7 = vweird.f32 %v7762_v37 }
 0x3eb   :  { %v2806_v25 = vmul.f32 %v4712_v12, %v2805_v16  ;;  %4715 = vpow2.f32 %v4185_v4  ;;  %v3047_v4 = vmul.f32 %v2853_v62, %v7499_v53 }
 0x3ec   :  { %v2602_v9 = vsel %vm879_vm4, %v2538_v51, 0.0  ;;  %v3905_v55 = vpop.f32.mrf.mxu3 }
 0x3ed   :  { %v2807_v57 = vmul.f32 0.5, %v2806_v25  ;;  %2603 = vadd.xlane.f32.xlu0 %v2602_v9  ;;  %v2592_v21 = vpop.xlane.xlu1 %2591  ;;  %v3906_v54 = vadd.f32 %v7722_v45, %v3905_v55  ;;  %v2420_v22 = vpop.xlane.xlu2 %2419  ;;  %v7833_v25 = vadd.f32 %v7830_v24, %v2343_v40  ;;  %v3083_v29 = vmul.f32 %v7772_v8, %v3047_v4 }
 0x3ee   :  { %v2662_v39 = vmul.f32 %v2592_v21, %v7152_v43  ;;  %v2479_v7 = vmul.f32 %v7152_v43, %v2420_v22 }
 0x3ef   :  { %v2808_v50 = vsub.f32 1.5, %v2807_v57  ;;  %3997 = vst [vmem:[#allocation5 + $0x10] sm:$0xff] %v3906_v54  ;;  %v2439_v53 = vsel %vm879_vm4, %v7833_v25, 0.0 }
 0x3f0   :  { %v7782_v26 = vadd.f32 1e-05, %v2662_v39  ;;  %v7784_v19 = vpop.eup %4713  ;;  %v7787_v59 = vsub.f32 %v7615_v27, %v2479_v7 }
 0x3f1   :  { %v2809_v47 = vmul.f32 %v4712_v12, %v2808_v50  ;;  %v2855_v60 = vmul.f32 %v7784_v19, %v7762_v37  ;;  %v4716_v46 = vpop.eup %4715  ;;  %vm2861_vm3 = vweird.f32 %v7784_v19  ;;  %v7854_v37 = vadd.f32 %v7830_v24, %v7696_v2 }
 0x3f2   :  { %4717 = vrsqrt.f32 %v7782_v26  ;;  %v2543_v17 = vmul.f32 %v7787_v59, %v7787_v59  ;;  %v7836_v1 = vadd.f32 1.0, %v4716_v46  ;;  %vm2862_vm8 = vmor %vm2860_vm7, %vm2861_vm3  ;;  %vm2840_vm10 = vweird.f32 %v7782_v26 }
 0x3f3   :  { %v2813_v27 = vsel %vm2812_vm15, %v4712_v12, %v2809_v47  ;;  %v2856_v23 = vmul.f32 %v7784_v19, %v2855_v60  ;;  %4719 = vpow2.f32 %v4186_v13 }
 0x3f4   :  { %v3043_v56 = vmul.f32 %v2813_v27, %v7563_v30  ;;  %v3908_v36 = vpop.f32.mrf.mxu3  ;;  %v2617_v52 = vsel %vm879_vm4, %v2543_v17, 0.0  ;;  %v7859_v17 = vadd.f32 %v7792_v32, %v3083_v29  ;;  %vm3421_vm15 = vweird.f32 %v7836_v1 }
 0x3f5   :  { %2425 = vadd.xlane.f32.xlu0 %v2424_v6  ;;  %v2414_v5 = vpop.xlane.xlu1 %2413  ;;  %v2857_v30 = vmul.f32 0.5, %v2856_v23  ;;  %v3909_v31 = vadd.f32 %v7722_v45, %v3908_v36  ;;  %2618 = vadd.xlane.f32.xlu1 %v2617_v52  ;;  %v2433_v36 = vsel %vm879_vm4, %v7854_v37, 0.0 }
 0x3f6   :  { %v2477_v28 = vmul.f32 %v7152_v43, %v2414_v5  ;;  %v3079_v63 = vmul.f32 %v7772_v8, %v3043_v56  ;;  %v4188_v52 = vmul.f32 -1.442695, %v7859_v17 }
 0x3f7   :  { %v2858_v49 = vsub.f32 1.5, %v2857_v30  ;;  %3998 = vst [vmem:[#allocation5 + $0x18] sm:$0xff] %v3909_v31 }
 0x3f8   :  { %v4718_v12 = vpop.eup %4717  ;;  %v7822_v16 = vsub.f32 %v7628_v61, %v2477_v28  ;;  %v7825_v51 = vadd.f32 %v7792_v32, %v3079_v63 }
 0x3f9   :  { %v2835_v9 = vmul.f32 %v4718_v12, %v7782_v26  ;;  %v2859_v55 = vmul.f32 %v7784_v19, %v2858_v49  ;;  %vm2841_vm9 = vweird.f32 %v4718_v12  ;;  %v4720_v47 = vpop.eup %4719 }
 0x3fa   :  { %v2541_v61 = vmul.f32 %v7822_v16, %v7822_v16  ;;  %v4184_v57 = vmul.f32 -1.442695, %v7825_v51  ;;  %vm2842_vm11 = vmor %vm2840_vm10, %vm2841_vm9  ;;  %v7861_v23 = vadd.f32 1.0, %v4720_v47 }
 0x3fb   :  { %v2836_v21 = vmul.f32 %v4718_v12, %v2835_v9  ;;  %v2863_v50 = vsel %vm2862_vm8, %v7784_v19, %v2859_v55 }
 0x3fc   :  { %v2611_v48 = vsel %vm879_vm4, %v2541_v61, 0.0  ;;  %4721 = vpow2.f32 %v4184_v57  ;;  %v3911_v39 = vpop.f32.mrf.mxu3  ;;  %v3048_v27 = vmul.f32 %v2863_v50, %v7591_v14  ;;  %vm3436_vm3 = vweird.f32 %v7861_v23 }
 0x3fd   :  { %v2837_v54 = vmul.f32 0.5, %v2836_v21  ;;  %2612 = vadd.xlane.f32.xlu0 %v2611_v48  ;;  %v3912_v22 = vadd.f32 %v7722_v45, %v3911_v39  ;;  %2440 = vadd.xlane.f32.xlu1 %v2439_v53  ;;  %4723 = vrcp.f32 %v7836_v1 }
 0x3fe   :  { %v3084_v13 = vmul.f32 %v7772_v8, %v3048_v27 }
 0x3ff   :  { %v2838_v7 = vsub.f32 1.5, %v2837_v54  ;;  %3999 = vst [vmem:[#allocation5 + $0x20] sm:$0xff] %v3912_v22 }
 0x400   :  { %v7880_v18 = vadd.f32 %v7792_v32, %v3084_v13 }
 0x401   :  { %v2839_v60 = vmul.f32 %v4718_v12, %v2838_v7 }
 0x402   :  { %v4722_v3 = vpop.eup %4721  ;;  %v4189_v9 = vmul.f32 -1.442695, %v7880_v18 }
 0x403   :  { %v2843_v56 = vsel %vm2842_vm11, %v4718_v12, %v2839_v60  ;;  %v3243_v19 = vadd.f32 1.0, %v4722_v3  ;;  %v7863_v6 = vpop.eup %4723  ;;  %v3427_v3 = vand.u32 2147483648, %v7836_v1 }
 0x404   :  { %v3046_v2 = vmul.f32 %v2843_v56, %v7602_v38  ;;  %v3914_v5 = vpop.f32.mrf.mxu3  ;;  %v3417_v46 = vmul.f32 %v7863_v6, %v7836_v1  ;;  %vm3422_vm5 = vweird.f32 %v7863_v6  ;;  %v3425_v56 = vand.u32 2147483647, %v7836_v1 }
 0x405   :  { %2434 = vadd.xlane.f32.xlu0 %v2433_v36  ;;  %4725 = vrcp.f32 %v3243_v19  ;;  %v3915_v14 = vadd.f32 %v7722_v45, %v3914_v5  ;;  %v3412_v4 = vand.u32 2147483648, %v3243_v19  ;;  %v3410_v21 = vand.u32 2147483647, %v3243_v19  ;;  %vm3423_vm0 = vmor %vm3421_vm15, %vm3422_vm5 }
 0x406   :  { %v3082_v26 = vmul.f32 %v7772_v8, %v3046_v2  ;;  %4727 = vrcp.f32 %v7861_v23  ;;  %v3418_v31 = vsub.f32 1.0, %v3417_v46  ;;  %vm3406_vm13 = vweird.f32 %v3243_v19 }
 0x407   :  { %4000 = vst [vmem:[#allocation5 + $0x28] sm:$0xff] %v3915_v14  ;;  %4729 = vpow2.f32 %v4188_v52  ;;  %v3413_v53 = vor.u32 1.1754944e-38, %v3412_v4  ;;  %vm3411_vm6 = vcmp.eq.f32.partialorder %v3410_v21, 8.507059e+37  ;;  %v3428_v5 = vor.u32 1.1754944e-38, %v3427_v3 }
 0x408   :  { %v7876_v38 = vadd.f32 %v7792_v32, %v3082_v26  ;;  %v3419_v61 = vmul.f32 %v7863_v6, %v3418_v31  ;;  %vm3426_vm1 = vcmp.eq.f32.partialorder %v3425_v56, 8.507059e+37  ;;  %v3442_v1 = vand.u32 2147483648, %v7861_v23  ;;  %v2346_v56 = vpop.f32.mrf.mxu2 }
 0x40a   :  { %v4187_v40 = vmul.f32 -1.442695, %v7876_v38  ;;  %v3420_v7 = vadd.f32 %v7863_v6, %v3419_v61 }
 0x40b   :  { %v4726_v30 = vpop.eup %4725 }
 0x40c   :  { %v3402_v28 = vmul.f32 %v4726_v30, %v3243_v19  ;;  %4731 = vpow2.f32 %v4187_v40  ;;  %v4728_v63 = vpop.eup %4727  ;;  %v3917_v62 = vpop.f32.mrf.mxu3  ;;  %vm3407_vm12 = vweird.f32 %v4726_v30  ;;  %v3424_v2 = vsel %vm3423_vm0, %v7863_v6, %v3420_v7 }
 0x40d   :  { %v3918_v12 = vadd.f32 %v7722_v45, %v3917_v62  ;;  %v4730_v57 = vpop.eup %4729  ;;  %v3432_v48 = vmul.f32 %v4728_v63, %v7861_v23  ;;  %4733 = vpow2.f32 %v4189_v9  ;;  %vm3408_vm14 = vmor %vm3406_vm13, %vm3407_vm12  ;;  %v3429_v26 = vsel %vm3426_vm1, %v3428_v5, %v3424_v2 }
 0x40e   :  { %v3403_v49 = vsub.f32 1.0, %v3402_v28  ;;  %v7887_v29 = vadd.f32 1.0, %v4730_v57  ;;  %vm3437_vm2 = vweird.f32 %v4728_v63  ;;  %v3756_v40 = vmul.f32 %v3429_v26, %v7759_v11 }
 0x40f   :  { %4001 = vst [vmem:[#allocation5 + $0x30] sm:$0xff] %v3918_v12  ;;  %v3433_v47 = vsub.f32 1.0, %v3432_v48  ;;  %vm3438_vm7 = vmor %vm3436_vm3, %vm3437_vm2  ;;  %v3443_v12 = vor.u32 1.1754944e-38, %v3442_v1 }
 0x410   :  { %v3404_v55 = vmul.f32 %v4726_v30, %v3403_v49 }
 0x411   :  { %v3434_v36 = vmul.f32 %v4728_v63, %v3433_v47  ;;  %v3472_v47 = vand.u32 2147483648, %v7887_v29 }
 0x412   :  { %v4732_v54 = vpop.eup %4731  ;;  %v3405_v39 = vadd.f32 %v4726_v30, %v3404_v55 }
 0x413   :  { %v3246_v22 = vadd.f32 1.0, %v4732_v54  ;;  %v4734_v19 = vpop.eup %4733 }
 0x414   :  { %v3409_v50 = vsel %vm3408_vm14, %v4726_v30, %v3405_v39  ;;  %v7897_v52 = vadd.f32 1.0, %v4734_v19  ;;  %v3440_v30 = vand.u32 2147483647, %v7861_v23  ;;  %vm3466_vm14 = vweird.f32 %v7887_v29 }
 0x415   :  { %v3414_v60 = vsel %vm3411_vm6, %v3413_v53, %v3409_v50  ;;  %4735 = vrcp.f32 %v3246_v22  ;;  %v3457_v61 = vand.u32 2147483648, %v3246_v22  ;;  %vm3451_vm10 = vweird.f32 %v3246_v22 }
 0x416   :  { %v3755_v27 = vmul.f32 %v3414_v60, %v7825_v51  ;;  %4737 = vrcp.f32 %v7887_v29  ;;  %v3435_v51 = vadd.f32 %v4728_v63, %v3434_v36  ;;  %vm3441_vm8 = vcmp.eq.f32.partialorder %v3440_v30, 8.507059e+37 }
 0x417   :  { %4739 = vrcp.f32 %v7897_v52  ;;  %v3455_v57 = vand.u32 2147483647, %v3246_v22  ;;  %v3458_v39 = vor.u32 1.1754944e-38, %v3457_v61  ;;  %v3473_v36 = vor.u32 1.1754944e-38, %v3472_v47 }
 0x418   :  { %4216 = vmatmul.msk.f32.gmra.mxu3 %vm879_vm4, %v3755_v27  ;;  %v3439_v31 = vsel %vm3438_vm7, %v4728_v63, %v3435_v51  ;;  %v3470_v27 = vand.u32 2147483647, %v7887_v29  ;;  %vm3481_vm0 = vweird.f32 %v7897_v52 }
 0x419   :  { %v3444_v49 = vsel %vm3441_vm8, %v3443_v12, %v3439_v31  ;;  %vm3456_vm12 = vcmp.eq.f32.partialorder %v3455_v57, 8.507059e+37  ;;  %v7934_v31 = vpop.f32.mrf.mxu2 }
 0x41a   :  { %v3757_v23 = vmul.f32 %v3444_v49, %v7795_v35  ;;  %vm3471_vm6 = vcmp.eq.f32.partialorder %v3470_v27, 8.507059e+37 }
 0x41b   :  { %v4736_v14 = vpop.eup %4735 }
 0x41c   :  { %v3447_v13 = vmul.f32 %v4736_v14, %v3246_v22  ;;  %v4738_v46 = vpop.eup %4737  ;;  %vm3452_vm9 = vweird.f32 %v4736_v14 }
 0x41d   :  { %v3462_v62 = vmul.f32 %v4738_v46, %v7887_v29  ;;  %v7906_v4 = vpop.eup %4739  ;;  %vm3453_vm11 = vmor %vm3451_vm10, %vm3452_vm9  ;;  %vm3467_vm13 = vweird.f32 %v4738_v46  ;;  %v3487_v29 = vand.u32 2147483648, %v7897_v52 }
 0x41e   :  { %v3448_v6 = vsub.f32 1.0, %v3447_v13  ;;  %v3477_v48 = vmul.f32 %v7906_v4, %v7897_v52  ;;  %vm3468_vm5 = vmor %vm3466_vm14, %vm3467_vm13  ;;  %vm3482_vm15 = vweird.f32 %v7906_v4 }
 0x41f   :  { %v3463_v11 = vsub.f32 1.0, %v3462_v62  ;;  %vm7930_vm1 = vmor %vm3481_vm0, %vm3482_vm15  ;;  %v3488_v62 = vor.u32 1.1754944e-38, %v3487_v29 }
 0x420   :  { %4217 = vmatmul.msk.f32.gmra.mxu3 %vm879_vm4, %v3756_v40  ;;  %v3449_v28 = vmul.f32 %v4736_v14, %v3448_v6  ;;  %v3478_v22 = vsub.f32 1.0, %v3477_v48  ;;  %v3485_v40 = vand.u32 2147483647, %v7897_v52 }
 0x421   :  { %v3464_v21 = vmul.f32 %v4738_v46, %v3463_v11 }
 0x422   :  { %v3450_v9 = vadd.f32 %v4736_v14, %v3449_v28  ;;  %v3479_v2 = vmul.f32 %v7906_v4, %v3478_v22  ;;  %vm3486_vm2 = vcmp.eq.f32.partialorder %v3485_v40, 8.507059e+37 }
 0x423   :  { %v3465_v7 = vadd.f32 %v4738_v46, %v3464_v21 }
 0x424   :  { %v3454_v63 = vsel %vm3453_vm11, %v4736_v14, %v3450_v9 }
 0x425   :  { %v3459_v50 = vsel %vm3456_vm12, %v3458_v39, %v3454_v63  ;;  %v3469_v19 = vsel %vm3468_vm5, %v4738_v46, %v3465_v7 }
 0x426   :  { %v3758_v3 = vmul.f32 %v3459_v50, %v7876_v38  ;;  %v3474_v26 = vsel %vm3471_vm6, %v3473_v36, %v3469_v19  ;;  %v3480_v38 = vadd.f32 %v7906_v4, %v3479_v2  ;;  %v2352_v50 = vpop.f32.mrf.mxu2 }
 0x427   :  { %v3759_v46 = vmul.f32 %v3474_v26, %v7859_v17  ;;  %v7962_v47 = vadd.f32 %v7830_v24, %v2352_v50 }
 0x428   :  { %v3920_v55 = vpop.f32.mrf.mxu3  ;;  %4218 = vmatmul.msk.f32.gmra.mxu3 %vm879_vm4, %v3757_v23 }
 0x429   :  { %v3921_v54 = vadd.f32 %v7722_v45, %v3920_v55  ;;  %v2448_v36 = vsel %vm879_vm4, %v7962_v47, 0.0 }
 0x42a   :  { %v2601_v53 = vpop.xlane.xlu1 %2600 }
 0x42b   :  { %4002 = vst [vmem:[#allocation5 + $0x38] sm:$0xff] %v3921_v54  ;;  %v2665_v35 = vmul.f32 %v2601_v53, %v7152_v43 }
 0x42d   :  { %v2697_v60 = vadd.f32 1e-05, %v2665_v35 }
 0x42f   :  { %4741 = vrsqrt.f32 %v2697_v60  ;;  %vm2870_vm7 = vweird.f32 %v2697_v60 }
 0x430   :  { %4219 = vmatmul.msk.f32.gmra.mxu3 %vm879_vm4, %v3758_v3 }
 0x432   :  { %v2607_v5 = vpop.xlane.xlu2 %2606  ;;  %v2423_v14 = vpop.xlane.xlu1 %2422 }
 0x433   :  { %v2480_v51 = vmul.f32 %v7152_v43, %v2423_v14  ;;  %v2667_v9 = vmul.f32 %v2607_v5, %v7152_v43 }
 0x435   :  { %v4742_v13 = vpop.eup %4741  ;;  %v7925_v1 = vsub.f32 %v7657_v10, %v2480_v51  ;;  %v3484_v10 = vsel %vm7930_vm1, %v7906_v4, %v3480_v38  ;;  %v7949_v4 = vadd.f32 %v7830_v24, %v2346_v56  ;;  %v2699_v48 = vadd.f32 1e-05, %v2667_v9 }
 0x436   :  { %v2865_v30 = vmul.f32 %v4742_v13, %v2697_v60  ;;  %v3489_v23 = vsel %vm3486_vm2, %v3488_v62, %v3484_v10  ;;  %vm2871_vm3 = vweird.f32 %v4742_v13 }
 0x437   :  { %v2544_v28 = vmul.f32 %v7925_v1, %v7925_v1  ;;  %v3760_v63 = vmul.f32 %v3489_v23, %v7880_v18  ;;  %vm2872_vm8 = vmor %vm2870_vm7, %vm2871_vm3  ;;  %v2442_v35 = vsel %vm879_vm4, %v7949_v4, 0.0  ;;  %4743 = vrsqrt.f32 %v2699_v48 }
 0x438   :  { %4220 = vmatmul.msk.f32.gmra.mxu3 %vm879_vm4, %v3759_v46  ;;  %v2866_v17 = vmul.f32 %v4742_v13, %v2865_v30  ;;  %vm2890_vm10 = vweird.f32 %v2699_v48 }
 0x439   :  { %v2620_v52 = vsel %vm879_vm4, %v2544_v28, 0.0 }
 0x43a   :  { %v2429_v12 = vpop.xlane.xlu2 %2428  ;;  %v2867_v49 = vmul.f32 0.5, %v2866_v17  ;;  %2621 = vadd.xlane.f32.xlu0 %v2620_v52  ;;  %v2610_v11 = vpop.xlane.xlu1 %2609 }
 0x43b   :  { %v2482_v61 = vmul.f32 %v7152_v43, %v2429_v12  ;;  %v2668_v60 = vmul.f32 %v2610_v11, %v7152_v43 }
 0x43c   :  { %v2868_v57 = vsub.f32 1.5, %v2867_v49 }
 0x43d   :  { %v7946_v55 = vsub.f32 %v7672_v33, %v2482_v61  ;;  %v4744_v19 = vpop.eup %4743  ;;  %v7971_v2 = vadd.f32 1e-05, %v2668_v60 }
 0x43e   :  { %v2869_v21 = vmul.f32 %v4742_v13, %v2868_v57  ;;  %vm2891_vm9 = vweird.f32 %v4744_v19 }
 0x43f   :  { %v2546_v54 = vmul.f32 %v7946_v55, %v7946_v55  ;;  %vm2892_vm12 = vmor %vm2890_vm10, %vm2891_vm9  ;;  %vm2900_vm15 = vweird.f32 %v7971_v2 }
 0x440   :  { %4221 = vmatmul.msk.f32.gmra.mxu3 %vm879_vm4, %v3760_v63  ;;  %v2873_v39 = vsel %vm2872_vm8, %v4742_v13, %v2869_v21 }
 0x441   :  { %v2626_v53 = vsel %vm879_vm4, %v2546_v54, 0.0  ;;  %v3049_v33 = vmul.f32 %v2873_v39, %v7646_v15 }
 0x442   :  { %2627 = vadd.xlane.f32.xlu1 %v2626_v53  ;;  %v2432_v18 = vpop.xlane.xlu1 %2431  ;;  %2443 = vadd.xlane.f32.xlu0 %v2442_v35 }
 0x443   :  { %v2483_v7 = vmul.f32 %v7152_v43, %v2432_v18  ;;  %v3085_v22 = vmul.f32 %v7772_v8, %v3049_v33 }
 0x445   :  { %v7966_v3 = vsub.f32 %v7694_v20, %v2483_v7  ;;  %v3121_v15 = vadd.f32 %v7792_v32, %v3085_v22  ;;  %v2885_v20 = vmul.f32 %v4744_v19, %v2699_v48 }
 0x447   :  { %v2547_v27 = vmul.f32 %v7966_v3, %v7966_v3  ;;  %v4190_v56 = vmul.f32 -1.442695, %v3121_v15  ;;  %v2886_v51 = vmul.f32 %v4744_v19, %v2885_v20 }
 0x449   :  { %v2629_v14 = vsel %vm879_vm4, %v2547_v27, 0.0  ;;  %4745 = vpow2.f32 %v4190_v56  ;;  %v2887_v40 = vmul.f32 0.5, %v2886_v51 }
 0x44a   :  { %v2616_v5 = vpop.xlane.xlu2 %2615  ;;  %2449 = vadd.xlane.f32.xlu1 %v2448_v36  ;;  %2630 = vadd.xlane.f32.xlu0 %v2629_v14  ;;  %4747 = vrsqrt.f32 %v7971_v2 }
 0x44b   :  { %v2670_v30 = vmul.f32 %v2616_v5, %v7152_v43  ;;  %v2888_v17 = vsub.f32 1.5, %v2887_v40 }
 0x44d   :  { %v7988_v52 = vadd.f32 1e-05, %v2670_v30  ;;  %v2889_v11 = vmul.f32 %v4744_v19, %v2888_v17 }
 0x44f   :  { %v4746_v26 = vpop.eup %4745  ;;  %v2893_v21 = vsel %vm2892_vm12, %v4744_v19, %v2889_v11  ;;  %vm2920_vm8 = vweird.f32 %v7988_v52 }
 0x450   :  { %v3249_v38 = vadd.f32 1.0, %v4746_v26  ;;  %v7977_v13 = vpop.eup %4747  ;;  %v3051_v18 = vmul.f32 %v2893_v21, %v7654_v34 }
 0x451   :  { %v2895_v28 = vmul.f32 %v7977_v13, %v7971_v2  ;;  %vm2901_vm6 = vweird.f32 %v7977_v13 }
 0x452   :  { %v2438_v29 = vpop.xlane.xlu2 %2437  ;;  %4749 = vrcp.f32 %v3249_v38  ;;  %v3502_v61 = vand.u32 2147483648, %v3249_v38  ;;  %v3500_v63 = vand.u32 2147483647, %v3249_v38  ;;  %vm3496_vm13 = vweird.f32 %v3249_v38  ;;  %vm2902_vm0 = vmor %vm2900_vm15, %vm2901_vm6 }
 0x453   :  { %v2485_v46 = vmul.f32 %v7152_v43, %v2438_v29  ;;  %v2896_v49 = vmul.f32 %v7977_v13, %v2895_v28  ;;  %4751 = vrsqrt.f32 %v7988_v52  ;;  %v3087_v5 = vmul.f32 %v7772_v8, %v3051_v18 }
 0x454   :  { %v3503_v50 = vor.u32 1.1754944e-38, %v3502_v61  ;;  %vm3501_vm5 = vcmp.eq.f32.partialorder %v3500_v63, 8.507059e+37  ;;  %v8028_v61 = vadd.f32 %v7830_v24, %v7934_v31 }
 0x455   :  { %v7982_v6 = vsub.f32 %v7717_v41, %v2485_v46  ;;  %v2897_v23 = vmul.f32 0.5, %v2896_v49  ;;  %v8013_v29 = vadd.f32 %v7792_v32, %v3087_v5 }
 0x457   :  { %v2549_v10 = vmul.f32 %v7982_v6, %v7982_v6  ;;  %v2898_v33 = vsub.f32 1.5, %v2897_v23 }
 0x458   :  { %v4750_v62 = vpop.eup %4749 }
 0x459   :  { %v2635_v12 = vsel %vm879_vm4, %v2549_v10, 0.0  ;;  %v3492_v9 = vmul.f32 %v4750_v62, %v3249_v38  ;;  %vm3497_vm11 = vweird.f32 %v4750_v62  ;;  %v7994_v48 = vpop.eup %4751  ;;  %v2899_v56 = vmul.f32 %v7977_v13, %v2898_v33 }
 0x45a   :  { %2636 = vadd.xlane.f32.xlu0 %v2635_v12  ;;  %vm3498_vm14 = vmor %vm3496_vm13, %vm3497_vm11  ;;  %v2915_v19 = vmul.f32 %v7994_v48, %v7988_v52  ;;  %vm2921_vm7 = vweird.f32 %v7994_v48 }
 0x45b   :  { %v3493_v41 = vsub.f32 1.0, %v3492_v9  ;;  %v2903_v20 = vsel %vm2902_vm0, %v7977_v13, %v2899_v56  ;;  %vm2922_vm9 = vmor %vm2920_vm8, %vm2921_vm7 }
 0x45c   :  { %v2916_v26 = vmul.f32 %v7994_v48, %v2915_v19  ;;  %v3052_v40 = vmul.f32 %v2903_v20, %v7678_v42 }
 0x45d   :  { %v3494_v57 = vmul.f32 %v4750_v62, %v3493_v41 }
 0x45e   :  { %v2917_v13 = vmul.f32 0.5, %v2916_v26  ;;  %v3088_v9 = vmul.f32 %v7772_v8, %v3052_v40 }
 0x45f   :  { %v3495_v39 = vadd.f32 %v4750_v62, %v3494_v57 }
 0x460   :  { %v2604_v54 = vpop.xlane.xlu0 %2603  ;;  %v2918_v42 = vsub.f32 1.5, %v2917_v13 }
 0x461   :  { %v2666_v53 = vmul.f32 %v2604_v54, %v7152_v43  ;;  %v3499_v35 = vsel %vm3498_vm14, %v4750_v62, %v3495_v39  ;;  %v8035_v39 = vadd.f32 %v7792_v32, %v3088_v9 }
 0x462   :  { %v3504_v22 = vsel %vm3501_vm5, %v3503_v50, %v3499_v35 }
 0x463   :  { %v2698_v7 = vadd.f32 1e-05, %v2666_v53  ;;  %v3761_v60 = vmul.f32 %v3504_v22, %v3121_v15  ;;  %v2919_v53 = vmul.f32 %v7994_v48, %v2918_v42 }
 0x465   :  { %4753 = vrsqrt.f32 %v2698_v7  ;;  %v3923_v27 = vpop.f32.mrf.mxu3  ;;  %4222 = vmatmul.msk.f32.gmra.mxu3 %vm879_vm4, %v3761_v60  ;;  %vm2880_vm2 = vweird.f32 %v2698_v7  ;;  %v2923_v56 = vsel %vm2922_vm9, %v7994_v48, %v2919_v53 }
 0x466   :  { %v3924_v36 = vadd.f32 %v7722_v45, %v3923_v27 }
 0x468   :  { %4003 = vst [vmem:[#allocation5 + $0x40] sm:$0xff] %v3924_v36  ;;  %v2426_v34 = vpop.xlane.xlu0 %2425  ;;  %v2619_v14 = vpop.xlane.xlu1 %2618 }
 0x469   :  { %v2481_v15 = vmul.f32 %v7152_v43, %v2426_v34  ;;  %v2671_v51 = vmul.f32 %v2619_v14, %v7152_v43  ;;  %v3054_v14 = vmul.f32 %v2923_v56, %v7708_v0 }
 0x46b   :  { %v4754_v38 = vpop.eup %4753  ;;  %v8010_v45 = vsub.f32 %v7780_v58, %v2481_v15  ;;  %v8015_v46 = vadd.f32 1e-05, %v2671_v51  ;;  %v4192_v58 = vmul.f32 -1.442695, %v8013_v29  ;;  %v3090_v0 = vmul.f32 %v7772_v8, %v3054_v14 }
 0x46c   :  { %v2875_v2 = vmul.f32 %v4754_v38, %v2698_v7  ;;  %vm2881_vm1 = vweird.f32 %v4754_v38 }
 0x46d   :  { %v2545_v30 = vmul.f32 %v8010_v45, %v8010_v45  ;;  %4755 = vrsqrt.f32 %v8015_v46  ;;  %vm2882_vm3 = vmor %vm2880_vm2, %vm2881_vm1  ;;  %vm2930_vm11 = vweird.f32 %v8015_v46 }
 0x46e   :  { %v2876_v28 = vmul.f32 %v4754_v38, %v2875_v2  ;;  %4757 = vpow2.f32 %v4192_v58  ;;  %v8068_v58 = vadd.f32 %v7792_v32, %v3090_v0 }
 0x46f   :  { %v2623_v10 = vsel %vm879_vm4, %v2545_v30, 0.0 }
 0x470   :  { %v2877_v17 = vmul.f32 0.5, %v2876_v28  ;;  %v2613_v62 = vpop.xlane.xlu0 %2612  ;;  %2624 = vadd.xlane.f32.xlu2 %v2623_v10  ;;  %v2441_v49 = vpop.xlane.xlu1 %2440  ;;  %v4195_v42 = vmul.f32 -1.442695, %v8068_v58 }
 0x471   :  { %v2669_v12 = vmul.f32 %v2613_v62, %v7152_v43  ;;  %v2486_v41 = vmul.f32 %v7152_v43, %v2441_v49 }
 0x472   :  { %v2878_v11 = vsub.f32 1.5, %v2877_v17 }
 0x473   :  { %v2701_v23 = vadd.f32 1e-05, %v2669_v12  ;;  %v4756_v57 = vpop.eup %4755  ;;  %v8031_v21 = vsub.f32 %v7833_v25, %v2486_v41  ;;  %v2445_v25 = vsel %vm879_vm4, %v8028_v61, 0.0 }
 0x474   :  { %v2879_v63 = vmul.f32 %v4754_v38, %v2878_v11  ;;  %v2925_v54 = vmul.f32 %v4756_v57, %v8015_v46  ;;  %v4758_v7 = vpop.eup %4757  ;;  %vm2931_vm10 = vweird.f32 %v4756_v57 }
 0x475   :  { %4759 = vrsqrt.f32 %v2701_v23  ;;  %v2550_v31 = vmul.f32 %v8031_v21, %v8031_v21  ;;  %v8056_v15 = vadd.f32 1.0, %v4758_v7  ;;  %vm2932_vm12 = vmor %vm2930_vm11, %vm2931_vm10  ;;  %vm2910_vm14 = vweird.f32 %v2701_v23 }
 0x476   :  { %v2883_v24 = vsel %vm2882_vm3, %v4754_v38, %v2879_v63  ;;  %v2926_v33 = vmul.f32 %v4756_v57, %v2925_v54 }
 0x477   :  { %v3050_v50 = vmul.f32 %v2883_v24, %v7756_v44  ;;  %v2638_v18 = vsel %vm879_vm4, %v2550_v31, 0.0  ;;  %v4193_v44 = vmul.f32 -1.442695, %v8035_v39  ;;  %vm3526_vm3 = vweird.f32 %v8056_v15 }
 0x478   :  { %v2435_v35 = vpop.xlane.xlu0 %2434  ;;  %2446 = vadd.xlane.f32.xlu2 %v2445_v25  ;;  %v2927_v22 = vmul.f32 0.5, %v2926_v33  ;;  %2639 = vadd.xlane.f32.xlu1 %v2638_v18 }
 0x479   :  { %v2484_v60 = vmul.f32 %v7152_v43, %v2435_v35  ;;  %v3086_v27 = vmul.f32 %v7772_v8, %v3050_v50  ;;  %4761 = vpow2.f32 %v4193_v44 }
 0x47a   :  { %v2928_v36 = vsub.f32 1.5, %v2927_v22 }
 0x47b   :  { %v4760_v19 = vpop.eup %4759  ;;  %v8051_v52 = vsub.f32 %v7854_v37, %v2484_v60  ;;  %v8054_v5 = vadd.f32 %v7792_v32, %v3086_v27 }
 0x47c   :  { %v2905_v34 = vmul.f32 %v4760_v19, %v2701_v23  ;;  %v2929_v48 = vmul.f32 %v4756_v57, %v2928_v36  ;;  %vm2911_vm13 = vweird.f32 %v4760_v19 }
 0x47d   :  { %v2548_v20 = vmul.f32 %v8051_v52, %v8051_v52  ;;  %v4191_v26 = vmul.f32 -1.442695, %v8054_v5  ;;  %vm2912_vm5 = vmor %vm2910_vm14, %vm2911_vm13 }
 0x47e   :  { %v2906_v51 = vmul.f32 %v4760_v19, %v2905_v34  ;;  %v2933_v2 = vsel %vm2932_vm12, %v4756_v57, %v2929_v48  ;;  %v3532_v34 = vand.u32 2147483648, %v8056_v15 }
 0x47f   :  { %v2632_v37 = vsel %vm879_vm4, %v2548_v20, 0.0  ;;  %4763 = vpow2.f32 %v4191_v26  ;;  %v4762_v30 = vpop.eup %4761  ;;  %v3055_v10 = vmul.f32 %v2933_v2, %v7787_v59  ;;  %v3530_v20 = vand.u32 2147483647, %v8056_v15 }
 0x480   :  { %v2907_v38 = vmul.f32 0.5, %v2906_v51  ;;  %2633 = vadd.xlane.f32.xlu2 %v2632_v37  ;;  %4765 = vrcp.f32 %v8056_v15  ;;  %v8070_v62 = vadd.f32 1.0, %v4762_v30  ;;  %v3533_v0 = vor.u32 1.1754944e-38, %v3532_v34 }
 0x481   :  { %v3091_v11 = vmul.f32 %v7772_v8, %v3055_v10  ;;  %vm3531_vm8 = vcmp.eq.f32.partialorder %v3530_v20, 8.507059e+37 }
 0x482   :  { %v2908_v40 = vsub.f32 1.5, %v2907_v38  ;;  %v8105_v38 = vld [vmem:[%s8343_s11] ss:$0 sm:$0xff]  ;;  %v3547_v10 = vand.u32 2147483648, %v8070_v62  ;;  %vm3541_vm10 = vweird.f32 %v8070_v62 }
 0x483   :  { %v8083_v57 = vadd.f32 %v7792_v32, %v3091_v11 }
 0x484   :  { %v2909_v13 = vmul.f32 %v4760_v19, %v2908_v40 }
 0x485   :  { %v4764_v28 = vpop.eup %4763  ;;  %v4196_v24 = vmul.f32 -1.442695, %v8083_v57 }
 0x486   :  { %v2913_v46 = vsel %vm2912_vm5, %v4760_v19, %v2909_v13  ;;  %v3250_v17 = vadd.f32 1.0, %v4764_v28  ;;  %v4766_v12 = vpop.eup %4765 }
 0x487   :  { %v3053_v49 = vmul.f32 %v2913_v46, %v7822_v16  ;;  %v3522_v59 = vmul.f32 %v4766_v12, %v8056_v15  ;;  %vm3527_vm1 = vweird.f32 %v4766_v12 }
 0x488   :  { %4767 = vrcp.f32 %v3250_v17  ;;  %v3517_v31 = vand.u32 2147483648, %v3250_v17  ;;  %v3515_v35 = vand.u32 2147483647, %v3250_v17  ;;  %vm3511_vm15 = vweird.f32 %v3250_v17  ;;  %vm3528_vm7 = vmor %vm3526_vm3, %vm3527_vm1 }
 0x489   :  { %v3089_v9 = vmul.f32 %v7772_v8, %v3053_v49  ;;  %4769 = vrcp.f32 %v8070_v62  ;;  %v3523_v63 = vsub.f32 1.0, %v3522_v59 }
 0x48a   :  { %4771 = vpow2.f32 %v4195_v42  ;;  %v3518_v22 = vor.u32 1.1754944e-38, %v3517_v31  ;;  %vm3516_vm2 = vcmp.eq.f32.partialorder %v3515_v35, 8.507059e+37 }
 0x48b   :  { %v8079_v41 = vadd.f32 %v7792_v32, %v3089_v9  ;;  %v3524_v50 = vmul.f32 %v4766_v12, %v3523_v63 }
 0x48d   :  { %v4194_v23 = vmul.f32 -1.442695, %v8079_v41  ;;  %v3525_v56 = vadd.f32 %v4766_v12, %v3524_v50 }
 0x48e   :  { %v4768_v16 = vpop.eup %4767 }
 0x48f   :  { %v3507_v54 = vmul.f32 %v4768_v16, %v3250_v17  ;;  %4773 = vpow2.f32 %v4194_v23  ;;  %v8085_v53 = vpop.eup %4769  ;;  %vm3512_vm6 = vweird.f32 %v4768_v16  ;;  %v3529_v51 = vsel %vm3528_vm7, %v4766_v12, %v3525_v56 }
 0x490   :  { %v4772_v33 = vpop.eup %4771  ;;  %v3537_v18 = vmul.f32 %v8085_v53, %v8070_v62  ;;  %4775 = vpow2.f32 %v4196_v24  ;;  %vm3513_vm0 = vmor %vm3511_vm15, %vm3512_vm6  ;;  %v3534_v2 = vsel %vm3531_vm8, %v3533_v0, %v3529_v51  ;;  %vm3542_vm9 = vweird.f32 %v8085_v53 }
 0x491   :  { %v3508_v8 = vsub.f32 1.0, %v3507_v54  ;;  %v8092_v27 = vadd.f32 1.0, %v4772_v33  ;;  %v3763_v46 = vmul.f32 %v3534_v2, %v8013_v29  ;;  %v3545_v17 = vand.u32 2147483647, %v8070_v62  ;;  %vm3543_vm11 = vmor %vm3541_vm10, %vm3542_vm9 }
 0x492   :  { %v3538_v19 = vsub.f32 1.0, %v3537_v18  ;;  %v3548_v23 = vor.u32 1.1754944e-38, %v3547_v10 }
 0x493   :  { %v3509_v25 = vmul.f32 %v4768_v16, %v3508_v8  ;;  %vm3546_vm12 = vcmp.eq.f32.partialorder %v3545_v17, 8.507059e+37 }
 0x494   :  { %v3539_v37 = vmul.f32 %v8085_v53, %v3538_v19  ;;  %v3575_v19 = vand.u32 2147483647, %v8092_v27 }
 0x495   :  { %v4774_v32 = vpop.eup %4773  ;;  %v3510_v7 = vadd.f32 %v4768_v16, %v3509_v25 }
 0x496   :  { %v8090_v60 = vadd.f32 1.0, %v4774_v32  ;;  %v4776_v26 = vpop.eup %4775  ;;  %v3540_v30 = vadd.f32 %v8085_v53, %v3539_v37 }
 0x497   :  { %v3514_v44 = vsel %vm3513_vm0, %v4768_v16, %v3510_v7  ;;  %v8108_v40 = vadd.f32 1.0, %v4776_v26  ;;  %vm3571_vm0 = vweird.f32 %v8092_v27 }
 0x498   :  { %v3519_v36 = vsel %vm3516_vm2, %v3518_v22, %v3514_v44  ;;  %4777 = vrcp.f32 %v8090_v60  ;;  %v3544_v9 = vsel %vm3543_vm11, %v8085_v53, %v3540_v30  ;;  %v3562_v54 = vand.u32 2147483648, %v8090_v60 }
 0x499   :  { %v3762_v14 = vmul.f32 %v3519_v36, %v8054_v5  ;;  %4779 = vrcp.f32 %v8092_v27  ;;  %v3549_v29 = vsel %vm3546_vm12, %v3548_v23, %v3544_v9  ;;  %vm3556_vm14 = vweird.f32 %v8090_v60 }
 0x49a   :  { %4781 = vrcp.f32 %v8108_v40  ;;  %v3764_v8 = vmul.f32 %v3549_v29, %v8035_v39  ;;  %v3560_v53 = vand.u32 2147483647, %v8090_v60  ;;  %v3563_v35 = vor.u32 1.1754944e-38, %v3562_v54 }
 0x49b   :  { %v3926_v48 = vpop.f32.mrf.mxu3  ;;  %4223 = vmatmul.msk.f32.gmra.mxu3 %vm879_vm4, %v3762_v14  ;;  %vm3576_vm2 = vcmp.eq.f32.partialorder %v3575_v19, 8.507059e+37  ;;  %vm3586_vm7 = vweird.f32 %v8108_v40  ;;  %v3590_v30 = vand.u32 2147483647, %v8108_v40 }
 0x49c   :  { %v3927_v5 = vadd.f32 %v8105_v38, %v3926_v48  ;;  %vm3561_vm6 = vcmp.eq.f32.partialorder %v3560_v53, 8.507059e+37 }
 0x49d   :  { %vm3591_vm9 = vcmp.eq.f32.partialorder %v3590_v30, 8.507059e+37 }
 0x49e   :  { %v4778_v15 = vpop.eup %4777  ;;  %4004 = vst [vmem:[#allocation5 + $0x48] sm:$0xff] %v3927_v5  ;;  %v3592_v5 = vand.u32 2147483648, %v8108_v40 }
 0x49f   :  { %v3552_v13 = vmul.f32 %v4778_v15, %v8090_v60  ;;  %v4780_v28 = vpop.eup %4779  ;;  %vm3557_vm13 = vweird.f32 %v4778_v15  ;;  %v3577_v60 = vand.u32 2147483648, %v8092_v27 }
 0x4a0   :  { %v3567_v11 = vmul.f32 %v4780_v28, %v8092_v27  ;;  %v8122_v63 = vpop.eup %4781  ;;  %vm3558_vm5 = vmor %vm3556_vm14, %vm3557_vm13  ;;  %vm3572_vm15 = vweird.f32 %v4780_v28 }
 0x4a1   :  { %v3553_v12 = vsub.f32 1.0, %v3552_v13  ;;  %v3582_v33 = vmul.f32 %v8122_v63, %v8108_v40  ;;  %vm3573_vm1 = vmor %vm3571_vm0, %vm3572_vm15  ;;  %v3578_v26 = vor.u32 1.1754944e-38, %v3577_v60  ;;  %vm3587_vm3 = vweird.f32 %v8122_v63 }
 0x4a2   :  { %v3568_v62 = vsub.f32 1.0, %v3567_v11  ;;  %vm8150_vm8 = vmor %vm3586_vm7, %vm3587_vm3 }
 0x4a3   :  { %v3929_v49 = vpop.f32.mrf.mxu3  ;;  %4224 = vmatmul.msk.f32.gmra.mxu3 %vm879_vm4, %v3763_v46  ;;  %v3554_v42 = vmul.f32 %v4778_v15, %v3553_v12  ;;  %v3583_v22 = vsub.f32 1.0, %v3582_v33  ;;  %v3593_v12 = vor.u32 1.1754944e-38, %v3592_v5 }
 0x4a4   :  { %v3930_v59 = vadd.f32 %v8105_v38, %v3929_v49  ;;  %v3569_v50 = vmul.f32 %v4780_v28, %v3568_v62 }
 0x4a5   :  { %v3555_v16 = vadd.f32 %v4778_v15, %v3554_v42  ;;  %v3584_v14 = vmul.f32 %v8122_v63, %v3583_v22 }
 0x4a6   :  { %4005 = vst [vmem:[#allocation5 + $0x50] sm:$0xff] %v3930_v59  ;;  %v3570_v7 = vadd.f32 %v4780_v28, %v3569_v50 }
 0x4a7   :  { %v3559_v31 = vsel %vm3558_vm5, %v4778_v15, %v3555_v16  ;;  %v3585_v27 = vadd.f32 %v8122_v63, %v3584_v14 }
 0x4a8   :  { %v3564_v39 = vsel %vm3561_vm6, %v3563_v35, %v3559_v31  ;;  %v3574_v34 = vsel %vm3573_vm1, %v4780_v28, %v3570_v7  ;;  %v8184_v35 = vld [vmem:[%s8341_s9] ss:$0 sm:$0xff] }
 0x4a9   :  { %v3765_v56 = vmul.f32 %v3564_v39, %v8079_v41  ;;  %v3579_v41 = vsel %vm3576_vm2, %v3578_v26, %v3574_v34 }
 0x4aa   :  { %v3766_v2 = vmul.f32 %v3579_v41, %v8068_v58 }
 0x4ab   :  { %v3932_v24 = vpop.f32.mrf.mxu3  ;;  %4225 = vmatmul.msk.f32.gmra.mxu3 %vm879_vm4, %v3764_v8 }
 0x4ac   :  { %v3933_v25 = vadd.f32 %v8105_v38, %v3932_v24 }
 0x4ad   :  { %v2622_v18 = vpop.xlane.xlu0 %2621 }
 0x4ae   :  { %4006 = vst [vmem:[#allocation5 + $0x58] sm:$0xff] %v3933_v25  ;;  %v2672_v32 = vmul.f32 %v2622_v18, %v7152_v43 }
 0x4b0   :  { %v2704_v44 = vadd.f32 1e-05, %v2672_v32 }
 0x4b2   :  { %4783 = vrsqrt.f32 %v2704_v44  ;;  %vm2940_vm11 = vweird.f32 %v2704_v44 }
 0x4b3   :  { %v3935_v36 = vpop.f32.mrf.mxu3  ;;  %4226 = vmatmul.msk.f32.gmra.mxu3 %vm879_vm4, %v3765_v56 }
 0x4b4   :  { %v3936_v20 = vadd.f32 %v8105_v38, %v3935_v36 }
 0x4b5   :  { %v2628_v48 = vpop.xlane.xlu1 %2627  ;;  %v2444_v51 = vpop.xlane.xlu0 %2443 }
 0x4b6   :  { %4007 = vst [vmem:[#allocation5 + $0x60] sm:$0xff] %v3936_v20  ;;  %v2487_v37 = vmul.f32 %v7152_v43, %v2444_v51  ;;  %v2674_v59 = vmul.f32 %v2628_v48, %v7152_v43 }
 0x4b8   :  { %v4784_v0 = vpop.eup %4783  ;;  %v8145_v15 = vsub.f32 %v7949_v4, %v2487_v37  ;;  %v3589_v4 = vsel %vm8150_vm8, %v8122_v63, %v3585_v27  ;;  %v2706_v54 = vadd.f32 1e-05, %v2674_v59 }
 0x4b9   :  { %v2935_v13 = vmul.f32 %v4784_v0, %v2704_v44  ;;  %v3594_v11 = vsel %vm3591_vm9, %v3593_v12, %v3589_v4  ;;  %vm2941_vm10 = vweird.f32 %v4784_v0 }
 0x4ba   :  { %v2551_v46 = vmul.f32 %v8145_v15, %v8145_v15  ;;  %v3767_v16 = vmul.f32 %v3594_v11, %v8083_v57  ;;  %vm2942_vm12 = vmor %vm2940_vm11, %vm2941_vm10  ;;  %4785 = vrsqrt.f32 %v2706_v54  ;;  %v8177_v57 = vld [vmem:[%s8340_s8] ss:$0 sm:$0xff]  ;;  %vm2960_vm5 = vweird.f32 %v2706_v54 }
 0x4bb   :  { %v3938_v10 = vpop.f32.mrf.mxu3  ;;  %4227 = vmatmul.msk.f32.gmra.mxu3 %vm879_vm4, %v3766_v2  ;;  %v2936_v58 = vmul.f32 %v4784_v0, %v2935_v13 }
 0x4bc   :  { %v3939_v17 = vadd.f32 %v8105_v38, %v3938_v10  ;;  %v2641_v40 = vsel %vm879_vm4, %v2551_v46, 0.0 }
 0x4bd   :  { %v2450_v49 = vpop.xlane.xlu1 %2449  ;;  %v2937_v9 = vmul.f32 0.5, %v2936_v58  ;;  %2642 = vadd.xlane.f32.xlu2 %v2641_v40  ;;  %v2631_v50 = vpop.xlane.xlu0 %2630 }
 0x4be   :  { %4008 = vst [vmem:[#allocation5 + $0x68] sm:$0xff] %v3939_v17  ;;  %v2489_v42 = vmul.f32 %v7152_v43, %v2450_v49  ;;  %v2675_v25 = vmul.f32 %v2631_v50, %v7152_v43 }
 0x4bf   :  { %v2938_v23 = vsub.f32 1.5, %v2937_v9 }
 0x4c0   :  { %v8165_v29 = vsub.f32 %v7962_v47, %v2489_v42  ;;  %v2707_v39 = vadd.f32 1e-05, %v2675_v25  ;;  %v4786_v32 = vpop.eup %4785 }
 0x4c1   :  { %v2939_v62 = vmul.f32 %v4784_v0, %v2938_v23  ;;  %v2955_v7 = vmul.f32 %v4786_v32, %v2706_v54  ;;  %vm2961_vm13 = vweird.f32 %v4786_v32 }
 0x4c2   :  { %v2553_v63 = vmul.f32 %v8165_v29, %v8165_v29  ;;  %vm2962_vm6 = vmor %vm2960_vm5, %vm2961_vm13  ;;  %vm2970_vm3 = vweird.f32 %v2707_v39 }
 0x4c3   :  { %v3941_v8 = vpop.f32.mrf.mxu3  ;;  %4228 = vmatmul.msk.f32.gmra.mxu3 %vm879_vm4, %v3767_v16  ;;  %v2943_v53 = vsel %vm2942_vm12, %v4784_v0, %v2939_v62  ;;  %v2956_v60 = vmul.f32 %v4786_v32, %v2955_v7 }
 0x4c4   :  { %v3942_v24 = vadd.f32 %v8105_v38, %v3941_v8  ;;  %v2647_v31 = vsel %vm879_vm4, %v2553_v63, 0.0  ;;  %v3056_v47 = vmul.f32 %v2943_v53, %v7925_v1 }
 0x4c5   :  { %2648 = vadd.xlane.f32.xlu1 %v2647_v31  ;;  %v2957_v36 = vmul.f32 0.5, %v2956_v60 }
 0x4c6   :  { %4009 = vst [vmem:[#allocation5 + $0x70] sm:$0xff] %v3942_v24  ;;  %v3092_v33 = vmul.f32 %v8177_v57, %v3056_v47 }
 0x4c7   :  { %v2958_v26 = vsub.f32 1.5, %v2957_v36 }
 0x4c8   :  { %v3128_v1 = vadd.f32 %v8184_v35, %v3092_v33 }
 0x4c9   :  { %v2959_v27 = vmul.f32 %v4786_v32, %v2958_v26 }
 0x4ca   :  { %v4197_v18 = vmul.f32 -1.442695, %v3128_v1 }
 0x4cb   :  { %v2963_v10 = vsel %vm2962_vm6, %v4786_v32, %v2959_v27 }
 0x4cc   :  { %4787 = vpow2.f32 %v4197_v18  ;;  %v3058_v9 = vmul.f32 %v2963_v10, %v7946_v55 }
 0x4cd   :  { %4789 = vrsqrt.f32 %v2707_v39  ;;  %v2637_v56 = vpop.xlane.xlu0 %2636 }
 0x4ce   :  { %v2677_v34 = vmul.f32 %v2637_v56, %v7152_v43  ;;  %v3094_v63 = vmul.f32 %v8177_v57, %v3058_v9 }
 0x4d0   :  { %v8188_v48 = vadd.f32 1e-05, %v2677_v34  ;;  %v8207_v25 = vadd.f32 %v8184_v35, %v3094_v63 }
 0x4d2   :  { %v4788_v22 = vpop.eup %4787  ;;  %vm2990_vm12 = vweird.f32 %v8188_v48 }
 0x4d3   :  { %v3256_v44 = vadd.f32 1.0, %v4788_v22  ;;  %v4790_v19 = vpop.eup %4789 }
 0x4d4   :  { %v2965_v14 = vmul.f32 %v4790_v19, %v2707_v39  ;;  %vm2971_vm2 = vweird.f32 %v4790_v19 }
 0x4d5   :  { %4791 = vrcp.f32 %v3256_v44  ;;  %v3607_v5 = vand.u32 2147483648, %v3256_v44  ;;  %v3605_v30 = vand.u32 2147483647, %v3256_v44  ;;  %vm3601_vm15 = vweird.f32 %v3256_v44  ;;  %vm2972_vm7 = vmor %vm2970_vm3, %vm2971_vm2 }
 0x4d6   :  { %v2966_v51 = vmul.f32 %v4790_v19, %v2965_v14  ;;  %4793 = vrsqrt.f32 %v8188_v48 }
 0x4d7   :  { %v3608_v4 = vor.u32 1.1754944e-38, %v3607_v5  ;;  %vm3606_vm1 = vcmp.eq.f32.partialorder %v3605_v30, 8.507059e+37 }
 0x4d8   :  { %v2967_v0 = vmul.f32 0.5, %v2966_v51 }
 0x4da   :  { %v2968_v58 = vsub.f32 1.5, %v2967_v0 }
 0x4db   :  { %v4792_v20 = vpop.eup %4791 }
 0x4dc   :  { %v3597_v41 = vmul.f32 %v4792_v20, %v3256_v44  ;;  %vm3602_vm14 = vweird.f32 %v4792_v20  ;;  %v8192_v12 = vpop.eup %4793  ;;  %v2969_v11 = vmul.f32 %v4790_v19, %v2968_v58 }
 0x4dd   :  { %vm3603_vm0 = vmor %vm3601_vm15, %vm3602_vm14  ;;  %v2985_v59 = vmul.f32 %v8192_v12, %v8188_v48  ;;  %vm2991_vm11 = vweird.f32 %v8192_v12 }
 0x4de   :  { %v3598_v37 = vsub.f32 1.0, %v3597_v41  ;;  %v2973_v8 = vsel %vm2972_vm7, %v4790_v19, %v2969_v11  ;;  %vm2992_vm13 = vmor %vm2990_vm12, %vm2991_vm11 }
 0x4df   :  { %v2986_v53 = vmul.f32 %v8192_v12, %v2985_v59 }
 0x4e0   :  { %v3599_v2 = vmul.f32 %v4792_v20, %v3598_v37 }
 0x4e1   :  { %v2987_v39 = vmul.f32 0.5, %v2986_v53 }
 0x4e2   :  { %v3600_v28 = vadd.f32 %v4792_v20, %v3599_v2 }
 0x4e3   :  { %v2625_v13 = vpop.xlane.xlu2 %2624  ;;  %v2988_v19 = vsub.f32 1.5, %v2987_v39 }
 0x4e4   :  { %v2673_v46 = vmul.f32 %v2625_v13, %v7152_v43  ;;  %v3604_v17 = vsel %vm3603_vm0, %v4792_v20, %v3600_v28 }
 0x4e5   :  { %v3609_v49 = vsel %vm3606_vm1, %v3608_v4, %v3604_v17  ;;  %v2989_v51 = vmul.f32 %v8192_v12, %v2988_v19 }
 0x4e6   :  { %v2705_v40 = vadd.f32 1e-05, %v2673_v46  ;;  %v3768_v42 = vmul.f32 %v3609_v49, %v3128_v1  ;;  %v3059_v1 = vmul.f32 %v2973_v8, %v7966_v3 }
 0x4e7   :  { %v2993_v13 = vsel %vm2992_vm13, %v8192_v12, %v2989_v51 }
 0x4e8   :  { %4795 = vrsqrt.f32 %v2705_v40  ;;  %v3944_v23 = vpop.f32.mrf.mxu3  ;;  %4229 = vmatmul.msk.f32.gmra.mxu3 %vm879_vm4, %v3768_v42  ;;  %v3095_v56 = vmul.f32 %v8177_v57, %v3059_v1  ;;  %vm2950_vm9 = vweird.f32 %v2705_v40 }
 0x4e9   :  { %v3945_v16 = vadd.f32 %v8105_v38, %v3944_v23 }
 0x4ea   :  { %v8217_v26 = vadd.f32 %v8184_v35, %v3095_v56 }
 0x4eb   :  { %v2447_v62 = vpop.xlane.xlu2 %2446  ;;  %4010 = vst [vmem:[#allocation5 + $0x78] sm:$0xff] %v3945_v16  ;;  %v2640_v54 = vpop.xlane.xlu1 %2639 }
 0x4ec   :  { %v2488_v55 = vmul.f32 %v7152_v43, %v2447_v62  ;;  %v2678_v24 = vmul.f32 %v2640_v54, %v7152_v43  ;;  %v4200_v2 = vmul.f32 -1.442695, %v8217_v26 }
 0x4ee   :  { %v4796_v31 = vpop.eup %4795  ;;  %v8204_v47 = vsub.f32 %v8028_v61, %v2488_v55  ;;  %v2710_v33 = vadd.f32 1e-05, %v2678_v24  ;;  %v4199_v61 = vmul.f32 -1.442695, %v8207_v25 }
 0x4ef   :  { %v2945_v50 = vmul.f32 %v4796_v31, %v2705_v40  ;;  %vm2951_vm8 = vweird.f32 %v4796_v31 }
 0x4f0   :  { %v2552_v18 = vmul.f32 %v8204_v47, %v8204_v47  ;;  %4797 = vrsqrt.f32 %v2710_v33  ;;  %vm2952_vm10 = vmor %vm2950_vm9, %vm2951_vm8  ;;  %vm3000_vm5 = vweird.f32 %v2710_v33 }
 0x4f1   :  { %v2946_v32 = vmul.f32 %v4796_v31, %v2945_v50  ;;  %4799 = vpow2.f32 %v4199_v61 }
 0x4f2   :  { %v2644_v7 = vsel %vm879_vm4, %v2552_v18, 0.0 }
 0x4f3   :  { %v2947_v22 = vmul.f32 0.5, %v2946_v32  ;;  %v2634_v60 = vpop.xlane.xlu2 %2633  ;;  %2645 = vadd.xlane.f32.xlu0 %v2644_v7 }
 0x4f4   :  { %v2676_v44 = vmul.f32 %v2634_v60, %v7152_v43 }
 0x4f5   :  { %v2948_v36 = vsub.f32 1.5, %v2947_v22 }
 0x4f6   :  { %v2708_v3 = vadd.f32 1e-05, %v2676_v44  ;;  %v4798_v34 = vpop.eup %4797 }
 0x4f7   :  { %v2949_v14 = vmul.f32 %v4796_v31, %v2948_v36  ;;  %v2995_v20 = vmul.f32 %v4798_v34, %v2710_v33  ;;  %v4800_v30 = vpop.eup %4799  ;;  %vm3001_vm14 = vweird.f32 %v4798_v34 }
 0x4f8   :  { %4801 = vrsqrt.f32 %v2708_v3  ;;  %v8231_v48 = vadd.f32 1.0, %v4800_v30  ;;  %vm3002_vm6 = vmor %vm3000_vm5, %vm3001_vm14  ;;  %vm2980_vm0 = vweird.f32 %v2708_v3 }
 0x4f9   :  { %v2953_v41 = vsel %vm2952_vm10, %v4796_v31, %v2949_v14  ;;  %v2996_v27 = vmul.f32 %v4798_v34, %v2995_v20  ;;  %4803 = vpow2.f32 %v4200_v2 }
 0x4fa   :  { %v3057_v37 = vmul.f32 %v2953_v41, %v8010_v45  ;;  %v3061_v45 = vmul.f32 %v2993_v13, %v7982_v6  ;;  %vm3631_vm10 = vweird.f32 %v8231_v48  ;;  %v3635_v30 = vand.u32 2147483647, %v8231_v48 }
 0x4fb   :  { %v2997_v5 = vmul.f32 0.5, %v2996_v27 }
 0x4fc   :  { %v3093_v0 = vmul.f32 %v8177_v57, %v3057_v37  ;;  %v3097_v12 = vmul.f32 %v8177_v57, %v3061_v45  ;;  %vm3636_vm12 = vcmp.eq.f32.partialorder %v3635_v30, 8.507059e+37 }
 0x4fd   :  { %v2998_v10 = vsub.f32 1.5, %v2997_v5 }
 0x4fe   :  { %v4802_v28 = vpop.eup %4801  ;;  %v8227_v46 = vadd.f32 %v8184_v35, %v3093_v0  ;;  %v8237_v16 = vadd.f32 %v8184_v35, %v3097_v12  ;;  %v3637_v0 = vand.u32 2147483648, %v8231_v48 }
 0x4ff   :  { %v2975_v4 = vmul.f32 %v4802_v28, %v2708_v3  ;;  %v2999_v17 = vmul.f32 %v4798_v34, %v2998_v10  ;;  %vm2981_vm15 = vweird.f32 %v4802_v28  ;;  %v4804_v6 = vpop.eup %4803 }
 0x500   :  { %v4198_v58 = vmul.f32 -1.442695, %v8227_v46  ;;  %vm2982_vm1 = vmor %vm2980_vm0, %vm2981_vm15  ;;  %v8239_v55 = vadd.f32 1.0, %v4804_v6  ;;  %v4202_v24 = vmul.f32 -1.442695, %v8237_v16 }
 0x501   :  { %v2976_v40 = vmul.f32 %v4802_v28, %v2975_v4  ;;  %v3003_v9 = vsel %vm3002_vm6, %v4798_v34, %v2999_v17 }
 0x502   :  { %4805 = vpow2.f32 %v4198_v58  ;;  %v3062_v23 = vmul.f32 %v3003_v9, %v8031_v21  ;;  %v3638_v58 = vor.u32 1.1754944e-38, %v3637_v0  ;;  %v3652_v9 = vand.u32 2147483648, %v8239_v55 }
 0x503   :  { %v2977_v49 = vmul.f32 0.5, %v2976_v40  ;;  %4807 = vrcp.f32 %v8231_v48  ;;  %vm3646_vm14 = vweird.f32 %v8239_v55  ;;  %v3650_v6 = vand.u32 2147483647, %v8239_v55 }
 0x504   :  { %v3098_v31 = vmul.f32 %v8177_v57, %v3062_v23 }
 0x505   :  { %v2978_v42 = vsub.f32 1.5, %v2977_v49  ;;  %vm3651_vm6 = vcmp.eq.f32.partialorder %v3650_v6, 8.507059e+37 }
 0x506   :  { %v8252_v1 = vadd.f32 %v8184_v35, %v3098_v31 }
 0x507   :  { %v2979_v11 = vmul.f32 %v4802_v28, %v2978_v42 }
 0x508   :  { %v4806_v59 = vpop.eup %4805  ;;  %v4203_v22 = vmul.f32 -1.442695, %v8252_v1 }
 0x509   :  { %v2983_v62 = vsel %vm2982_vm1, %v4802_v28, %v2979_v11  ;;  %v3257_v63 = vadd.f32 1.0, %v4806_v59  ;;  %v4808_v54 = vpop.eup %4807 }
 0x50a   :  { %v3060_v8 = vmul.f32 %v2983_v62, %v8051_v52  ;;  %v3627_v21 = vmul.f32 %v4808_v54, %v8231_v48  ;;  %vm3632_vm8 = vweird.f32 %v4808_v54 }
 0x50b   :  { %4809 = vrcp.f32 %v3257_v63  ;;  %v3622_v60 = vand.u32 2147483648, %v3257_v63  ;;  %v3620_v19 = vand.u32 2147483647, %v3257_v63  ;;  %vm3616_vm3 = vweird.f32 %v3257_v63  ;;  %vm3633_vm11 = vmor %vm3631_vm10, %vm3632_vm8 }
 0x50c   :  { %v3096_v53 = vmul.f32 %v8177_v57, %v3060_v8  ;;  %4811 = vrcp.f32 %v8239_v55  ;;  %v3628_v18 = vsub.f32 1.0, %v3627_v21  ;;  %v3653_v8 = vor.u32 1.1754944e-38, %v3652_v9 }
 0x50d   :  { %4813 = vpow2.f32 %v4202_v24  ;;  %v3623_v14 = vor.u32 1.1754944e-38, %v3622_v60  ;;  %vm3621_vm9 = vcmp.eq.f32.partialorder %v3620_v19, 8.507059e+37 }
 0x50e   :  { %v8248_v50 = vadd.f32 %v8184_v35, %v3096_v53  ;;  %v3629_v61 = vmul.f32 %v4808_v54, %v3628_v18 }
 0x510   :  { %v4201_v33 = vmul.f32 -1.442695, %v8248_v50  ;;  %v3630_v37 = vadd.f32 %v4808_v54, %v3629_v61 }
 0x511   :  { %v4810_v52 = vpop.eup %4809 }
 0x512   :  { %v3612_v39 = vmul.f32 %v4810_v52, %v3257_v63  ;;  %4815 = vpow2.f32 %v4201_v33  ;;  %v8254_v32 = vpop.eup %4811  ;;  %vm3617_vm2 = vweird.f32 %v4810_v52  ;;  %v3634_v10 = vsel %vm3633_vm11, %v4808_v54, %v3630_v37 }
 0x513   :  { %v4814_v44 = vpop.eup %4813  ;;  %v3642_v36 = vmul.f32 %v8254_v32, %v8239_v55  ;;  %4817 = vpow2.f32 %v4203_v22  ;;  %vm3618_vm7 = vmor %vm3616_vm3, %vm3617_vm2  ;;  %vm3647_vm13 = vweird.f32 %v8254_v32 }
 0x514   :  { %v3613_v7 = vsub.f32 1.0, %v3612_v39  ;;  %v8261_v51 = vadd.f32 1.0, %v4814_v44  ;;  %vm3648_vm5 = vmor %vm3646_vm14, %vm3647_vm13 }
 0x515   :  { %v3643_v27 = vsub.f32 1.0, %v3642_v36 }
 0x516   :  { %v3614_v56 = vmul.f32 %v4810_v52, %v3613_v7  ;;  %v3682_v19 = vand.u32 2147483648, %v8261_v51 }
 0x517   :  { %v3644_v4 = vmul.f32 %v8254_v32, %v3643_v27 }
 0x518   :  { %v4816_v3 = vpop.eup %4815  ;;  %v3615_v34 = vadd.f32 %v4810_v52, %v3614_v56  ;;  %v3683_v27 = vor.u32 1.1754944e-38, %v3682_v19 }
 0x519   :  { %v8259_v20 = vadd.f32 1.0, %v4816_v3  ;;  %v4818_v13 = vpop.eup %4817  ;;  %v3645_v48 = vadd.f32 %v8254_v32, %v3644_v4 }
 0x51a   :  { %v3619_v41 = vsel %vm3618_vm7, %v4810_v52, %v3615_v34  ;;  %v8272_v40 = vadd.f32 1.0, %v4818_v13  ;;  %vm3676_vm7 = vweird.f32 %v8261_v51  ;;  %v3680_v34 = vand.u32 2147483647, %v8261_v51 }
 0x51b   :  { %v3624_v5 = vsel %vm3621_vm9, %v3623_v14, %v3619_v41  ;;  %4819 = vrcp.f32 %v8259_v20  ;;  %v3649_v23 = vsel %vm3648_vm5, %v8254_v32, %v3645_v48  ;;  %v3667_v31 = vand.u32 2147483648, %v8259_v20 }
 0x51c   :  { %v3769_v2 = vmul.f32 %v3624_v5, %v8227_v46  ;;  %4821 = vrcp.f32 %v8261_v51  ;;  %v3639_v46 = vsel %vm3636_vm12, %v3638_v58, %v3634_v10  ;;  %vm3661_vm0 = vweird.f32 %v8259_v20 }
 0x51d   :  { %v3770_v42 = vmul.f32 %v3639_v46, %v8207_v25  ;;  %4823 = vrcp.f32 %v8272_v40  ;;  %v3654_v25 = vsel %vm3651_vm6, %v3653_v8, %v3649_v23  ;;  %v3665_v33 = vand.u32 2147483647, %v8259_v20 }
 0x51e   :  { %v3947_v28 = vpop.f32.mrf.mxu3  ;;  %4230 = vmatmul.msk.f32.gmra.mxu3 %vm879_vm4, %v3769_v2  ;;  %v3771_v21 = vmul.f32 %v3654_v25, %v8217_v26  ;;  %v3668_v22 = vor.u32 1.1754944e-38, %v3667_v31  ;;  %vm3681_vm9 = vcmp.eq.f32.partialorder %v3680_v34, 8.507059e+37  ;;  %vm3691_vm11 = vweird.f32 %v8272_v40 }
 0x51f   :  { %v3948_v45 = vadd.f32 %v8105_v38, %v3947_v28  ;;  %vm3666_vm2 = vcmp.eq.f32.partialorder %v3665_v33, 8.507059e+37  ;;  %v3695_v30 = vand.u32 2147483647, %v8272_v40 }
 0x521   :  { %v4820_v17 = vpop.eup %4819  ;;  %4011 = vst [vmem:[#allocation5 + $0x80] sm:$0xff] %v3948_v45  ;;  %vm3696_vm13 = vcmp.eq.f32.partialorder %v3695_v30, 8.507059e+37 }
 0x522   :  { %v3657_v49 = vmul.f32 %v4820_v17, %v8259_v20  ;;  %v4822_v12 = vpop.eup %4821  ;;  %vm3662_vm15 = vweird.f32 %v4820_v17 }
 0x523   :  { %v3672_v63 = vmul.f32 %v4822_v12, %v8261_v51  ;;  %v4824_v24 = vpop.eup %4823  ;;  %vm3663_vm1 = vmor %vm3661_vm0, %vm3662_vm15  ;;  %vm3677_vm3 = vweird.f32 %v4822_v12 }
 0x524   :  { %v3658_v11 = vsub.f32 1.0, %v3657_v49  ;;  %v3687_v32 = vmul.f32 %v4824_v24, %v8272_v40  ;;  %vm3678_vm8 = vmor %vm3676_vm7, %vm3677_vm3  ;;  %vm3692_vm10 = vweird.f32 %v4824_v24 }
 0x525   :  { %v3673_v55 = vsub.f32 1.0, %v3672_v63  ;;  %vm3693_vm12 = vmor %vm3691_vm11, %vm3692_vm10 }
 0x526   :  { %v3950_v59 = vpop.f32.mrf.mxu3  ;;  %4231 = vmatmul.msk.f32.gmra.mxu3 %vm879_vm4, %v3770_v42  ;;  %v3659_v62 = vmul.f32 %v4820_v17, %v3658_v11  ;;  %v3688_v56 = vsub.f32 1.0, %v3687_v32 }
 0x527   :  { %v3951_v54 = vadd.f32 %v8105_v38, %v3950_v59  ;;  %v3674_v39 = vmul.f32 %v4822_v12, %v3673_v55 }
 0x528   :  { %v3660_v53 = vadd.f32 %v4820_v17, %v3659_v62  ;;  %v3689_v41 = vmul.f32 %v4824_v24, %v3688_v56 }
 0x529   :  { %4012 = vst [vmem:[#allocation5 + $0x88] sm:$0xff] %v3951_v54  ;;  %v3675_v44 = vadd.f32 %v4822_v12, %v3674_v39 }
 0x52a   :  { %v3664_v18 = vsel %vm3663_vm1, %v4820_v17, %v3660_v53  ;;  %v3690_v0 = vadd.f32 %v4824_v24, %v3689_v41 }
 0x52b   :  { %v3669_v61 = vsel %vm3666_vm2, %v3668_v22, %v3664_v18  ;;  %v3679_v20 = vsel %vm3678_vm8, %v4822_v12, %v3675_v44 }
 0x52c   :  { %v3772_v3 = vmul.f32 %v3669_v61, %v8248_v50  ;;  %v3684_v5 = vsel %vm3681_vm9, %v3683_v27, %v3679_v20  ;;  %v3697_v50 = vand.u32 2147483648, %v8272_v40  ;;  %v3694_v10 = vsel %vm3693_vm12, %v4824_v24, %v3690_v0 }
 0x52d   :  { %v3773_v51 = vmul.f32 %v3684_v5, %v8237_v16 }
 0x52e   :  { %v3953_v52 = vpop.f32.mrf.mxu3  ;;  %4232 = vmatmul.msk.f32.gmra.mxu3 %vm879_vm4, %v3771_v21  ;;  %v3698_v58 = vor.u32 1.1754944e-38, %v3697_v50 }
 0x52f   :  { %v3954_v7 = vadd.f32 %v8105_v38, %v3953_v52 }
 0x530   :  { %v2643_v60 = vpop.xlane.xlu2 %2642  ;;  %v3699_v48 = vsel %vm3696_vm13, %v3698_v58, %v3694_v10 }
 0x531   :  { %4013 = vst [vmem:[#allocation5 + $0x90] sm:$0xff] %v3954_v7  ;;  %v2679_v26 = vmul.f32 %v2643_v60, %v7152_v43  ;;  %v3774_v40 = vmul.f32 %v3699_v48, %v8252_v1 }
 0x533   :  { %v2711_v36 = vadd.f32 1e-05, %v2679_v26 }
 0x535   :  { %4825 = vrsqrt.f32 %v2711_v36  ;;  %vm3010_vm5 = vweird.f32 %v2711_v36 }
 0x536   :  { %v3956_v14 = vpop.f32.mrf.mxu3  ;;  %4233 = vmatmul.msk.f32.gmra.mxu3 %vm879_vm4, %v3772_v3 }
 0x537   :  { %v3957_v37 = vadd.f32 %v8105_v38, %v3956_v14 }
 0x538   :  { %v2649_v17 = vpop.xlane.xlu1 %2648 }
 0x539   :  { %4014 = vst [vmem:[#allocation5 + $0x98] sm:$0xff] %v3957_v37  ;;  %v2681_v49 = vmul.f32 %v2649_v17, %v7152_v43 }
 0x53b   :  { %v4826_v2 = vpop.eup %4825  ;;  %v2713_v6 = vadd.f32 1e-05, %v2681_v49 }
 0x53c   :  { %v3005_v13 = vmul.f32 %v4826_v2, %v2711_v36  ;;  %vm3011_vm14 = vweird.f32 %v4826_v2 }
 0x53d   :  { %vm3012_vm6 = vmor %vm3010_vm5, %vm3011_vm14  ;;  %4827 = vrsqrt.f32 %v2713_v6  ;;  %vm3030_vm1 = vweird.f32 %v2713_v6 }
 0x53e   :  { %v3959_v28 = vpop.f32.mrf.mxu3  ;;  %4234 = vmatmul.msk.f32.gmra.mxu3 %vm879_vm4, %v3773_v51  ;;  %v3006_v4 = vmul.f32 %v4826_v2, %v3005_v13 }
 0x53f   :  { %v3960_v45 = vadd.f32 %v8105_v38, %v3959_v28 }
 0x540   :  { %v3007_v46 = vmul.f32 0.5, %v3006_v4 }
 0x541   :  { %4015 = vst [vmem:[#allocation5 + $0xa0] sm:$0xff] %v3960_v45 }
 0x542   :  { %v3008_v16 = vsub.f32 1.5, %v3007_v46 }
 0x543   :  { %v4828_v1 = vpop.eup %4827 }
 0x544   :  { %v3009_v12 = vmul.f32 %v4826_v2, %v3008_v16  ;;  %v3025_v54 = vmul.f32 %v4828_v1, %v2713_v6  ;;  %vm3031_vm15 = vweird.f32 %v4828_v1 }
 0x545   :  { %vm3032_vm2 = vmor %vm3030_vm1, %vm3031_vm15 }
 0x546   :  { %v3962_v9 = vpop.f32.mrf.mxu3  ;;  %4235 = vmatmul.msk.f32.gmra.mxu3 %vm879_vm4, %v3774_v40  ;;  %v3013_v42 = vsel %vm3012_vm6, %v4826_v2, %v3009_v12  ;;  %v3026_v53 = vmul.f32 %v4828_v1, %v3025_v54 }
 0x547   :  { %v3963_v11 = vadd.f32 %v8105_v38, %v3962_v9  ;;  %v3063_v59 = vmul.f32 %v3013_v42, %v8145_v15 }
 0x548   :  { %v3027_v55 = vmul.f32 0.5, %v3026_v53 }
 0x549   :  { %4016 = vst [vmem:[#allocation5 + $0xa8] sm:$0xff] %v3963_v11  ;;  %v3099_v23 = vmul.f32 %v8177_v57, %v3063_v59 }
 0x54a   :  { %v3028_v31 = vsub.f32 1.5, %v3027_v55 }
 0x54b   :  { %v3135_v62 = vadd.f32 %v8184_v35, %v3099_v23 }
 0x54c   :  { %v3029_v52 = vmul.f32 %v4828_v1, %v3028_v31 }
 0x54d   :  { %v4204_v63 = vmul.f32 -1.442695, %v3135_v62 }
 0x54e   :  { %v3033_v61 = vsel %vm3032_vm2, %v4828_v1, %v3029_v52 }
 0x54f   :  { %4829 = vpow2.f32 %v4204_v63  ;;  %v3065_v36 = vmul.f32 %v3033_v61, %v8165_v29 }
 0x551   :  { %v3101_v14 = vmul.f32 %v8177_v57, %v3065_v36 }
 0x553   :  { %v3137_v41 = vadd.f32 %v8184_v35, %v3101_v14 }
 0x555   :  { %v4830_v8 = vpop.eup %4829  ;;  %v4206_v5 = vmul.f32 -1.442695, %v3137_v41 }
 0x556   :  { %v3263_v25 = vadd.f32 1.0, %v4830_v8 }
 0x558   :  { %4831 = vrcp.f32 %v3263_v25  ;;  %v3712_v15 = vand.u32 2147483648, %v3263_v25  ;;  %v3710_v39 = vand.u32 2147483647, %v3263_v25  ;;  %vm3706_vm3 = vweird.f32 %v3263_v25 }
 0x55a   :  { %v3713_v60 = vor.u32 1.1754944e-38, %v3712_v15  ;;  %vm3711_vm8 = vcmp.eq.f32.partialorder %v3710_v39, 8.507059e+37 }
 0x55e   :  { %v4832_v24 = vpop.eup %4831 }
 0x55f   :  { %v3702_v21 = vmul.f32 %v4832_v24, %v3263_v25  ;;  %vm3707_vm0 = vweird.f32 %v4832_v24 }
 0x560   :  { %vm3708_vm7 = vmor %vm3706_vm3, %vm3707_vm0 }
 0x561   :  { %v3703_v33 = vsub.f32 1.0, %v3702_v21  ;;  %v4885_v21 = vld [vmem:[%s8343_s11] ss:$0 sm:$0xff] }
 0x563   :  { %v3704_v18 = vmul.f32 %v4832_v24, %v3703_v33 }
 0x565   :  { %v3705_v7 = vadd.f32 %v4832_v24, %v3704_v18 }
 0x566   :  { %v2646_v32 = vpop.xlane.xlu0 %2645 }
 0x567   :  { %v2680_v22 = vmul.f32 %v2646_v32, %v7152_v43  ;;  %v3709_v26 = vsel %vm3708_vm7, %v4832_v24, %v3705_v7 }
 0x568   :  { %v3714_v56 = vsel %vm3711_vm8, %v3713_v60, %v3709_v26 }
 0x569   :  { %v2712_v44 = vadd.f32 1e-05, %v2680_v22  ;;  %v3775_v19 = vmul.f32 %v3714_v56, %v3135_v62 }
 0x56b   :  { %4833 = vrsqrt.f32 %v2712_v44  ;;  %v3965_v3 = vpop.f32.mrf.mxu3  ;;  %4236 = vmatmul.msk.f32.gmra.mxu3 %vm879_vm4, %v3775_v19  ;;  %vm3020_vm10 = vweird.f32 %v2712_v44 }
 0x56c   :  { %v3966_v34 = vadd.f32 %v8105_v38, %v3965_v3  ;;  %4835 = vpow2.f32 %v4206_v5 }
 0x56e   :  { %4017 = vst [vmem:[#allocation5 + $0xb0] sm:$0xff] %v3966_v34 }
 0x571   :  { %v4834_v43 = vpop.eup %4833 }
 0x572   :  { %v3015_v20 = vmul.f32 %v4834_v43, %v2712_v44  ;;  %vm3021_vm9 = vweird.f32 %v4834_v43  ;;  %v4836_v30 = vpop.eup %4835 }
 0x573   :  { %vm3022_vm11 = vmor %vm3020_vm10, %vm3021_vm9  ;;  %v3265_v10 = vadd.f32 1.0, %v4836_v30 }
 0x574   :  { %v3016_v37 = vmul.f32 %v4834_v43, %v3015_v20 }
 0x575   :  { %v3742_v59 = vand.u32 2147483648, %v3265_v10  ;;  %vm3736_vm15 = vweird.f32 %v3265_v10  ;;  %v3740_v62 = vand.u32 2147483647, %v3265_v10 }
 0x576   :  { %v3017_v27 = vmul.f32 0.5, %v3016_v37 }
 0x577   :  { %v3743_v8 = vor.u32 1.1754944e-38, %v3742_v59  ;;  %vm3741_vm1 = vcmp.eq.f32.partialorder %v3740_v62, 8.507059e+37 }
 0x578   :  { %v3018_v0 = vsub.f32 1.5, %v3017_v27 }
 0x57a   :  { %v3019_v50 = vmul.f32 %v4834_v43, %v3018_v0 }
 0x57c   :  { %v3023_v29 = vsel %vm3022_vm11, %v4834_v43, %v3019_v50 }
 0x57d   :  { %v3064_v2 = vmul.f32 %v3023_v29, %v8204_v47 }
 0x57f   :  { %v3100_v51 = vmul.f32 %v8177_v57, %v3064_v2 }
 0x581   :  { %v3136_v13 = vadd.f32 %v8184_v35, %v3100_v51 }
 0x583   :  { %v4205_v28 = vmul.f32 -1.442695, %v3136_v13 }
 0x585   :  { %4837 = vpow2.f32 %v4205_v28 }
 0x586   :  { %4839 = vrcp.f32 %v3265_v10 }
 0x58b   :  { %v4838_v4 = vpop.eup %4837 }
 0x58c   :  { %v3264_v45 = vadd.f32 1.0, %v4838_v4  ;;  %v4840_v58 = vpop.eup %4839 }
 0x58d   :  { %v3732_v17 = vmul.f32 %v4840_v58, %v3265_v10  ;;  %vm3737_vm6 = vweird.f32 %v4840_v58 }
 0x58e   :  { %4841 = vrcp.f32 %v3264_v45  ;;  %v3727_v40 = vand.u32 2147483648, %v3264_v45  ;;  %v3725_v57 = vand.u32 2147483647, %v3264_v45  ;;  %vm3721_vm13 = vweird.f32 %v3264_v45  ;;  %vm3738_vm0 = vmor %vm3736_vm15, %vm3737_vm6 }
 0x58f   :  { %v3733_v16 = vsub.f32 1.0, %v3732_v17 }
 0x590   :  { %v3728_v35 = vor.u32 1.1754944e-38, %v3727_v40  ;;  %vm3726_vm5 = vcmp.eq.f32.partialorder %v3725_v57, 8.507059e+37 }
 0x591   :  { %v3734_v12 = vmul.f32 %v4840_v58, %v3733_v16 }
 0x593   :  { %v3735_v6 = vadd.f32 %v4840_v58, %v3734_v12 }
 0x594   :  { %v4842_v46 = vpop.eup %4841 }
 0x595   :  { %v3717_v48 = vmul.f32 %v4842_v46, %v3264_v45  ;;  %vm3722_vm12 = vweird.f32 %v4842_v46  ;;  %v3739_v1 = vsel %vm3738_vm0, %v4840_v58, %v3735_v6 }
 0x596   :  { %vm3723_vm14 = vmor %vm3721_vm13, %vm3722_vm12  ;;  %v3744_v25 = vsel %vm3741_vm1, %v3743_v8, %v3739_v1 }
 0x597   :  { %v3718_v49 = vsub.f32 1.0, %v3717_v48  ;;  %v3777_v53 = vmul.f32 %v3744_v25, %v3137_v41 }
 0x599   :  { %v3719_v47 = vmul.f32 %v4842_v46, %v3718_v49 }
 0x59b   :  { %v3720_v9 = vadd.f32 %v4842_v46, %v3719_v47 }
 0x59d   :  { %v3724_v42 = vsel %vm3723_vm14, %v4842_v46, %v3720_v9 }
 0x59e   :  { %v3729_v11 = vsel %vm3726_vm5, %v3728_v35, %v3724_v42 }
 0x59f   :  { %v3776_v23 = vmul.f32 %v3729_v11, %v3136_v13 }
 0x5a1   :  { %v3968_v63 = vpop.f32.mrf.mxu3  ;;  %4237 = vmatmul.msk.f32.gmra.mxu3 %vm879_vm4, %v3776_v23 }
 0x5a2   :  { %v3969_v54 = vadd.f32 %v8105_v38, %v3968_v63 }
 0x5a4   :  { %4018 = vst [vmem:[#allocation5 + $0xb8] sm:$0xff] %v3969_v54 }
 0x5a9   :  { %v3971_v55 = vpop.f32.mrf.mxu3  ;;  %4238 = vmatmul.msk.f32.gmra.mxu3 %vm879_vm4, %v3777_v53 }
 0x5aa   :  { %v3972_v24 = vadd.f32 %v8105_v38, %v3971_v55 }
 0x5ac   :  { %4019 = vst [vmem:[#allocation5 + $0xc0] sm:$0xff] %v3972_v24 }
 0x5b1   :  { %v3974_v31 = vpop.f32.mrf.mxu3 }
 0x5b2   :  { %v3975_v33 = vadd.f32 %v4885_v21, %v3974_v31 }
 0x5b4   :  { %4020 = vst [vmem:[#allocation5 + $0xc8] sm:$0xff] %v3975_v33 }
 0x5b9   :  { %v3977_v15 = vpop.f32.mrf.mxu3 }
 0x5ba   :  { %v3978_v52 = vadd.f32 %v4885_v21, %v3977_v15 }
 0x5bc   :  { %4021 = vst [vmem:[#allocation5 + $0xd0] sm:$0xff] %v3978_v52 }
 0x5c1   :  { %v3980_v18 = vpop.f32.mrf.mxu3 }
 0x5c2   :  { %v3981_v39 = vadd.f32 %v4885_v21, %v3980_v18 }
 0x5c4   :  { %4022 = vst [vmem:[#allocation5 + $0xd8] sm:$0xff] %v3981_v39 }
 0x5c9   :  { %v3983_v32 = vpop.f32.mrf.mxu3 }
 0x5ca   :  { %v3984_v7 = vadd.f32 %v4885_v21, %v3983_v32 }
 0x5cc   :  { %4023 = vst [vmem:[#allocation5 + $0xe0] sm:$0xff] %v3984_v7 }
 0x5ee   :  { %v3986_v22 = vpop.f32.mrf.mxu3 }
 0x5ef   :  { %v3987_v60 = vadd.f32 %v4885_v21, %v3986_v22 }
 0x5f1   :  { %4024 = vst [vmem:[#allocation5 + $0xe8] sm:$0xff] %v3987_v60 }
 0x624   :  { %v3989_v38 = vpop.f32.mrf.mxu3 }
 0x625   :  { %v3990_v61 = vadd.f32 %v4885_v21, %v3989_v38 }
 0x627   :  { %4025 = vst [vmem:[#allocation5 + $0xf0] sm:$0xff] %v3990_v61 }
 0x62c   :  { %v3992_v26 = vpop.f32.mrf.mxu3 }
 0x62d   :  { %v3993_v44 = vadd.f32 %v4885_v21, %v3992_v26 }
 0x62f   :  { %4026 = vst [vmem:[#allocation5 + $0xf8] sm:$0xff] %v3993_v44 }
 0x630   :  { %4039 = dma.vmem_to_hbm [thread:$0]  %s4032_s17, 4096, %s4034_s3, [#allocation3], %s4934_s20, %s4934_s20, %s4935_s6  }
 0x631   :  { %4924 = dma.done.wait [#allocation3], 4096  }
 0x632   :  { %4925 = vsyncadd [#allocation3], 4294963200 }
 0x633   :  { %4044 = vsyncpa [#allocation3], 1 }
 0x634   :  { %4045 = vsyncpa [#allocation4], 1 }

</bundles_post_ra>
